<compile_context>
chip_gen: v5e
topology: v5e:2x2
jax: 0.10.0
libtpu: 0.0.40
codegen_flags: <defaults>
</compile_context>

<pallas_src>
import functools
import math

import jax
import jax.numpy as jnp
from jax.experimental import pallas as pl
from jax.experimental.pallas import tpu as pltpu


# ----------------------------- small helpers -----------------------------

def _layer_norm(x, gamma, beta, eps):
    mu = jnp.mean(x, axis=-1, keepdims=True)
    xc = x - mu
    var = jnp.mean(xc * xc, axis=-1, keepdims=True)
    return xc * jax.lax.rsqrt(var + eps) * gamma + beta


def _mm(a, w_bf16):
    """bf16 x bf16 matmul with f32 accumulation (MXU)."""
    return jnp.dot(a.astype(jnp.bfloat16), w_bf16, preferred_element_type=jnp.float32)


def _rep_spec(shape):
    """BlockSpec for an array replicated across the (batch, q-tile) grid."""
    zeros = (0,) * len(shape)
    return pl.BlockSpec(shape, lambda bi, ti: zeros)


def _cparams():
    # Explicit VMEM limit: v5e scoped default is 16 MiB, v6e/v7x 32 MiB; 64 MiB is
    # within physical VMEM on every generation.
    return pltpu.CompilerParams(
        dimension_semantics=("parallel", "parallel"),
        vmem_limit_bytes=64 * 1024 * 1024)


def choose_q_tile(T, x_band_width, h_band_width, q_tile=None):
    """Pick a query-tile length: multiple of 8, divides T, covers both bands."""
    if q_tile is None:
        q_tile = T
        for cand in (512, 256, 128, 64, 32, 16, 8):
            if T % cand == 0 and cand >= max(x_band_width, h_band_width):
                q_tile = cand
                break
    if T % q_tile != 0:
        raise ValueError("sequence length must be divisible by the q tile")
    if q_tile < max(x_band_width, h_band_width):
        raise ValueError("band width must not exceed the q tile")
    if q_tile % 8 != 0 and q_tile != T:
        raise ValueError("q tile must be a multiple of 8 (or the full length)")
    return q_tile


# --------------------- prenet + dec_in_proj (fused, q-tiled) ---------------------

def _prenet_decin_kernel(inp_ref, mem_ref, *args, n_prenet, out_scale):
    o_ref = args[-1]
    w_fc_ref, b_fc_ref, w_in_mem_ref, w_in_pre_ref, b_in_ref = args[2 * n_prenet:-1]

    h = inp_ref[0]                                   # (tq, d_in) f32
    for i in range(n_prenet):
        h = jnp.maximum(_mm(h, args[2 * i][...]) + args[2 * i + 1][...], 0.0)
        # TODO(synk): kantts Prenet applies dropout(p=0.5, training=True) even at eval; omitted.
    h = _mm(h, w_fc_ref[...]) + b_fc_ref[...]
    # dec_in_proj on concat([memory, prenet_out]) == split matmul (no in-kernel concat).
    y = _mm(mem_ref[0], w_in_mem_ref[...]) + _mm(h, w_in_pre_ref[...]) + b_in_ref[...]
    o_ref[0] = y * out_scale


def prenet_decin_pallas(inp, memory, fp, tq):
    B, T, d_in = inp.shape
    d_mem = memory.shape[-1]
    d_model = fp["b_in"].shape[1]
    n_prenet = len(fp["prenet_layers"])
    n_t = T // tq

    weight_args = []
    in_specs = [pl.BlockSpec((1, tq, d_in), lambda bi, ti: (bi, ti, 0)),
                pl.BlockSpec((1, tq, d_mem), lambda bi, ti: (bi, ti, 0))]
    for (w, b) in fp["prenet_layers"]:
        weight_args += [w, b]
        in_specs += [_rep_spec(w.shape), _rep_spec(b.shape)]
    tail = [fp["prenet_fc"][0], fp["prenet_fc"][1],
            fp["w_in_mem"], fp["w_in_pre"], fp["b_in"]]
    weight_args += tail
    in_specs += [_rep_spec(a.shape) for a in tail]

    return pl.pallas_call(
        functools.partial(_prenet_decin_kernel, n_prenet=n_prenet,
                          out_scale=float(d_model) ** 0.5),
        out_shape=jax.ShapeDtypeStruct((B, T, d_model), jnp.float32),
        grid=(B, n_t),
        in_specs=in_specs,
        out_specs=pl.BlockSpec((1, tq, d_model), lambda bi, ti: (bi, ti, 0)),
        compiler_params=_cparams(),
    )(inp, memory, *weight_args)


# ------------------------- fused banded PNCA layer kernel -------------------------

def _pnca_layer_kernel(x_cur_ref, x_prev_ref, mem_cur_ref, mem_next_ref,
                       wq_ref, bq_ref, wkvx_ref, bkvx_ref, wkvh_ref, bkvh_ref,
                       wo_ref, bo_ref, g1_ref, be1_ref,
                       w1_ref, b1_ref, w2_ref, b2_ref, g2_ref, be2_ref,
                       o_ref, attn_ref, *,
                       n_head, d_head, x_bw, h_bw, scale, tq, seq_len):
    t = pl.program_id(1)
    dh_total = n_head * d_head

    x = x_cur_ref[0]                                                 # (tq, d_model) f32
    xw = jnp.concatenate([x_prev_ref[0], x], axis=0)                 # (2tq, d_model)
    mw = jnp.concatenate([mem_cur_ref[0], mem_next_ref[0]], axis=0)  # (2tq, d_mem)

    # Projections: Q only on the current tile, fused K|V on the banded window.
    q = (_mm(x, wq_ref[...]) + bq_ref[...]).astype(jnp.bfloat16)          # (tq, H*dh)
    kvx = (_mm(xw, wkvx_ref[...]) + bkvx_ref[...]).astype(jnp.bfloat16)   # (2tq, 2*H*dh)
    kvh = (_mm(mw, wkvh_ref[...]) + bkvh_ref[...]).astype(jnp.bfloat16)   # (2tq, 2*H*dh)
    kx, vx = kvx[:, :dh_total], kvx[:, dh_total:]
    kh, vh = kvh[:, :dh_total], kvh[:, dh_total:]
    k_all = jnp.concatenate([kx, kh], axis=0)                             # (4tq, H*dh)

    # Band masks on the (tq, 2tq) window only (global positions; window rows that fall
    # outside [0, seq_len) because of edge-tile block clamping are masked out here).
    q_pos = t * tq + jax.lax.broadcasted_iota(jnp.int32, (tq, 2 * tq), 0)
    kx_pos = (t - 1) * tq + jax.lax.broadcasted_iota(jnp.int32, (tq, 2 * tq), 1)
    kh_pos = t * tq + jax.lax.broadcasted_iota(jnp.int32, (tq, 2 * tq), 1)
    x_allow = (kx_pos >= q_pos - x_bw) & (kx_pos <= q_pos) & (kx_pos >= 0)
    h_allow = (kh_pos >= q_pos) & (kh_pos <= q_pos + h_bw) & (kh_pos < seq_len)
    x_bias = jnp.where(x_allow, 0.0, -1e30)
    h_bias = jnp.where(h_allow, 0.0, -1e30)

    def _softmax(s):
        e = jnp.exp(s - jnp.max(s, axis=-1, keepdims=True))
        return e * pl.reciprocal(jnp.sum(e, axis=-1, keepdims=True), approx=True)

    # Per-head banded attention; x-path and h-path scores share one MXU call.
    # Per-head outputs land in a (tq, 2*H*dh) VMEM slab -> one stacked projection.
    for h in range(n_head):
        lo, hi = h * d_head, (h + 1) * d_head
        s = jax.lax.dot_general(q[:, lo:hi], k_all[:, lo:hi],
                                (((1,), (1,)), ((), ())),
                                preferred_element_type=jnp.float32) * scale
        px = _softmax(s[:, :2 * tq] + x_bias)
        ph = _softmax(s[:, 2 * tq:] + h_bias)
        attn_ref[:, lo:hi] = _mm(px, vx[:, lo:hi])
        attn_ref[:, dh_total + lo:dh_total + hi] = _mm(ph, vh[:, lo:hi])

    # Single stacked output projection [fc_x; fc_h] (K = 2*H*dh) + residual + LN.
    y = x + _mm(attn_ref[...], wo_ref[...]) + bo_ref[...]
    z = _layer_norm(y, g1_ref[...], be1_ref[...], eps=1e-5)

    # PositionwiseConvFeedForward with kernel_size (1,1): two pointwise matmuls.
    ff = jnp.maximum(_mm(z, w1_ref[...]) + b1_ref[...], 0.0)
    ff = _mm(ff, w2_ref[...]) + b2_ref[...] + z
    o_ref[0] = _layer_norm(ff, g2_ref[...], be2_ref[...], eps=1e-5)


def pnca_layer_pallas(x, memory, lp, *, n_head, d_head, x_bw, h_bw, tq):
    B, T, d_model = x.shape
    d_mem = memory.shape[-1]
    n_t = T // tq

    weights = [lp["wq"], lp["bq"], lp["wkvx"], lp["bkvx"], lp["wkvh"], lp["bkvh"],
               lp["wo"], lp["bo"], lp["g1"], lp["be1"],
               lp["w1"], lp["b1"], lp["w2"], lp["b2"], lp["g2"], lp["be2"]]

    in_specs = [
        # current q-tile of x
        pl.BlockSpec((1, tq, d_model), lambda bi, ti: (bi, ti, 0)),
        # previous tile of x (clamped at the left edge; out-of-range keys are masked)
        pl.BlockSpec((1, tq, d_model), lambda bi, ti: (bi, jnp.maximum(ti - 1, 0), 0)),
        # current tile of memory
        pl.BlockSpec((1, tq, d_mem), lambda bi, ti: (bi, ti, 0)),
        # next tile of memory (clamped at the right edge; out-of-range keys are masked)
        pl.BlockSpec((1, tq, d_mem), lambda bi, ti: (bi, jnp.minimum(ti + 1, n_t - 1), 0)),
    ] + [_rep_spec(w.shape) for w in weights]

    kernel = functools.partial(
        _pnca_layer_kernel, n_head=n_head, d_head=d_head, x_bw=x_bw, h_bw=h_bw,
        scale=1.0 / math.sqrt(d_head), tq=tq, seq_len=T)

    return pl.pallas_call(
        kernel,
        out_shape=jax.ShapeDtypeStruct((B, T, d_model), jnp.float32),
        grid=(B, n_t),
        in_specs=in_specs,
        out_specs=pl.BlockSpec((1, tq, d_model), lambda bi, ti: (bi, ti, 0)),
        scratch_shapes=[pltpu.VMEM((tq, 2 * n_head * d_head), jnp.float32)],
        compiler_params=_cparams(),
    )(x, x, memory, memory, *weights)


# ----------------------- final LayerNorm + out projection -----------------------

def _final_kernel(x_ref, g_ref, be_ref, w_ref, bo_ref, o_ref):
    z = _layer_norm(x_ref[0], g_ref[...], be_ref[...], eps=1e-6)
    # TODO(synk): d_out < 128 forces masked stores; for production widths pad d_out
    #             (or fold T into the lane axis) wrapper-side for lane-dense stores.
    o_ref[0] = _mm(z, w_ref[...]) + bo_ref[...]


def final_proj_pallas(x, fp, tq):
    B, T, d_model = x.shape
    w, b = fp["out_w"], fp["out_b"]
    d_out = w.shape[1]
    n_t = T // tq
    return pl.pallas_call(
        _final_kernel,
        out_shape=jax.ShapeDtypeStruct((B, T, d_out), jnp.float32),
        grid=(B, n_t),
        in_specs=[pl.BlockSpec((1, tq, d_model), lambda bi, ti: (bi, ti, 0)),
                  _rep_spec(fp["ln_g"].shape), _rep_spec(fp["ln_b"].shape),
                  _rep_spec(w.shape), _rep_spec(b.shape)],
        out_specs=pl.BlockSpec((1, tq, d_out), lambda bi, ti: (bi, ti, 0)),
        compiler_params=_cparams(),
    )(x, fp["ln_g"], fp["ln_b"], w, b)


# ----------------------------- parameters -----------------------------

def _init_linear(key, din, dout, scale=0.08):
    kw, kb = jax.random.split(key)
    w = scale * jax.random.normal(kw, (din, dout), jnp.float32)
    b = 0.01 * jax.random.normal(kb, (dout,), jnp.float32)
    return (w, b)


def init_params(key, d_in, prenet_units, n_layer, d_model, d_mem,
                n_head, d_head, d_inner, d_out):
    keys = jax.random.split(key, 4 + n_layer)
    dh_total = n_head * d_head
    p = {}
    pk = jax.random.split(keys[0], len(prenet_units) + 1)
    dims = [d_in] + list(prenet_units)
    p["prenet_layers"] = [_init_linear(pk[i], dims[i], dims[i + 1])
                          for i in range(len(prenet_units))]
    p["prenet_fc"] = _init_linear(pk[-1], prenet_units[-1], d_model)
    p["dec_in_proj"] = _init_linear(keys[1], d_mem + d_model, d_model)
    p["ln"] = (jnp.ones((d_model,), jnp.float32), jnp.zeros((d_model,), jnp.float32))
    p["dec_out_proj"] = _init_linear(keys[2], d_model, d_out)
    layers = []
    for li in range(n_layer):
        lk = jax.random.split(keys[3 + li], 9)
        layers.append({
            "w_qs": _init_linear(lk[0], d_model, dh_total),
            "w_ks_x": _init_linear(lk[1], d_model, dh_total),
            "w_vs_x": _init_linear(lk[2], d_model, dh_total),
            "w_ks_h": _init_linear(lk[3], d_mem, dh_total),
            "w_vs_h": _init_linear(lk[4], d_mem, dh_total),
            "fc_x": _init_linear(lk[5], dh_total, d_model),
            "fc_h": _init_linear(lk[6], dh_total, d_model),
            "attn_ln": (jnp.ones((d_model,), jnp.float32),
                        jnp.zeros((d_model,), jnp.float32)),
            "ffn_w1": _init_linear(lk[7], d_model, d_inner),
            "ffn_w2": _init_linear(lk[8], d_inner, d_model),
            "ffn_ln": (jnp.ones((d_model,), jnp.float32),
                       jnp.zeros((d_model,), jnp.float32)),
        })
    p["pnca"] = layers
    return p


def preprocess_params(params):
    """One-time host-side weight fusion + bf16 casts (hoisted out of the forward)."""
    d_mem = params["pnca"][0]["w_ks_h"][0].shape[0] if params["pnca"] else \
        params["dec_in_proj"][0].shape[0] - params["dec_in_proj"][0].shape[1]
    fp = {}
    fp["prenet_layers"] = [(w.astype(jnp.bfloat16), b.reshape(1, -1))
                           for (w, b) in params["prenet_layers"]]
    fp["prenet_fc"] = (params["prenet_fc"][0].astype(jnp.bfloat16),
                       params["prenet_fc"][1].reshape(1, -1))
    w_in, b_in = params["dec_in_proj"]
    fp["w_in_mem"] = w_in[:d_mem].astype(jnp.bfloat16)
    fp["w_in_pre"] = w_in[d_mem:].astype(jnp.bfloat16)
    fp["b_in"] = b_in.reshape(1, -1)
    layers = []
    for lp in params["pnca"]:
        layers.append({
            "wq": lp["w_qs"][0].astype(jnp.bfloat16),
            "bq": lp["w_qs"][1].reshape(1, -1),
            "wkvx": jnp.concatenate([lp["w_ks_x"][0], lp["w_vs_x"][0]],
                                    axis=1).astype(jnp.bfloat16),
            "bkvx": jnp.concatenate([lp["w_ks_x"][1], lp["w_vs_x"][1]]).reshape(1, -1),
            "wkvh": jnp.concatenate([lp["w_ks_h"][0], lp["w_vs_h"][0]],
                                    axis=1).astype(jnp.bfloat16),
            "bkvh": jnp.concatenate([lp["w_ks_h"][1], lp["w_vs_h"][1]]).reshape(1, -1),
            # stacked [fc_x; fc_h] and pre-summed bias
            "wo": jnp.concatenate([lp["fc_x"][0], lp["fc_h"][0]],
                                  axis=0).astype(jnp.bfloat16),
            "bo": (lp["fc_x"][1] + lp["fc_h"][1]).reshape(1, -1),
            "g1": lp["attn_ln"][0].reshape(1, -1), "be1": lp["attn_ln"][1].reshape(1, -1),
            "w1": lp["ffn_w1"][0].astype(jnp.bfloat16), "b1": lp["ffn_w1"][1].reshape(1, -1),
            "w2": lp["ffn_w2"][0].astype(jnp.bfloat16), "b2": lp["ffn_w2"][1].reshape(1, -1),
            "g2": lp["ffn_ln"][0].reshape(1, -1), "be2": lp["ffn_ln"][1].reshape(1, -1),
        })
    fp["layers"] = layers
    fp["ln_g"] = params["ln"][0].reshape(1, -1)
    fp["ln_b"] = params["ln"][1].reshape(1, -1)
    fp["out_w"] = params["dec_out_proj"][0].astype(jnp.bfloat16)
    fp["out_b"] = params["dec_out_proj"][1].reshape(1, -1)
    return fp


# ----------------------------- forward -----------------------------

def hybrid_attention_decoder_forward(fparams, inp, memory, x_band_width,
                                     h_band_width, n_head, d_head, q_tile):
    # TODO(synk): padding-mask path (mask is not None) and return_attns not implemented.
    x = prenet_decin_pallas(inp, memory, fparams, q_tile)
    # F.dropout(p=self.dropout) is identity in eval mode.
    # TODO(synk): fuse all PNCA layers into one kernel with manually double-buffered
    #             per-layer weights (P4/P10) to drop the per-layer activation HBM trip.
    for lp in fparams["layers"]:
        x = pnca_layer_pallas(x, memory, lp, n_head=n_head, d_head=d_head,
                              x_bw=x_band_width, h_bw=h_band_width, tq=q_tile)
    out = final_proj_pallas(x, fparams, q_tile)
    return out, [], []


# ----------------------------- pure-JAX reference -----------------------------

def reference_forward(fp, inp, memory, x_band_width, h_band_width, n_head, d_head):
    """Straightforward (non-Pallas, non-tiled) f32 reference of the same forward."""
    f32 = lambda a: a.astype(jnp.float32)
    h = inp
    for (w, b) in fp["prenet_layers"]:
        h = jnp.maximum(h @ f32(w) + b, 0.0)
    h = h @ f32(fp["prenet_fc"][0]) + fp["prenet_fc"][1]
    d_model = fp["b_in"].shape[1]
    x = memory @ f32(fp["w_in_mem"]) + h @ f32(fp["w_in_pre"]) + fp["b_in"]
    x = x * float(d_model) ** 0.5

    B, T, _ = x.shape
    pos = jnp.arange(T)
    x_allow = (pos[None, :] >= pos[:, None] - x_band_width) & (pos[None, :] <= pos[:, None])
    h_allow = (pos[None, :] >= pos[:, None]) & (pos[None, :] <= pos[:, None] + h_band_width)
    x_bias = jnp.where(x_allow, 0.0, -1e30)
    h_bias = jnp.where(h_allow, 0.0, -1e30)
    scale = 1.0 / math.sqrt(d_head)
    H, dh = n_head, d_head

    for lp in fp["layers"]:
        q = (x @ f32(lp["wq"]) + lp["bq"]).reshape(B, T, H, dh)
        kvx = x @ f32(lp["wkvx"]) + lp["bkvx"]
        kvh = memory @ f32(lp["wkvh"]) + lp["bkvh"]
        kx = kvx[..., :H * dh].reshape(B, T, H, dh)
        vx = kvx[..., H * dh:].reshape(B, T, H, dh)
        kh = kvh[..., :H * dh].reshape(B, T, H, dh)
        vh = kvh[..., H * dh:].reshape(B, T, H, dh)
        sx = jnp.einsum("bqhd,bkhd->bhqk", q, kx) * scale + x_bias
        sh = jnp.einsum("bqhd,bkhd->bhqk", q, kh) * scale + h_bias
        ox = jnp.einsum("bhqk,bkhd->bqhd", jax.nn.softmax(sx, axis=-1),
                        vx).reshape(B, T, H * dh)
        oh = jnp.einsum("bhqk,bkhd->bqhd", jax.nn.softmax(sh, axis=-1),
                        vh).reshape(B, T, H * dh)
        y = x + jnp.concatenate([ox, oh], axis=-1) @ f32(lp["wo"]) + lp["bo"]
        z = _layer_norm(y, lp["g1"], lp["be1"], eps=1e-5)
        ff = jnp.maximum(z @ f32(lp["w1"]) + lp["b1"], 0.0)
        x = _layer_norm(ff @ f32(lp["w2"]) + lp["b2"] + z, lp["g2"], lp["be2"], eps=1e-5)

    z = _layer_norm(x, fp["ln_g"], fp["ln_b"], eps=1e-6)
    return z @ f32(fp["out_w"]) + fp["out_b"]


# ----------------------------- demo -----------------------------

if __name__ == "__main__":
    d_in = 8
    prenet_units = [16, 16]
    n_layer = 2
    d_model = 32
    d_mem = 24
    n_head = 4
    d_head = 8
    d_inner = 64
    d_out = 8
    B, T = 2, 16
    x_band_width, h_band_width = 4, 3

    key = jax.random.PRNGKey(0)
    kparam, kin, kmem = jax.random.split(key, 3)
    params = init_params(kparam, d_in, prenet_units, n_layer, d_model, d_mem,
                         n_head, d_head, d_inner, d_out)
    # One-time host-side weight fusion / bf16 casts (hoisted out of the forward).
    fparams = preprocess_params(params)
    inp = jax.random.normal(kin, (B, T, d_in), jnp.float32)
    memory = jax.random.normal(kmem, (B, T, d_mem), jnp.float32)

    # q_tile=8 exercises the banded multi-tile path (2 q-tiles) at the demo length.
    q_tile = choose_q_tile(T, x_band_width, h_band_width, q_tile=8)

    fwd = jax.jit(hybrid_attention_decoder_forward, static_argnums=(3, 4, 5, 6, 7))
    out, _, _ = fwd(fparams, inp, memory, x_band_width, h_band_width,
                    n_head, d_head, q_tile)
    out = jax.block_until_ready(out)

    assert out.shape == (B, T, d_out), out.shape
    assert bool(jnp.all(jnp.isfinite(out)))

    ref = reference_forward(fparams, inp, memory, x_band_width, h_band_width,
                            n_head, d_head)
    max_err = float(jnp.max(jnp.abs(out - ref)))
    assert max_err < 2e-1, f"kernel/reference mismatch: {max_err}"
    print("KERNEL_OK")
</pallas_src>

<mosaic_0001>
module attributes {stable_mosaic.version = 11 : i64} {
  func.func @_prenet_decin_kernel(%arg0: i32, %arg1: i32, %arg2: memref<1x8x8xf32, #tpu.memory_space<vmem>>, %arg3: memref<1x8x24xf32, #tpu.memory_space<vmem>>, %arg4: memref<8x16xbf16, #tpu.memory_space<vmem>>, %arg5: memref<1x16xf32, #tpu.memory_space<vmem>>, %arg6: memref<16x16xbf16, #tpu.memory_space<vmem>>, %arg7: memref<1x16xf32, #tpu.memory_space<vmem>>, %arg8: memref<16x32xbf16, #tpu.memory_space<vmem>>, %arg9: memref<1x32xf32, #tpu.memory_space<vmem>>, %arg10: memref<24x32xbf16, #tpu.memory_space<vmem>>, %arg11: memref<32x32xbf16, #tpu.memory_space<vmem>>, %arg12: memref<1x32xf32, #tpu.memory_space<vmem>>, %arg13: memref<1x8x32xf32, #tpu.memory_space<vmem>>) attributes {dimension_semantics = [#tpu.dimension_semantics<parallel>, #tpu.dimension_semantics<parallel>], iteration_bounds = array<i64: 2, 2>, scalar_prefetch = 0 : i64, scratch_operands = 0 : i64, tpu.core_type = #tpu.core_type<tc>, window_params = [{transform_indices = @transform_0, window_bounds = array<i64: 1, 8, 8>}, {transform_indices = @transform_1, window_bounds = array<i64: 1, 8, 24>}, {pipeline_mode = #tpu.pipeline_mode<synchronous>, transform_indices = @transform_2, window_bounds = array<i64: 8, 16>}, {pipeline_mode = #tpu.pipeline_mode<synchronous>, transform_indices = @transform_3, window_bounds = array<i64: 1, 16>}, {pipeline_mode = #tpu.pipeline_mode<synchronous>, transform_indices = @transform_4, window_bounds = array<i64: 16, 16>}, {pipeline_mode = #tpu.pipeline_mode<synchronous>, transform_indices = @transform_5, window_bounds = array<i64: 1, 16>}, {pipeline_mode = #tpu.pipeline_mode<synchronous>, transform_indices = @transform_6, window_bounds = array<i64: 16, 32>}, {pipeline_mode = #tpu.pipeline_mode<synchronous>, transform_indices = @transform_7, window_bounds = array<i64: 1, 32>}, {pipeline_mode = #tpu.pipeline_mode<synchronous>, transform_indices = @transform_8, window_bounds = array<i64: 24, 32>}, {pipeline_mode = #tpu.pipeline_mode<synchronous>, transform_indices = @transform_9, window_bounds = array<i64: 32, 32>}, {pipeline_mode = #tpu.pipeline_mode<synchronous>, transform_indices = @transform_10, window_bounds = array<i64: 1, 32>}, {transform_indices = @transform_11, window_bounds = array<i64: 1, 8, 32>}]} {
    %c0 = arith.constant 0 : index
    %c0_0 = arith.constant 0 : index
    %c0_1 = arith.constant 0 : index
    %0 = vector.load %arg2[%c0, %c0_0, %c0_1] : memref<1x8x8xf32, #tpu.memory_space<vmem>>, vector<1x8x8xf32>
    %1 = vector.shape_cast %0 : vector<1x8x8xf32> to vector<8x8xf32>
    %c0_2 = arith.constant 0 : index
    %c0_3 = arith.constant 0 : index
    %2 = vector.load %arg4[%c0_2, %c0_3] : memref<8x16xbf16, #tpu.memory_space<vmem>>, vector<8x16xbf16>
    %3 = arith.truncf %1 : vector<8x8xf32> to vector<8x8xbf16>
    %cst = arith.constant dense<0.000000e+00> : vector<8x16xf32>
    %4 = tpu.matmul %3, %2, %cst {dimension_numbers = #tpu.dot_dimension_numbers<[1], [0], [0], [1], [0, 0, 1, 1], [], []>} : vector<8x8xbf16>, vector<8x16xbf16>, vector<8x16xf32> -> vector<8x16xf32>
    %c0_4 = arith.constant 0 : index
    %c0_5 = arith.constant 0 : index
    %5 = vector.load %arg5[%c0_4, %c0_5] : memref<1x16xf32, #tpu.memory_space<vmem>>, vector<1x16xf32>
    %6 = vector.broadcast %5 : vector<1x16xf32> to vector<8x16xf32>
    %7 = arith.addf %4, %6 : vector<8x16xf32>
    %cst_6 = arith.constant 0.000000e+00 : f32
    %8 = vector.broadcast %cst_6 : f32 to vector<8x16xf32>
    %9 = arith.maximumf %7, %8 : vector<8x16xf32>
    %c0_7 = arith.constant 0 : index
    %c0_8 = arith.constant 0 : index
    %10 = vector.load %arg6[%c0_7, %c0_8] : memref<16x16xbf16, #tpu.memory_space<vmem>>, vector<16x16xbf16>
    %11 = arith.truncf %9 : vector<8x16xf32> to vector<8x16xbf16>
    %cst_9 = arith.constant dense<0.000000e+00> : vector<8x16xf32>
    %12 = tpu.matmul %11, %10, %cst_9 {dimension_numbers = #tpu.dot_dimension_numbers<[1], [0], [0], [1], [0, 0, 1, 1], [], []>} : vector<8x16xbf16>, vector<16x16xbf16>, vector<8x16xf32> -> vector<8x16xf32>
    %c0_10 = arith.constant 0 : index
    %c0_11 = arith.constant 0 : index
    %13 = vector.load %arg7[%c0_10, %c0_11] : memref<1x16xf32, #tpu.memory_space<vmem>>, vector<1x16xf32>
    %14 = vector.broadcast %13 : vector<1x16xf32> to vector<8x16xf32>
    %15 = arith.addf %12, %14 : vector<8x16xf32>
    %cst_12 = arith.constant 0.000000e+00 : f32
    %16 = vector.broadcast %cst_12 : f32 to vector<8x16xf32>
    %17 = arith.maximumf %15, %16 : vector<8x16xf32>
    %c0_13 = arith.constant 0 : index
    %c0_14 = arith.constant 0 : index
    %18 = vector.load %arg8[%c0_13, %c0_14] : memref<16x32xbf16, #tpu.memory_space<vmem>>, vector<16x32xbf16>
    %19 = arith.truncf %17 : vector<8x16xf32> to vector<8x16xbf16>
    %cst_15 = arith.constant dense<0.000000e+00> : vector<8x32xf32>
    %20 = tpu.matmul %19, %18, %cst_15 {dimension_numbers = #tpu.dot_dimension_numbers<[1], [0], [0], [1], [0, 0, 1, 1], [], []>} : vector<8x16xbf16>, vector<16x32xbf16>, vector<8x32xf32> -> vector<8x32xf32>
    %c0_16 = arith.constant 0 : index
    %c0_17 = arith.constant 0 : index
    %21 = vector.load %arg9[%c0_16, %c0_17] : memref<1x32xf32, #tpu.memory_space<vmem>>, vector<1x32xf32>
    %22 = vector.broadcast %21 : vector<1x32xf32> to vector<8x32xf32>
    %23 = arith.addf %20, %22 : vector<8x32xf32>
    %c0_18 = arith.constant 0 : index
    %c0_19 = arith.constant 0 : index
    %c0_20 = arith.constant 0 : index
    %24 = vector.load %arg3[%c0_18, %c0_19, %c0_20] : memref<1x8x24xf32, #tpu.memory_space<vmem>>, vector<1x8x24xf32>
    %25 = vector.shape_cast %24 : vector<1x8x24xf32> to vector<8x24xf32>
    %c0_21 = arith.constant 0 : index
    %c0_22 = arith.constant 0 : index
    %26 = vector.load %arg10[%c0_21, %c0_22] : memref<24x32xbf16, #tpu.memory_space<vmem>>, vector<24x32xbf16>
    %27 = arith.truncf %25 : vector<8x24xf32> to vector<8x24xbf16>
    %cst_23 = arith.constant dense<0.000000e+00> : vector<8x32xf32>
    %28 = tpu.matmul %27, %26, %cst_23 {dimension_numbers = #tpu.dot_dimension_numbers<[1], [0], [0], [1], [0, 0, 1, 1], [], []>} : vector<8x24xbf16>, vector<24x32xbf16>, vector<8x32xf32> -> vector<8x32xf32>
    %c0_24 = arith.constant 0 : index
    %c0_25 = arith.constant 0 : index
    %29 = vector.load %arg11[%c0_24, %c0_25] : memref<32x32xbf16, #tpu.memory_space<vmem>>, vector<32x32xbf16>
    %30 = arith.truncf %23 : vector<8x32xf32> to vector<8x32xbf16>
    %cst_26 = arith.constant dense<0.000000e+00> : vector<8x32xf32>
    %31 = tpu.matmul %30, %29, %cst_26 {dimension_numbers = #tpu.dot_dimension_numbers<[1], [0], [0], [1], [0, 0, 1, 1], [], []>} : vector<8x32xbf16>, vector<32x32xbf16>, vector<8x32xf32> -> vector<8x32xf32>
    %32 = arith.addf %28, %31 : vector<8x32xf32>
    %c0_27 = arith.constant 0 : index
    %c0_28 = arith.constant 0 : index
    %33 = vector.load %arg12[%c0_27, %c0_28] : memref<1x32xf32, #tpu.memory_space<vmem>>, vector<1x32xf32>
    %34 = vector.broadcast %33 : vector<1x32xf32> to vector<8x32xf32>
    %35 = arith.addf %32, %34 : vector<8x32xf32>
    %cst_29 = arith.constant 5.65685415 : f32
    %36 = vector.broadcast %cst_29 : f32 to vector<8x32xf32>
    %37 = arith.mulf %35, %36 : vector<8x32xf32>
    %c0_30 = arith.constant 0 : index
    %c0_31 = arith.constant 0 : index
    %c0_32 = arith.constant 0 : index
    %38 = vector.load %arg13[%c0_30, %c0_31, %c0_32] : memref<1x8x32xf32, #tpu.memory_space<vmem>>, vector<1x8x32xf32>
    %39 = vector.shape_cast %38 : vector<1x8x32xf32> to vector<8x32xf32>
    %40 = vector.shape_cast %37 : vector<8x32xf32> to vector<1x8x32xf32>
    tpu.vector_store %arg13[%c0_30, %c0_31, %c0_32], %40 {strides = array<i32>} : memref<1x8x32xf32, #tpu.memory_space<vmem>>, vector<1x8x32xf32>,
    return
  }
  func.func @transform_0(%arg0: i32, %arg1: i32) -> (i32, i32, i32) {
    %c0_i32 = arith.constant 0 : i32
    %c0_i32_0 = arith.constant 0 : i32
    return %arg0, %arg1, %c0_i32 : i32, i32, i32
  }
  func.func @transform_1(%arg0: i32, %arg1: i32) -> (i32, i32, i32) {
    %c0_i32 = arith.constant 0 : i32
    %c0_i32_0 = arith.constant 0 : i32
    return %arg0, %arg1, %c0_i32 : i32, i32, i32
  }
  func.func @transform_2(%arg0: i32, %arg1: i32) -> (i32, i32) {
    %c0_i32 = arith.constant 0 : i32
    %c0_i32_0 = arith.constant 0 : i32
    %c0_i32_1 = arith.constant 0 : i32
    return %c0_i32, %c0_i32_0 : i32, i32
  }
  func.func @transform_3(%arg0: i32, %arg1: i32) -> (i32, i32) {
    %c0_i32 = arith.constant 0 : i32
    %c0_i32_0 = arith.constant 0 : i32
    %c0_i32_1 = arith.constant 0 : i32
    return %c0_i32, %c0_i32_0 : i32, i32
  }
  func.func @transform_4(%arg0: i32, %arg1: i32) -> (i32, i32) {
    %c0_i32 = arith.constant 0 : i32
    %c0_i32_0 = arith.constant 0 : i32
    %c0_i32_1 = arith.constant 0 : i32
    return %c0_i32, %c0_i32_0 : i32, i32
  }
  func.func @transform_5(%arg0: i32, %arg1: i32) -> (i32, i32) {
    %c0_i32 = arith.constant 0 : i32
    %c0_i32_0 = arith.constant 0 : i32
    %c0_i32_1 = arith.constant 0 : i32
    return %c0_i32, %c0_i32_0 : i32, i32
  }
  func.func @transform_6(%arg0: i32, %arg1: i32) -> (i32, i32) {
    %c0_i32 = arith.constant 0 : i32
    %c0_i32_0 = arith.constant 0 : i32
    %c0_i32_1 = arith.constant 0 : i32
    return %c0_i32, %c0_i32_0 : i32, i32
  }
  func.func @transform_7(%arg0: i32, %arg1: i32) -> (i32, i32) {
    %c0_i32 = arith.constant 0 : i32
    %c0_i32_0 = arith.constant 0 : i32
    %c0_i32_1 = arith.constant 0 : i32
    return %c0_i32, %c0_i32_0 : i32, i32
  }
  func.func @transform_8(%arg0: i32, %arg1: i32) -> (i32, i32) {
    %c0_i32 = arith.constant 0 : i32
    %c0_i32_0 = arith.constant 0 : i32
    %c0_i32_1 = arith.constant 0 : i32
    return %c0_i32, %c0_i32_0 : i32, i32
  }
  func.func @transform_9(%arg0: i32, %arg1: i32) -> (i32, i32) {
    %c0_i32 = arith.constant 0 : i32
    %c0_i32_0 = arith.constant 0 : i32
    %c0_i32_1 = arith.constant 0 : i32
    return %c0_i32, %c0_i32_0 : i32, i32
  }
  func.func @transform_10(%arg0: i32, %arg1: i32) -> (i32, i32) {
    %c0_i32 = arith.constant 0 : i32
    %c0_i32_0 = arith.constant 0 : i32
    %c0_i32_1 = arith.constant 0 : i32
    return %c0_i32, %c0_i32_0 : i32, i32
  }
  func.func @transform_11(%arg0: i32, %arg1: i32) -> (i32, i32, i32) {
    %c0_i32 = arith.constant 0 : i32
    %c0_i32_0 = arith.constant 0 : i32
    return %arg0, %arg1, %c0_i32 : i32, i32, i32
  }
}

module attributes {stable_mosaic.version = 11 : i64} {
  func.func @_pnca_layer_kernel(%arg0: i32, %arg1: i32, %arg2: memref<1x8x32xf32, #tpu.memory_space<vmem>>, %arg3: memref<1x8x32xf32, #tpu.memory_space<vmem>>, %arg4: memref<1x8x24xf32, #tpu.memory_space<vmem>>, %arg5: memref<1x8x24xf32, #tpu.memory_space<vmem>>, %arg6: memref<32x32xbf16, #tpu.memory_space<vmem>>, %arg7: memref<1x32xf32, #tpu.memory_space<vmem>>, %arg8: memref<32x64xbf16, #tpu.memory_space<vmem>>, %arg9: memref<1x64xf32, #tpu.memory_space<vmem>>, %arg10: memref<24x64xbf16, #tpu.memory_space<vmem>>, %arg11: memref<1x64xf32, #tpu.memory_space<vmem>>, %arg12: memref<64x32xbf16, #tpu.memory_space<vmem>>, %arg13: memref<1x32xf32, #tpu.memory_space<vmem>>, %arg14: memref<1x32xf32, #tpu.memory_space<vmem>>, %arg15: memref<1x32xf32, #tpu.memory_space<vmem>>, %arg16: memref<32x64xbf16, #tpu.memory_space<vmem>>, %arg17: memref<1x64xf32, #tpu.memory_space<vmem>>, %arg18: memref<64x32xbf16, #tpu.memory_space<vmem>>, %arg19: memref<1x32xf32, #tpu.memory_space<vmem>>, %arg20: memref<1x32xf32, #tpu.memory_space<vmem>>, %arg21: memref<1x32xf32, #tpu.memory_space<vmem>>, %arg22: memref<1x8x32xf32, #tpu.memory_space<vmem>>, %arg23: memref<8x64xf32, #tpu.memory_space<vmem>>) attributes {dimension_semantics = [#tpu.dimension_semantics<parallel>, #tpu.dimension_semantics<parallel>], iteration_bounds = array<i64: 2, 2>, scalar_prefetch = 0 : i64, scratch_operands = 1 : i64, tpu.core_type = #tpu.core_type<tc>, window_params = [{transform_indices = @transform_0, window_bounds = array<i64: 1, 8, 32>}, {transform_indices = @transform_1, window_bounds = array<i64: 1, 8, 32>}, {transform_indices = @transform_2, window_bounds = array<i64: 1, 8, 24>}, {transform_indices = @transform_3, window_bounds = array<i64: 1, 8, 24>}, {pipeline_mode = #tpu.pipeline_mode<synchronous>, transform_indices = @transform_4, window_bounds = array<i64: 32, 32>}, {pipeline_mode = #tpu.pipeline_mode<synchronous>, transform_indices = @transform_5, window_bounds = array<i64: 1, 32>}, {pipeline_mode = #tpu.pipeline_mode<synchronous>, transform_indices = @transform_6, window_bounds = array<i64: 32, 64>}, {pipeline_mode = #tpu.pipeline_mode<synchronous>, transform_indices = @transform_7, window_bounds = array<i64: 1, 64>}, {pipeline_mode = #tpu.pipeline_mode<synchronous>, transform_indices = @transform_8, window_bounds = array<i64: 24, 64>}, {pipeline_mode = #tpu.pipeline_mode<synchronous>, transform_indices = @transform_9, window_bounds = array<i64: 1, 64>}, {pipeline_mode = #tpu.pipeline_mode<synchronous>, transform_indices = @transform_10, window_bounds = array<i64: 64, 32>}, {pipeline_mode = #tpu.pipeline_mode<synchronous>, transform_indices = @transform_11, window_bounds = array<i64: 1, 32>}, {pipeline_mode = #tpu.pipeline_mode<synchronous>, transform_indices = @transform_12, window_bounds = array<i64: 1, 32>}, {pipeline_mode = #tpu.pipeline_mode<synchronous>, transform_indices = @transform_13, window_bounds = array<i64: 1, 32>}, {pipeline_mode = #tpu.pipeline_mode<synchronous>, transform_indices = @transform_14, window_bounds = array<i64: 32, 64>}, {pipeline_mode = #tpu.pipeline_mode<synchronous>, transform_indices = @transform_15, window_bounds = array<i64: 1, 64>}, {pipeline_mode = #tpu.pipeline_mode<synchronous>, transform_indices = @transform_16, window_bounds = array<i64: 64, 32>}, {pipeline_mode = #tpu.pipeline_mode<synchronous>, transform_indices = @transform_17, window_bounds = array<i64: 1, 32>}, {pipeline_mode = #tpu.pipeline_mode<synchronous>, transform_indices = @transform_18, window_bounds = array<i64: 1, 32>}, {pipeline_mode = #tpu.pipeline_mode<synchronous>, transform_indices = @transform_19, window_bounds = array<i64: 1, 32>}, {transform_indices = @transform_20, window_bounds = array<i64: 1, 8, 32>}]} {
    %c0 = arith.constant 0 : index
    %c0_0 = arith.constant 0 : index
    %c0_1 = arith.constant 0 : index
    %0 = vector.load %arg2[%c0, %c0_0, %c0_1] : memref<1x8x32xf32, #tpu.memory_space<vmem>>, vector<1x8x32xf32>
    %1 = vector.shape_cast %0 : vector<1x8x32xf32> to vector<8x32xf32>
    %c0_2 = arith.constant 0 : index
    %c0_3 = arith.constant 0 : index
    %c0_4 = arith.constant 0 : index
    %2 = vector.load %arg3[%c0_2, %c0_3, %c0_4] : memref<1x8x32xf32, #tpu.memory_space<vmem>>, vector<1x8x32xf32>
    %3 = vector.shape_cast %2 : vector<1x8x32xf32> to vector<8x32xf32>
    %4 = tpu.concatenate %3, %1 in 0 : vector<8x32xf32>, vector<8x32xf32> -> vector<16x32xf32>
    %c0_5 = arith.constant 0 : index
    %c0_6 = arith.constant 0 : index
    %c0_7 = arith.constant 0 : index
    %5 = vector.load %arg4[%c0_5, %c0_6, %c0_7] : memref<1x8x24xf32, #tpu.memory_space<vmem>>, vector<1x8x24xf32>
    %6 = vector.shape_cast %5 : vector<1x8x24xf32> to vector<8x24xf32>
    %c0_8 = arith.constant 0 : index
    %c0_9 = arith.constant 0 : index
    %c0_10 = arith.constant 0 : index
    %7 = vector.load %arg5[%c0_8, %c0_9, %c0_10] : memref<1x8x24xf32, #tpu.memory_space<vmem>>, vector<1x8x24xf32>
    %8 = vector.shape_cast %7 : vector<1x8x24xf32> to vector<8x24xf32>
    %9 = tpu.concatenate %6, %8 in 0 : vector<8x24xf32>, vector<8x24xf32> -> vector<16x24xf32>
    %c0_11 = arith.constant 0 : index
    %c0_12 = arith.constant 0 : index
    %10 = vector.load %arg6[%c0_11, %c0_12] : memref<32x32xbf16, #tpu.memory_space<vmem>>, vector<32x32xbf16>
    %11 = arith.truncf %1 : vector<8x32xf32> to vector<8x32xbf16>
    %cst = arith.constant dense<0.000000e+00> : vector<8x32xf32>
    %12 = tpu.matmul %11, %10, %cst {dimension_numbers = #tpu.dot_dimension_numbers<[1], [0], [0], [1], [0, 0, 1, 1], [], []>} : vector<8x32xbf16>, vector<32x32xbf16>, vector<8x32xf32> -> vector<8x32xf32>
    %c0_13 = arith.constant 0 : index
    %c0_14 = arith.constant 0 : index
    %13 = vector.load %arg7[%c0_13, %c0_14] : memref<1x32xf32, #tpu.memory_space<vmem>>, vector<1x32xf32>
    %14 = vector.broadcast %13 : vector<1x32xf32> to vector<8x32xf32>
    %15 = arith.addf %12, %14 : vector<8x32xf32>
    %16 = arith.truncf %15 : vector<8x32xf32> to vector<8x32xbf16>
    %c0_15 = arith.constant 0 : index
    %c0_16 = arith.constant 0 : index
    %17 = vector.load %arg8[%c0_15, %c0_16] : memref<32x64xbf16, #tpu.memory_space<vmem>>, vector<32x64xbf16>
    %18 = arith.truncf %4 : vector<16x32xf32> to vector<16x32xbf16>
    %cst_17 = arith.constant dense<0.000000e+00> : vector<16x64xf32>
    %19 = tpu.matmul %18, %17, %cst_17 {dimension_numbers = #tpu.dot_dimension_numbers<[1], [0], [0], [1], [0, 0, 1, 1], [], []>} : vector<16x32xbf16>, vector<32x64xbf16>, vector<16x64xf32> -> vector<16x64xf32>
    %c0_18 = arith.constant 0 : index
    %c0_19 = arith.constant 0 : index
    %20 = vector.load %arg9[%c0_18, %c0_19] : memref<1x64xf32, #tpu.memory_space<vmem>>, vector<1x64xf32>
    %21 = vector.broadcast %20 : vector<1x64xf32> to vector<16x64xf32>
    %22 = arith.addf %19, %21 : vector<16x64xf32>
    %23 = arith.truncf %22 : vector<16x64xf32> to vector<16x64xbf16>
    %c0_20 = arith.constant 0 : index
    %c0_21 = arith.constant 0 : index
    %24 = vector.load %arg10[%c0_20, %c0_21] : memref<24x64xbf16, #tpu.memory_space<vmem>>, vector<24x64xbf16>
    %25 = arith.truncf %9 : vector<16x24xf32> to vector<16x24xbf16>
    %cst_22 = arith.constant dense<0.000000e+00> : vector<16x64xf32>
    %26 = tpu.matmul %25, %24, %cst_22 {dimension_numbers = #tpu.dot_dimension_numbers<[1], [0], [0], [1], [0, 0, 1, 1], [], []>} : vector<16x24xbf16>, vector<24x64xbf16>, vector<16x64xf32> -> vector<16x64xf32>
    %c0_23 = arith.constant 0 : index
    %c0_24 = arith.constant 0 : index
    %27 = vector.load %arg11[%c0_23, %c0_24] : memref<1x64xf32, #tpu.memory_space<vmem>>, vector<1x64xf32>
    %28 = vector.broadcast %27 : vector<1x64xf32> to vector<16x64xf32>
    %29 = arith.addf %26, %28 : vector<16x64xf32>
    %30 = arith.truncf %29 : vector<16x64xf32> to vector<16x64xbf16>
    %31 = vector.extract_strided_slice %23 {offsets = [0, 0], sizes = [16, 32], strides = [1, 1]} : vector<16x64xbf16> to vector<16x32xbf16>
    %32 = vector.extract_strided_slice %23 {offsets = [0, 32], sizes = [16, 32], strides = [1, 1]} : vector<16x64xbf16> to vector<16x32xbf16>
    %33 = vector.extract_strided_slice %30 {offsets = [0, 0], sizes = [16, 32], strides = [1, 1]} : vector<16x64xbf16> to vector<16x32xbf16>
    %34 = vector.extract_strided_slice %30 {offsets = [0, 32], sizes = [16, 32], strides = [1, 1]} : vector<16x64xbf16> to vector<16x32xbf16>
    %35 = tpu.concatenate %31, %33 in 0 : vector<16x32xbf16>, vector<16x32xbf16> -> vector<32x32xbf16>
    %c8_i32 = arith.constant 8 : i32
    %36 = arith.muli %arg1, %c8_i32 : i32
    %37 = tpu.iota {dimensions = array<i32: 0>} : vector<8x16xi32>
    %38 = vector.broadcast %36 : i32 to vector<8x16xi32>
    %39 = arith.addi %38, %37 : vector<8x16xi32>
    %c1_i32 = arith.constant 1 : i32
    %40 = arith.subi %arg1, %c1_i32 : i32
    %c8_i32_25 = arith.constant 8 : i32
    %41 = arith.muli %40, %c8_i32_25 : i32
    %42 = tpu.iota {dimensions = array<i32: 1>} : vector<8x16xi32>
    %43 = vector.broadcast %41 : i32 to vector<8x16xi32>
    %44 = arith.addi %43, %42 : vector<8x16xi32>
    %c8_i32_26 = arith.constant 8 : i32
    %45 = arith.muli %arg1, %c8_i32_26 : i32
    %46 = tpu.iota {dimensions = array<i32: 1>} : vector<8x16xi32>
    %47 = vector.broadcast %45 : i32 to vector<8x16xi32>
    %48 = arith.addi %47, %46 : vector<8x16xi32>
    %c4_i32 = arith.constant 4 : i32
    %49 = vector.broadcast %c4_i32 : i32 to vector<8x16xi32>
    %50 = arith.subi %39, %49 : vector<8x16xi32>
    %51 = arith.cmpi sge, %44, %50 : vector<8x16xi32>
    %52 = arith.cmpi sle, %44, %39 : vector<8x16xi32>
    %53 = arith.andi %51, %52 : vector<8x16xi1>
    %c0_i32 = arith.constant 0 : i32
    %54 = vector.broadcast %c0_i32 : i32 to vector<8x16xi32>
    %55 = arith.cmpi sge, %44, %54 : vector<8x16xi32>
    %56 = arith.andi %53, %55 : vector<8x16xi1>
    %57 = arith.cmpi sge, %48, %39 : vector<8x16xi32>
    %c3_i32 = arith.constant 3 : i32
    %58 = vector.broadcast %c3_i32 : i32 to vector<8x16xi32>
    %59 = arith.addi %39, %58 : vector<8x16xi32>
    %60 = arith.cmpi sle, %48, %59 : vector<8x16xi32>
    %61 = arith.andi %57, %60 : vector<8x16xi1>
    %c16_i32 = arith.constant 16 : i32
    %62 = vector.broadcast %c16_i32 : i32 to vector<8x16xi32>
    %63 = arith.cmpi slt, %48, %62 : vector<8x16xi32>
    %64 = arith.andi %61, %63 : vector<8x16xi1>
    %cst_27 = arith.constant 0.000000e+00 : f32
    %cst_28 = arith.constant -1.000000e+30 : f32
    %65 = vector.broadcast %cst_27 : f32 to vector<8x16xf32>
    %66 = vector.broadcast %cst_28 : f32 to vector<8x16xf32>
    %67 = arith.select %56, %65, %66 : vector<8x16xi1>, vector<8x16xf32>
    %cst_29 = arith.constant 0.000000e+00 : f32
    %cst_30 = arith.constant -1.000000e+30 : f32
    %68 = vector.broadcast %cst_29 : f32 to vector<8x16xf32>
    %69 = vector.broadcast %cst_30 : f32 to vector<8x16xf32>
    %70 = arith.select %64, %68, %69 : vector<8x16xi1>, vector<8x16xf32>
    %71 = vector.extract_strided_slice %16 {offsets = [0, 0], sizes = [8, 8], strides = [1, 1]} : vector<8x32xbf16> to vector<8x8xbf16>
    %72 = vector.extract_strided_slice %35 {offsets = [0, 0], sizes = [32, 8], strides = [1, 1]} : vector<32x32xbf16> to vector<32x8xbf16>
    %cst_31 = arith.constant dense<0.000000e+00> : vector<8x32xf32>
    %73 = tpu.matmul %71, %72, %cst_31 {dimension_numbers = #tpu.dot_dimension_numbers<[1], [1], [0], [0], [0, 0, 1, 0], [], []>} : vector<8x8xbf16>, vector<32x8xbf16>, vector<8x32xf32> -> vector<8x32xf32>
    %cst_32 = arith.constant 0.353553385 : f32
    %74 = vector.broadcast %cst_32 : f32 to vector<8x32xf32>
    %75 = arith.mulf %73, %74 : vector<8x32xf32>
    %76 = vector.extract_strided_slice %75 {offsets = [0, 0], sizes = [8, 16], strides = [1, 1]} : vector<8x32xf32> to vector<8x16xf32>
    %77 = arith.addf %76, %67 : vector<8x16xf32>
    %cst_33 = arith.constant dense<0xFF800000> : vector<8xf32>
    %78 = vector.multi_reduction <maximumf>, %77, %cst_33 [1] : vector<8x16xf32> to vector<8xf32>
    %79 = vector.shape_cast %78 : vector<8xf32> to vector<8x1xf32>
    %80 = vector.broadcast %79 : vector<8x1xf32> to vector<8x16xf32>
    %81 = arith.subf %77, %80 : vector<8x16xf32>
    %82 = math.exp %81 : vector<8x16xf32>
    %cst_34 = arith.constant dense<0.000000e+00> : vector<8xf32>
    %83 = vector.multi_reduction <add>, %82, %cst_34 [1] : vector<8x16xf32> to vector<8xf32>
    %84 = vector.shape_cast %83 : vector<8xf32> to vector<8x1xf32>
    %85 = tpu.reciprocal %84 {approx = true} : vector<8x1xf32> -> vector<8x1xf32>
    %86 = vector.broadcast %85 : vector<8x1xf32> to vector<8x16xf32>
    %87 = arith.mulf %82, %86 : vector<8x16xf32>
    %88 = vector.extract_strided_slice %75 {offsets = [0, 16], sizes = [8, 16], strides = [1, 1]} : vector<8x32xf32> to vector<8x16xf32>
    %89 = arith.addf %88, %70 : vector<8x16xf32>
    %cst_35 = arith.constant dense<0xFF800000> : vector<8xf32>
    %90 = vector.multi_reduction <maximumf>, %89, %cst_35 [1] : vector<8x16xf32> to vector<8xf32>
    %91 = vector.shape_cast %90 : vector<8xf32> to vector<8x1xf32>
    %92 = vector.broadcast %91 : vector<8x1xf32> to vector<8x16xf32>
    %93 = arith.subf %89, %92 : vector<8x16xf32>
    %94 = math.exp %93 : vector<8x16xf32>
    %cst_36 = arith.constant dense<0.000000e+00> : vector<8xf32>
    %95 = vector.multi_reduction <add>, %94, %cst_36 [1] : vector<8x16xf32> to vector<8xf32>
    %96 = vector.shape_cast %95 : vector<8xf32> to vector<8x1xf32>
    %97 = tpu.reciprocal %96 {approx = true} : vector<8x1xf32> -> vector<8x1xf32>
    %98 = vector.broadcast %97 : vector<8x1xf32> to vector<8x16xf32>
    %99 = arith.mulf %94, %98 : vector<8x16xf32>
    %100 = vector.extract_strided_slice %32 {offsets = [0, 0], sizes = [16, 8], strides = [1, 1]} : vector<16x32xbf16> to vector<16x8xbf16>
    %101 = arith.truncf %87 : vector<8x16xf32> to vector<8x16xbf16>
    %cst_37 = arith.constant dense<0.000000e+00> : vector<8x8xf32>
    %102 = tpu.matmul %101, %100, %cst_37 {dimension_numbers = #tpu.dot_dimension_numbers<[1], [0], [0], [1], [0, 0, 1, 1], [], []>} : vector<8x16xbf16>, vector<16x8xbf16>, vector<8x8xf32> -> vector<8x8xf32>
    %c0_38 = arith.constant 0 : index
    %c0_39 = arith.constant 0 : index
    %103 = vector.load %arg23[%c0_38, %c0_39] : memref<8x64xf32, #tpu.memory_space<vmem>>, vector<8x8xf32>
    tpu.vector_store %arg23[%c0_38, %c0_39], %102 {strides = array<i32>} : memref<8x64xf32, #tpu.memory_space<vmem>>, vector<8x8xf32>,
    %104 = vector.extract_strided_slice %34 {offsets = [0, 0], sizes = [16, 8], strides = [1, 1]} : vector<16x32xbf16> to vector<16x8xbf16>
    %105 = arith.truncf %99 : vector<8x16xf32> to vector<8x16xbf16>
    %cst_40 = arith.constant dense<0.000000e+00> : vector<8x8xf32>
    %106 = tpu.matmul %105, %104, %cst_40 {dimension_numbers = #tpu.dot_dimension_numbers<[1], [0], [0], [1], [0, 0, 1, 1], [], []>} : vector<8x16xbf16>, vector<16x8xbf16>, vector<8x8xf32> -> vector<8x8xf32>
    %c0_41 = arith.constant 0 : index
    %c32 = arith.constant 32 : index
    %107 = vector.load %arg23[%c0_41, %c32] : memref<8x64xf32, #tpu.memory_space<vmem>>, vector<8x8xf32>
    tpu.vector_store %arg23[%c0_41, %c32], %106 {strides = array<i32>} : memref<8x64xf32, #tpu.memory_space<vmem>>, vector<8x8xf32>,
    %108 = vector.extract_strided_slice %16 {offsets = [0, 8], sizes = [8, 8], strides = [1, 1]} : vector<8x32xbf16> to vector<8x8xbf16>
    %109 = vector.extract_strided_slice %35 {offsets = [0, 8], sizes = [32, 8], strides = [1, 1]} : vector<32x32xbf16> to vector<32x8xbf16>
    %cst_42 = arith.constant dense<0.000000e+00> : vector<8x32xf32>
    %110 = tpu.matmul %108, %109, %cst_42 {dimension_numbers = #tpu.dot_dimension_numbers<[1], [1], [0], [0], [0, 0, 1, 0], [], []>} : vector<8x8xbf16>, vector<32x8xbf16>, vector<8x32xf32> -> vector<8x32xf32>
    %cst_43 = arith.constant 0.353553385 : f32
    %111 = vector.broadcast %cst_43 : f32 to vector<8x32xf32>
    %112 = arith.mulf %110, %111 : vector<8x32xf32>
    %113 = vector.extract_strided_slice %112 {offsets = [0, 0], sizes = [8, 16], strides = [1, 1]} : vector<8x32xf32> to vector<8x16xf32>
    %114 = arith.addf %113, %67 : vector<8x16xf32>
    %cst_44 = arith.constant dense<0xFF800000> : vector<8xf32>
    %115 = vector.multi_reduction <maximumf>, %114, %cst_44 [1] : vector<8x16xf32> to vector<8xf32>
    %116 = vector.shape_cast %115 : vector<8xf32> to vector<8x1xf32>
    %117 = vector.broadcast %116 : vector<8x1xf32> to vector<8x16xf32>
    %118 = arith.subf %114, %117 : vector<8x16xf32>
    %119 = math.exp %118 : vector<8x16xf32>
    %cst_45 = arith.constant dense<0.000000e+00> : vector<8xf32>
    %120 = vector.multi_reduction <add>, %119, %cst_45 [1] : vector<8x16xf32> to vector<8xf32>
    %121 = vector.shape_cast %120 : vector<8xf32> to vector<8x1xf32>
    %122 = tpu.reciprocal %121 {approx = true} : vector<8x1xf32> -> vector<8x1xf32>
    %123 = vector.broadcast %122 : vector<8x1xf32> to vector<8x16xf32>
    %124 = arith.mulf %119, %123 : vector<8x16xf32>
    %125 = vector.extract_strided_slice %112 {offsets = [0, 16], sizes = [8, 16], strides = [1, 1]} : vector<8x32xf32> to vector<8x16xf32>
    %126 = arith.addf %125, %70 : vector<8x16xf32>
    %cst_46 = arith.constant dense<0xFF800000> : vector<8xf32>
    %127 = vector.multi_reduction <maximumf>, %126, %cst_46 [1] : vector<8x16xf32> to vector<8xf32>
    %128 = vector.shape_cast %127 : vector<8xf32> to vector<8x1xf32>
    %129 = vector.broadcast %128 : vector<8x1xf32> to vector<8x16xf32>
    %130 = arith.subf %126, %129 : vector<8x16xf32>
    %131 = math.exp %130 : vector<8x16xf32>
    %cst_47 = arith.constant dense<0.000000e+00> : vector<8xf32>
    %132 = vector.multi_reduction <add>, %131, %cst_47 [1] : vector<8x16xf32> to vector<8xf32>
    %133 = vector.shape_cast %132 : vector<8xf32> to vector<8x1xf32>
    %134 = tpu.reciprocal %133 {approx = true} : vector<8x1xf32> -> vector<8x1xf32>
    %135 = vector.broadcast %134 : vector<8x1xf32> to vector<8x16xf32>
    %136 = arith.mulf %131, %135 : vector<8x16xf32>
    %137 = vector.extract_strided_slice %32 {offsets = [0, 8], sizes = [16, 8], strides = [1, 1]} : vector<16x32xbf16> to vector<16x8xbf16>
    %138 = arith.truncf %124 : vector<8x16xf32> to vector<8x16xbf16>
    %cst_48 = arith.constant dense<0.000000e+00> : vector<8x8xf32>
    %139 = tpu.matmul %138, %137, %cst_48 {dimension_numbers = #tpu.dot_dimension_numbers<[1], [0], [0], [1], [0, 0, 1, 1], [], []>} : vector<8x16xbf16>, vector<16x8xbf16>, vector<8x8xf32> -> vector<8x8xf32>
    %c0_49 = arith.constant 0 : index
    %c8 = arith.constant 8 : index
    %140 = vector.load %arg23[%c0_49, %c8] : memref<8x64xf32, #tpu.memory_space<vmem>>, vector<8x8xf32>
    tpu.vector_store %arg23[%c0_49, %c8], %139 {strides = array<i32>} : memref<8x64xf32, #tpu.memory_space<vmem>>, vector<8x8xf32>,
    %141 = vector.extract_strided_slice %34 {offsets = [0, 8], sizes = [16, 8], strides = [1, 1]} : vector<16x32xbf16> to vector<16x8xbf16>
    %142 = arith.truncf %136 : vector<8x16xf32> to vector<8x16xbf16>
    %cst_50 = arith.constant dense<0.000000e+00> : vector<8x8xf32>
    %143 = tpu.matmul %142, %141, %cst_50 {dimension_numbers = #tpu.dot_dimension_numbers<[1], [0], [0], [1], [0, 0, 1, 1], [], []>} : vector<8x16xbf16>, vector<16x8xbf16>, vector<8x8xf32> -> vector<8x8xf32>
    %c0_51 = arith.constant 0 : index
    %c40 = arith.constant 40 : index
    %144 = vector.load %arg23[%c0_51, %c40] : memref<8x64xf32, #tpu.memory_space<vmem>>, vector<8x8xf32>
    tpu.vector_store %arg23[%c0_51, %c40], %143 {strides = array<i32>} : memref<8x64xf32, #tpu.memory_space<vmem>>, vector<8x8xf32>,
    %145 = vector.extract_strided_slice %16 {offsets = [0, 16], sizes = [8, 8], strides = [1, 1]} : vector<8x32xbf16> to vector<8x8xbf16>
    %146 = vector.extract_strided_slice %35 {offsets = [0, 16], sizes = [32, 8], strides = [1, 1]} : vector<32x32xbf16> to vector<32x8xbf16>
    %cst_52 = arith.constant dense<0.000000e+00> : vector<8x32xf32>
    %147 = tpu.matmul %145, %146, %cst_52 {dimension_numbers = #tpu.dot_dimension_numbers<[1], [1], [0], [0], [0, 0, 1, 0], [], []>} : vector<8x8xbf16>, vector<32x8xbf16>, vector<8x32xf32> -> vector<8x32xf32>
    %cst_53 = arith.constant 0.353553385 : f32
    %148 = vector.broadcast %cst_53 : f32 to vector<8x32xf32>
    %149 = arith.mulf %147, %148 : vector<8x32xf32>
    %150 = vector.extract_strided_slice %149 {offsets = [0, 0], sizes = [8, 16], strides = [1, 1]} : vector<8x32xf32> to vector<8x16xf32>
    %151 = arith.addf %150, %67 : vector<8x16xf32>
    %cst_54 = arith.constant dense<0xFF800000> : vector<8xf32>
    %152 = vector.multi_reduction <maximumf>, %151, %cst_54 [1] : vector<8x16xf32> to vector<8xf32>
    %153 = vector.shape_cast %152 : vector<8xf32> to vector<8x1xf32>
    %154 = vector.broadcast %153 : vector<8x1xf32> to vector<8x16xf32>
    %155 = arith.subf %151, %154 : vector<8x16xf32>
    %156 = math.exp %155 : vector<8x16xf32>
    %cst_55 = arith.constant dense<0.000000e+00> : vector<8xf32>
    %157 = vector.multi_reduction <add>, %156, %cst_55 [1] : vector<8x16xf32> to vector<8xf32>
    %158 = vector.shape_cast %157 : vector<8xf32> to vector<8x1xf32>
    %159 = tpu.reciprocal %158 {approx = true} : vector<8x1xf32> -> vector<8x1xf32>
    %160 = vector.broadcast %159 : vector<8x1xf32> to vector<8x16xf32>
    %161 = arith.mulf %156, %160 : vector<8x16xf32>
    %162 = vector.extract_strided_slice %149 {offsets = [0, 16], sizes = [8, 16], strides = [1, 1]} : vector<8x32xf32> to vector<8x16xf32>
    %163 = arith.addf %162, %70 : vector<8x16xf32>
    %cst_56 = arith.constant dense<0xFF800000> : vector<8xf32>
    %164 = vector.multi_reduction <maximumf>, %163, %cst_56 [1] : vector<8x16xf32> to vector<8xf32>
    %165 = vector.shape_cast %164 : vector<8xf32> to vector<8x1xf32>
    %166 = vector.broadcast %165 : vector<8x1xf32> to vector<8x16xf32>
    %167 = arith.subf %163, %166 : vector<8x16xf32>
    %168 = math.exp %167 : vector<8x16xf32>
    %cst_57 = arith.constant dense<0.000000e+00> : vector<8xf32>
    %169 = vector.multi_reduction <add>, %168, %cst_57 [1] : vector<8x16xf32> to vector<8xf32>
    %170 = vector.shape_cast %169 : vector<8xf32> to vector<8x1xf32>
    %171 = tpu.reciprocal %170 {approx = true} : vector<8x1xf32> -> vector<8x1xf32>
    %172 = vector.broadcast %171 : vector<8x1xf32> to vector<8x16xf32>
    %173 = arith.mulf %168, %172 : vector<8x16xf32>
    %174 = vector.extract_strided_slice %32 {offsets = [0, 16], sizes = [16, 8], strides = [1, 1]} : vector<16x32xbf16> to vector<16x8xbf16>
    %175 = arith.truncf %161 : vector<8x16xf32> to vector<8x16xbf16>
    %cst_58 = arith.constant dense<0.000000e+00> : vector<8x8xf32>
    %176 = tpu.matmul %175, %174, %cst_58 {dimension_numbers = #tpu.dot_dimension_numbers<[1], [0], [0], [1], [0, 0, 1, 1], [], []>} : vector<8x16xbf16>, vector<16x8xbf16>, vector<8x8xf32> -> vector<8x8xf32>
    %c0_59 = arith.constant 0 : index
    %c16 = arith.constant 16 : index
    %177 = vector.load %arg23[%c0_59, %c16] : memref<8x64xf32, #tpu.memory_space<vmem>>, vector<8x8xf32>
    tpu.vector_store %arg23[%c0_59, %c16], %176 {strides = array<i32>} : memref<8x64xf32, #tpu.memory_space<vmem>>, vector<8x8xf32>,
    %178 = vector.extract_strided_slice %34 {offsets = [0, 16], sizes = [16, 8], strides = [1, 1]} : vector<16x32xbf16> to vector<16x8xbf16>
    %179 = arith.truncf %173 : vector<8x16xf32> to vector<8x16xbf16>
    %cst_60 = arith.constant dense<0.000000e+00> : vector<8x8xf32>
    %180 = tpu.matmul %179, %178, %cst_60 {dimension_numbers = #tpu.dot_dimension_numbers<[1], [0], [0], [1], [0, 0, 1, 1], [], []>} : vector<8x16xbf16>, vector<16x8xbf16>, vector<8x8xf32> -> vector<8x8xf32>
    %c0_61 = arith.constant 0 : index
    %c48 = arith.constant 48 : index
    %181 = vector.load %arg23[%c0_61, %c48] : memref<8x64xf32, #tpu.memory_space<vmem>>, vector<8x8xf32>
    tpu.vector_store %arg23[%c0_61, %c48], %180 {strides = array<i32>} : memref<8x64xf32, #tpu.memory_space<vmem>>, vector<8x8xf32>,
    %182 = vector.extract_strided_slice %16 {offsets = [0, 24], sizes = [8, 8], strides = [1, 1]} : vector<8x32xbf16> to vector<8x8xbf16>
    %183 = vector.extract_strided_slice %35 {offsets = [0, 24], sizes = [32, 8], strides = [1, 1]} : vector<32x32xbf16> to vector<32x8xbf16>
    %cst_62 = arith.constant dense<0.000000e+00> : vector<8x32xf32>
    %184 = tpu.matmul %182, %183, %cst_62 {dimension_numbers = #tpu.dot_dimension_numbers<[1], [1], [0], [0], [0, 0, 1, 0], [], []>} : vector<8x8xbf16>, vector<32x8xbf16>, vector<8x32xf32> -> vector<8x32xf32>
    %cst_63 = arith.constant 0.353553385 : f32
    %185 = vector.broadcast %cst_63 : f32 to vector<8x32xf32>
    %186 = arith.mulf %184, %185 : vector<8x32xf32>
    %187 = vector.extract_strided_slice %186 {offsets = [0, 0], sizes = [8, 16], strides = [1, 1]} : vector<8x32xf32> to vector<8x16xf32>
    %188 = arith.addf %187, %67 : vector<8x16xf32>
    %cst_64 = arith.constant dense<0xFF800000> : vector<8xf32>
    %189 = vector.multi_reduction <maximumf>, %188, %cst_64 [1] : vector<8x16xf32> to vector<8xf32>
    %190 = vector.shape_cast %189 : vector<8xf32> to vector<8x1xf32>
    %191 = vector.broadcast %190 : vector<8x1xf32> to vector<8x16xf32>
    %192 = arith.subf %188, %191 : vector<8x16xf32>
    %193 = math.exp %192 : vector<8x16xf32>
    %cst_65 = arith.constant dense<0.000000e+00> : vector<8xf32>
    %194 = vector.multi_reduction <add>, %193, %cst_65 [1] : vector<8x16xf32> to vector<8xf32>
    %195 = vector.shape_cast %194 : vector<8xf32> to vector<8x1xf32>
    %196 = tpu.reciprocal %195 {approx = true} : vector<8x1xf32> -> vector<8x1xf32>
    %197 = vector.broadcast %196 : vector<8x1xf32> to vector<8x16xf32>
    %198 = arith.mulf %193, %197 : vector<8x16xf32>
    %199 = vector.extract_strided_slice %186 {offsets = [0, 16], sizes = [8, 16], strides = [1, 1]} : vector<8x32xf32> to vector<8x16xf32>
    %200 = arith.addf %199, %70 : vector<8x16xf32>
    %cst_66 = arith.constant dense<0xFF800000> : vector<8xf32>
    %201 = vector.multi_reduction <maximumf>, %200, %cst_66 [1] : vector<8x16xf32> to vector<8xf32>
    %202 = vector.shape_cast %201 : vector<8xf32> to vector<8x1xf32>
    %203 = vector.broadcast %202 : vector<8x1xf32> to vector<8x16xf32>
    %204 = arith.subf %200, %203 : vector<8x16xf32>
    %205 = math.exp %204 : vector<8x16xf32>
    %cst_67 = arith.constant dense<0.000000e+00> : vector<8xf32>
    %206 = vector.multi_reduction <add>, %205, %cst_67 [1] : vector<8x16xf32> to vector<8xf32>
    %207 = vector.shape_cast %206 : vector<8xf32> to vector<8x1xf32>
    %208 = tpu.reciprocal %207 {approx = true} : vector<8x1xf32> -> vector<8x1xf32>
    %209 = vector.broadcast %208 : vector<8x1xf32> to vector<8x16xf32>
    %210 = arith.mulf %205, %209 : vector<8x16xf32>
    %211 = vector.extract_strided_slice %32 {offsets = [0, 24], sizes = [16, 8], strides = [1, 1]} : vector<16x32xbf16> to vector<16x8xbf16>
    %212 = arith.truncf %198 : vector<8x16xf32> to vector<8x16xbf16>
    %cst_68 = arith.constant dense<0.000000e+00> : vector<8x8xf32>
    %213 = tpu.matmul %212, %211, %cst_68 {dimension_numbers = #tpu.dot_dimension_numbers<[1], [0], [0], [1], [0, 0, 1, 1], [], []>} : vector<8x16xbf16>, vector<16x8xbf16>, vector<8x8xf32> -> vector<8x8xf32>
    %c0_69 = arith.constant 0 : index
    %c24 = arith.constant 24 : index
    %214 = vector.load %arg23[%c0_69, %c24] : memref<8x64xf32, #tpu.memory_space<vmem>>, vector<8x8xf32>
    tpu.vector_store %arg23[%c0_69, %c24], %213 {strides = array<i32>} : memref<8x64xf32, #tpu.memory_space<vmem>>, vector<8x8xf32>,
    %215 = vector.extract_strided_slice %34 {offsets = [0, 24], sizes = [16, 8], strides = [1, 1]} : vector<16x32xbf16> to vector<16x8xbf16>
    %216 = arith.truncf %210 : vector<8x16xf32> to vector<8x16xbf16>
    %cst_70 = arith.constant dense<0.000000e+00> : vector<8x8xf32>
    %217 = tpu.matmul %216, %215, %cst_70 {dimension_numbers = #tpu.dot_dimension_numbers<[1], [0], [0], [1], [0, 0, 1, 1], [], []>} : vector<8x16xbf16>, vector<16x8xbf16>, vector<8x8xf32> -> vector<8x8xf32>
    %c0_71 = arith.constant 0 : index
    %c56 = arith.constant 56 : index
    %218 = vector.load %arg23[%c0_71, %c56] : memref<8x64xf32, #tpu.memory_space<vmem>>, vector<8x8xf32>
    tpu.vector_store %arg23[%c0_71, %c56], %217 {strides = array<i32>} : memref<8x64xf32, #tpu.memory_space<vmem>>, vector<8x8xf32>,
    %c0_72 = arith.constant 0 : index
    %c0_73 = arith.constant 0 : index
    %219 = vector.load %arg23[%c0_72, %c0_73] : memref<8x64xf32, #tpu.memory_space<vmem>>, vector<8x64xf32>
    %c0_74 = arith.constant 0 : index
    %c0_75 = arith.constant 0 : index
    %220 = vector.load %arg12[%c0_74, %c0_75] : memref<64x32xbf16, #tpu.memory_space<vmem>>, vector<64x32xbf16>
    %221 = arith.truncf %219 : vector<8x64xf32> to vector<8x64xbf16>
    %cst_76 = arith.constant dense<0.000000e+00> : vector<8x32xf32>
    %222 = tpu.matmul %221, %220, %cst_76 {dimension_numbers = #tpu.dot_dimension_numbers<[1], [0], [0], [1], [0, 0, 1, 1], [], []>} : vector<8x64xbf16>, vector<64x32xbf16>, vector<8x32xf32> -> vector<8x32xf32>
    %223 = arith.addf %1, %222 : vector<8x32xf32>
    %c0_77 = arith.constant 0 : index
    %c0_78 = arith.constant 0 : index
    %224 = vector.load %arg13[%c0_77, %c0_78] : memref<1x32xf32, #tpu.memory_space<vmem>>, vector<1x32xf32>
    %225 = vector.broadcast %224 : vector<1x32xf32> to vector<8x32xf32>
    %226 = arith.addf %223, %225 : vector<8x32xf32>
    %c0_79 = arith.constant 0 : index
    %c0_80 = arith.constant 0 : index
    %227 = vector.load %arg14[%c0_79, %c0_80] : memref<1x32xf32, #tpu.memory_space<vmem>>, vector<1x32xf32>
    %c0_81 = arith.constant 0 : index
    %c0_82 = arith.constant 0 : index
    %228 = vector.load %arg15[%c0_81, %c0_82] : memref<1x32xf32, #tpu.memory_space<vmem>>, vector<1x32xf32>
    %cst_83 = arith.constant dense<0.000000e+00> : vector<8xf32>
    %229 = vector.multi_reduction <add>, %226, %cst_83 [1] : vector<8x32xf32> to vector<8xf32>
    %230 = vector.shape_cast %229 : vector<8xf32> to vector<8x1xf32>
    %cst_84 = arith.constant 3.200000e+01 : f32
    %231 = vector.broadcast %cst_84 : f32 to vector<8x1xf32>
    %232 = arith.divf %230, %231 : vector<8x1xf32>
    %233 = vector.broadcast %232 : vector<8x1xf32> to vector<8x32xf32>
    %234 = arith.subf %226, %233 : vector<8x32xf32>
    %235 = arith.mulf %234, %234 : vector<8x32xf32>
    %cst_85 = arith.constant dense<0.000000e+00> : vector<8xf32>
    %236 = vector.multi_reduction <add>, %235, %cst_85 [1] : vector<8x32xf32> to vector<8xf32>
    %237 = vector.shape_cast %236 : vector<8xf32> to vector<8x1xf32>
    %cst_86 = arith.constant 3.200000e+01 : f32
    %238 = vector.broadcast %cst_86 : f32 to vector<8x1xf32>
    %239 = arith.divf %237, %238 : vector<8x1xf32>
    %cst_87 = arith.constant 9.99999974E-6 : f32
    %240 = vector.broadcast %cst_87 : f32 to vector<8x1xf32>
    %241 = arith.addf %239, %240 : vector<8x1xf32>
    %242 = math.rsqrt %241 : vector<8x1xf32>
    %243 = vector.broadcast %242 : vector<8x1xf32> to vector<8x32xf32>
    %244 = arith.mulf %234, %243 : vector<8x32xf32>
    %245 = vector.broadcast %227 : vector<1x32xf32> to vector<8x32xf32>
    %246 = arith.mulf %244, %245 : vector<8x32xf32>
    %247 = vector.broadcast %228 : vector<1x32xf32> to vector<8x32xf32>
    %248 = arith.addf %246, %247 : vector<8x32xf32>
    %c0_88 = arith.constant 0 : index
    %c0_89 = arith.constant 0 : index
    %249 = vector.load %arg16[%c0_88, %c0_89] : memref<32x64xbf16, #tpu.memory_space<vmem>>, vector<32x64xbf16>
    %250 = arith.truncf %248 : vector<8x32xf32> to vector<8x32xbf16>
    %cst_90 = arith.constant dense<0.000000e+00> : vector<8x64xf32>
    %251 = tpu.matmul %250, %249, %cst_90 {dimension_numbers = #tpu.dot_dimension_numbers<[1], [0], [0], [1], [0, 0, 1, 1], [], []>} : vector<8x32xbf16>, vector<32x64xbf16>, vector<8x64xf32> -> vector<8x64xf32>
    %c0_91 = arith.constant 0 : index
    %c0_92 = arith.constant 0 : index
    %252 = vector.load %arg17[%c0_91, %c0_92] : memref<1x64xf32, #tpu.memory_space<vmem>>, vector<1x64xf32>
    %253 = vector.broadcast %252 : vector<1x64xf32> to vector<8x64xf32>
    %254 = arith.addf %251, %253 : vector<8x64xf32>
    %cst_93 = arith.constant 0.000000e+00 : f32
    %255 = vector.broadcast %cst_93 : f32 to vector<8x64xf32>
    %256 = arith.maximumf %254, %255 : vector<8x64xf32>
    %c0_94 = arith.constant 0 : index
    %c0_95 = arith.constant 0 : index
    %257 = vector.load %arg18[%c0_94, %c0_95] : memref<64x32xbf16, #tpu.memory_space<vmem>>, vector<64x32xbf16>
    %258 = arith.truncf %256 : vector<8x64xf32> to vector<8x64xbf16>
    %cst_96 = arith.constant dense<0.000000e+00> : vector<8x32xf32>
    %259 = tpu.matmul %258, %257, %cst_96 {dimension_numbers = #tpu.dot_dimension_numbers<[1], [0], [0], [1], [0, 0, 1, 1], [], []>} : vector<8x64xbf16>, vector<64x32xbf16>, vector<8x32xf32> -> vector<8x32xf32>
    %c0_97 = arith.constant 0 : index
    %c0_98 = arith.constant 0 : index
    %260 = vector.load %arg19[%c0_97, %c0_98] : memref<1x32xf32, #tpu.memory_space<vmem>>, vector<1x32xf32>
    %261 = vector.broadcast %260 : vector<1x32xf32> to vector<8x32xf32>
    %262 = arith.addf %259, %261 : vector<8x32xf32>
    %263 = arith.addf %262, %248 : vector<8x32xf32>
    %c0_99 = arith.constant 0 : index
    %c0_100 = arith.constant 0 : index
    %264 = vector.load %arg20[%c0_99, %c0_100] : memref<1x32xf32, #tpu.memory_space<vmem>>, vector<1x32xf32>
    %c0_101 = arith.constant 0 : index
    %c0_102 = arith.constant 0 : index
    %265 = vector.load %arg21[%c0_101, %c0_102] : memref<1x32xf32, #tpu.memory_space<vmem>>, vector<1x32xf32>
    %cst_103 = arith.constant dense<0.000000e+00> : vector<8xf32>
    %266 = vector.multi_reduction <add>, %263, %cst_103 [1] : vector<8x32xf32> to vector<8xf32>
    %267 = vector.shape_cast %266 : vector<8xf32> to vector<8x1xf32>
    %cst_104 = arith.constant 3.200000e+01 : f32
    %268 = vector.broadcast %cst_104 : f32 to vector<8x1xf32>
    %269 = arith.divf %267, %268 : vector<8x1xf32>
    %270 = vector.broadcast %269 : vector<8x1xf32> to vector<8x32xf32>
    %271 = arith.subf %263, %270 : vector<8x32xf32>
    %272 = arith.mulf %271, %271 : vector<8x32xf32>
    %cst_105 = arith.constant dense<0.000000e+00> : vector<8xf32>
    %273 = vector.multi_reduction <add>, %272, %cst_105 [1] : vector<8x32xf32> to vector<8xf32>
    %274 = vector.shape_cast %273 : vector<8xf32> to vector<8x1xf32>
    %cst_106 = arith.constant 3.200000e+01 : f32
    %275 = vector.broadcast %cst_106 : f32 to vector<8x1xf32>
    %276 = arith.divf %274, %275 : vector<8x1xf32>
    %cst_107 = arith.constant 9.99999974E-6 : f32
    %277 = vector.broadcast %cst_107 : f32 to vector<8x1xf32>
    %278 = arith.addf %276, %277 : vector<8x1xf32>
    %279 = math.rsqrt %278 : vector<8x1xf32>
    %280 = vector.broadcast %279 : vector<8x1xf32> to vector<8x32xf32>
    %281 = arith.mulf %271, %280 : vector<8x32xf32>
    %282 = vector.broadcast %264 : vector<1x32xf32> to vector<8x32xf32>
    %283 = arith.mulf %281, %282 : vector<8x32xf32>
    %284 = vector.broadcast %265 : vector<1x32xf32> to vector<8x32xf32>
    %285 = arith.addf %283, %284 : vector<8x32xf32>
    %c0_108 = arith.constant 0 : index
    %c0_109 = arith.constant 0 : index
    %c0_110 = arith.constant 0 : index
    %286 = vector.load %arg22[%c0_108, %c0_109, %c0_110] : memref<1x8x32xf32, #tpu.memory_space<vmem>>, vector<1x8x32xf32>
    %287 = vector.shape_cast %286 : vector<1x8x32xf32> to vector<8x32xf32>
    %288 = vector.shape_cast %285 : vector<8x32xf32> to vector<1x8x32xf32>
    tpu.vector_store %arg22[%c0_108, %c0_109, %c0_110], %288 {strides = array<i32>} : memref<1x8x32xf32, #tpu.memory_space<vmem>>, vector<1x8x32xf32>,
    return
  }
  func.func @transform_0(%arg0: i32, %arg1: i32) -> (i32, i32, i32) {
    %c0_i32 = arith.constant 0 : i32
    %c0_i32_0 = arith.constant 0 : i32
    return %arg0, %arg1, %c0_i32 : i32, i32, i32
  }
  func.func @transform_1(%arg0: i32, %arg1: i32) -> (i32, i32, i32) {
    %c1_i32 = arith.constant 1 : i32
    %0 = arith.subi %arg1, %c1_i32 : i32
    %c0_i32 = arith.constant 0 : i32
    %1 = arith.maxsi %0, %c0_i32 : i32
    %c0_i32_0 = arith.constant 0 : i32
    %c0_i32_1 = arith.constant 0 : i32
    return %arg0, %1, %c0_i32_0 : i32, i32, i32
  }
  func.func @transform_2(%arg0: i32, %arg1: i32) -> (i32, i32, i32) {
    %c0_i32 = arith.constant 0 : i32
    %c0_i32_0 = arith.constant 0 : i32
    return %arg0, %arg1, %c0_i32 : i32, i32, i32
  }
  func.func @transform_3(%arg0: i32, %arg1: i32) -> (i32, i32, i32) {
    %c1_i32 = arith.constant 1 : i32
    %0 = arith.addi %arg1, %c1_i32 : i32
    %c1_i32_0 = arith.constant 1 : i32
    %1 = arith.minsi %0, %c1_i32_0 : i32
    %c0_i32 = arith.constant 0 : i32
    %c0_i32_1 = arith.constant 0 : i32
    return %arg0, %1, %c0_i32 : i32, i32, i32
  }
  func.func @transform_4(%arg0: i32, %arg1: i32) -> (i32, i32) {
    %c0_i32 = arith.constant 0 : i32
    %c0_i32_0 = arith.constant 0 : i32
    %c0_i32_1 = arith.constant 0 : i32
    return %c0_i32, %c0_i32_0 : i32, i32
  }
  func.func @transform_5(%arg0: i32, %arg1: i32) -> (i32, i32) {
    %c0_i32 = arith.constant 0 : i32
    %c0_i32_0 = arith.constant 0 : i32
    %c0_i32_1 = arith.constant 0 : i32
    return %c0_i32, %c0_i32_0 : i32, i32
  }
  func.func @transform_6(%arg0: i32, %arg1: i32) -> (i32, i32) {
    %c0_i32 = arith.constant 0 : i32
    %c0_i32_0 = arith.constant 0 : i32
    %c0_i32_1 = arith.constant 0 : i32
    return %c0_i32, %c0_i32_0 : i32, i32
  }
  func.func @transform_7(%arg0: i32, %arg1: i32) -> (i32, i32) {
    %c0_i32 = arith.constant 0 : i32
    %c0_i32_0 = arith.constant 0 : i32
    %c0_i32_1 = arith.constant 0 : i32
    return %c0_i32, %c0_i32_0 : i32, i32
  }
  func.func @transform_8(%arg0: i32, %arg1: i32) -> (i32, i32) {
    %c0_i32 = arith.constant 0 : i32
    %c0_i32_0 = arith.constant 0 : i32
    %c0_i32_1 = arith.constant 0 : i32
    return %c0_i32, %c0_i32_0 : i32, i32
  }
  func.func @transform_9(%arg0: i32, %arg1: i32) -> (i32, i32) {
    %c0_i32 = arith.constant 0 : i32
    %c0_i32_0 = arith.constant 0 : i32
    %c0_i32_1 = arith.constant 0 : i32
    return %c0_i32, %c0_i32_0 : i32, i32
  }
  func.func @transform_10(%arg0: i32, %arg1: i32) -> (i32, i32) {
    %c0_i32 = arith.constant 0 : i32
    %c0_i32_0 = arith.constant 0 : i32
    %c0_i32_1 = arith.constant 0 : i32
    return %c0_i32, %c0_i32_0 : i32, i32
  }
  func.func @transform_11(%arg0: i32, %arg1: i32) -> (i32, i32) {
    %c0_i32 = arith.constant 0 : i32
    %c0_i32_0 = arith.constant 0 : i32
    %c0_i32_1 = arith.constant 0 : i32
    return %c0_i32, %c0_i32_0 : i32, i32
  }
  func.func @transform_12(%arg0: i32, %arg1: i32) -> (i32, i32) {
    %c0_i32 = arith.constant 0 : i32
    %c0_i32_0 = arith.constant 0 : i32
    %c0_i32_1 = arith.constant 0 : i32
    return %c0_i32, %c0_i32_0 : i32, i32
  }
  func.func @transform_13(%arg0: i32, %arg1: i32) -> (i32, i32) {
    %c0_i32 = arith.constant 0 : i32
    %c0_i32_0 = arith.constant 0 : i32
    %c0_i32_1 = arith.constant 0 : i32
    return %c0_i32, %c0_i32_0 : i32, i32
  }
  func.func @transform_14(%arg0: i32, %arg1: i32) -> (i32, i32) {
    %c0_i32 = arith.constant 0 : i32
    %c0_i32_0 = arith.constant 0 : i32
    %c0_i32_1 = arith.constant 0 : i32
    return %c0_i32, %c0_i32_0 : i32, i32
  }
  func.func @transform_15(%arg0: i32, %arg1: i32) -> (i32, i32) {
    %c0_i32 = arith.constant 0 : i32
    %c0_i32_0 = arith.constant 0 : i32
    %c0_i32_1 = arith.constant 0 : i32
    return %c0_i32, %c0_i32_0 : i32, i32
  }
  func.func @transform_16(%arg0: i32, %arg1: i32) -> (i32, i32) {
    %c0_i32 = arith.constant 0 : i32
    %c0_i32_0 = arith.constant 0 : i32
    %c0_i32_1 = arith.constant 0 : i32
    return %c0_i32, %c0_i32_0 : i32, i32
  }
  func.func @transform_17(%arg0: i32, %arg1: i32) -> (i32, i32) {
    %c0_i32 = arith.constant 0 : i32
    %c0_i32_0 = arith.constant 0 : i32
    %c0_i32_1 = arith.constant 0 : i32
    return %c0_i32, %c0_i32_0 : i32, i32
  }
  func.func @transform_18(%arg0: i32, %arg1: i32) -> (i32, i32) {
    %c0_i32 = arith.constant 0 : i32
    %c0_i32_0 = arith.constant 0 : i32
    %c0_i32_1 = arith.constant 0 : i32
    return %c0_i32, %c0_i32_0 : i32, i32
  }
  func.func @transform_19(%arg0: i32, %arg1: i32) -> (i32, i32) {
    %c0_i32 = arith.constant 0 : i32
    %c0_i32_0 = arith.constant 0 : i32
    %c0_i32_1 = arith.constant 0 : i32
    return %c0_i32, %c0_i32_0 : i32, i32
  }
  func.func @transform_20(%arg0: i32, %arg1: i32) -> (i32, i32, i32) {
    %c0_i32 = arith.constant 0 : i32
    %c0_i32_0 = arith.constant 0 : i32
    return %arg0, %arg1, %c0_i32 : i32, i32, i32
  }
}

module attributes {stable_mosaic.version = 11 : i64} {
  func.func @_final_kernel(%arg0: i32, %arg1: i32, %arg2: memref<1x8x32xf32, #tpu.memory_space<vmem>>, %arg3: memref<1x32xf32, #tpu.memory_space<vmem>>, %arg4: memref<1x32xf32, #tpu.memory_space<vmem>>, %arg5: memref<32x8xbf16, #tpu.memory_space<vmem>>, %arg6: memref<1x8xf32, #tpu.memory_space<vmem>>, %arg7: memref<1x8x8xf32, #tpu.memory_space<vmem>>) attributes {dimension_semantics = [#tpu.dimension_semantics<parallel>, #tpu.dimension_semantics<parallel>], iteration_bounds = array<i64: 2, 2>, scalar_prefetch = 0 : i64, scratch_operands = 0 : i64, tpu.core_type = #tpu.core_type<tc>, window_params = [{transform_indices = @transform_0, window_bounds = array<i64: 1, 8, 32>}, {pipeline_mode = #tpu.pipeline_mode<synchronous>, transform_indices = @transform_1, window_bounds = array<i64: 1, 32>}, {pipeline_mode = #tpu.pipeline_mode<synchronous>, transform_indices = @transform_2, window_bounds = array<i64: 1, 32>}, {pipeline_mode = #tpu.pipeline_mode<synchronous>, transform_indices = @transform_3, window_bounds = array<i64: 32, 8>}, {pipeline_mode = #tpu.pipeline_mode<synchronous>, transform_indices = @transform_4, window_bounds = array<i64: 1, 8>}, {transform_indices = @transform_5, window_bounds = array<i64: 1, 8, 8>}]} {
    %c0 = arith.constant 0 : index
    %c0_0 = arith.constant 0 : index
    %c0_1 = arith.constant 0 : index
    %0 = vector.load %arg2[%c0, %c0_0, %c0_1] : memref<1x8x32xf32, #tpu.memory_space<vmem>>, vector<1x8x32xf32>
    %1 = vector.shape_cast %0 : vector<1x8x32xf32> to vector<8x32xf32>
    %c0_2 = arith.constant 0 : index
    %c0_3 = arith.constant 0 : index
    %2 = vector.load %arg3[%c0_2, %c0_3] : memref<1x32xf32, #tpu.memory_space<vmem>>, vector<1x32xf32>
    %c0_4 = arith.constant 0 : index
    %c0_5 = arith.constant 0 : index
    %3 = vector.load %arg4[%c0_4, %c0_5] : memref<1x32xf32, #tpu.memory_space<vmem>>, vector<1x32xf32>
    %cst = arith.constant dense<0.000000e+00> : vector<8xf32>
    %4 = vector.multi_reduction <add>, %1, %cst [1] : vector<8x32xf32> to vector<8xf32>
    %5 = vector.shape_cast %4 : vector<8xf32> to vector<8x1xf32>
    %cst_6 = arith.constant 3.200000e+01 : f32
    %6 = vector.broadcast %cst_6 : f32 to vector<8x1xf32>
    %7 = arith.divf %5, %6 : vector<8x1xf32>
    %8 = vector.broadcast %7 : vector<8x1xf32> to vector<8x32xf32>
    %9 = arith.subf %1, %8 : vector<8x32xf32>
    %10 = arith.mulf %9, %9 : vector<8x32xf32>
    %cst_7 = arith.constant dense<0.000000e+00> : vector<8xf32>
    %11 = vector.multi_reduction <add>, %10, %cst_7 [1] : vector<8x32xf32> to vector<8xf32>
    %12 = vector.shape_cast %11 : vector<8xf32> to vector<8x1xf32>
    %cst_8 = arith.constant 3.200000e+01 : f32
    %13 = vector.broadcast %cst_8 : f32 to vector<8x1xf32>
    %14 = arith.divf %12, %13 : vector<8x1xf32>
    %cst_9 = arith.constant 9.99999997E-7 : f32
    %15 = vector.broadcast %cst_9 : f32 to vector<8x1xf32>
    %16 = arith.addf %14, %15 : vector<8x1xf32>
    %17 = math.rsqrt %16 : vector<8x1xf32>
    %18 = vector.broadcast %17 : vector<8x1xf32> to vector<8x32xf32>
    %19 = arith.mulf %9, %18 : vector<8x32xf32>
    %20 = vector.broadcast %2 : vector<1x32xf32> to vector<8x32xf32>
    %21 = arith.mulf %19, %20 : vector<8x32xf32>
    %22 = vector.broadcast %3 : vector<1x32xf32> to vector<8x32xf32>
    %23 = arith.addf %21, %22 : vector<8x32xf32>
    %c0_10 = arith.constant 0 : index
    %c0_11 = arith.constant 0 : index
    %24 = vector.load %arg5[%c0_10, %c0_11] : memref<32x8xbf16, #tpu.memory_space<vmem>>, vector<32x8xbf16>
    %25 = arith.truncf %23 : vector<8x32xf32> to vector<8x32xbf16>
    %cst_12 = arith.constant dense<0.000000e+00> : vector<8x8xf32>
    %26 = tpu.matmul %25, %24, %cst_12 {dimension_numbers = #tpu.dot_dimension_numbers<[1], [0], [0], [1], [0, 0, 1, 1], [], []>} : vector<8x32xbf16>, vector<32x8xbf16>, vector<8x8xf32> -> vector<8x8xf32>
    %c0_13 = arith.constant 0 : index
    %c0_14 = arith.constant 0 : index
    %27 = vector.load %arg6[%c0_13, %c0_14] : memref<1x8xf32, #tpu.memory_space<vmem>>, vector<1x8xf32>
    %28 = vector.broadcast %27 : vector<1x8xf32> to vector<8x8xf32>
    %29 = arith.addf %26, %28 : vector<8x8xf32>
    %c0_15 = arith.constant 0 : index
    %c0_16 = arith.constant 0 : index
    %c0_17 = arith.constant 0 : index
    %30 = vector.load %arg7[%c0_15, %c0_16, %c0_17] : memref<1x8x8xf32, #tpu.memory_space<vmem>>, vector<1x8x8xf32>
    %31 = vector.shape_cast %30 : vector<1x8x8xf32> to vector<8x8xf32>
    %32 = vector.shape_cast %29 : vector<8x8xf32> to vector<1x8x8xf32>
    tpu.vector_store %arg7[%c0_15, %c0_16, %c0_17], %32 {strides = array<i32>} : memref<1x8x8xf32, #tpu.memory_space<vmem>>, vector<1x8x8xf32>,
    return
  }
  func.func @transform_0(%arg0: i32, %arg1: i32) -> (i32, i32, i32) {
    %c0_i32 = arith.constant 0 : i32
    %c0_i32_0 = arith.constant 0 : i32
    return %arg0, %arg1, %c0_i32 : i32, i32, i32
  }
  func.func @transform_1(%arg0: i32, %arg1: i32) -> (i32, i32) {
    %c0_i32 = arith.constant 0 : i32
    %c0_i32_0 = arith.constant 0 : i32
    %c0_i32_1 = arith.constant 0 : i32
    return %c0_i32, %c0_i32_0 : i32, i32
  }
  func.func @transform_2(%arg0: i32, %arg1: i32) -> (i32, i32) {
    %c0_i32 = arith.constant 0 : i32
    %c0_i32_0 = arith.constant 0 : i32
    %c0_i32_1 = arith.constant 0 : i32
    return %c0_i32, %c0_i32_0 : i32, i32
  }
  func.func @transform_3(%arg0: i32, %arg1: i32) -> (i32, i32) {
    %c0_i32 = arith.constant 0 : i32
    %c0_i32_0 = arith.constant 0 : i32
    %c0_i32_1 = arith.constant 0 : i32
    return %c0_i32, %c0_i32_0 : i32, i32
  }
  func.func @transform_4(%arg0: i32, %arg1: i32) -> (i32, i32) {
    %c0_i32 = arith.constant 0 : i32
    %c0_i32_0 = arith.constant 0 : i32
    %c0_i32_1 = arith.constant 0 : i32
    return %c0_i32, %c0_i32_0 : i32, i32
  }
  func.func @transform_5(%arg0: i32, %arg1: i32) -> (i32, i32, i32) {
    %c0_i32 = arith.constant 0 : i32
    %c0_i32_0 = arith.constant 0 : i32
    return %arg0, %arg1, %c0_i32 : i32, i32, i32
  }
}

module attributes {stable_mosaic.version = 11 : i64} {
  func.func @_pnca_layer_kernel(%arg0: i32, %arg1: i32, %arg2: memref<1x8x32xf32, #tpu.memory_space<vmem>>, %arg3: memref<1x8x32xf32, #tpu.memory_space<vmem>>, %arg4: memref<1x8x24xf32, #tpu.memory_space<vmem>>, %arg5: memref<1x8x24xf32, #tpu.memory_space<vmem>>, %arg6: memref<32x32xbf16, #tpu.memory_space<vmem>>, %arg7: memref<1x32xf32, #tpu.memory_space<vmem>>, %arg8: memref<32x64xbf16, #tpu.memory_space<vmem>>, %arg9: memref<1x64xf32, #tpu.memory_space<vmem>>, %arg10: memref<24x64xbf16, #tpu.memory_space<vmem>>, %arg11: memref<1x64xf32, #tpu.memory_space<vmem>>, %arg12: memref<64x32xbf16, #tpu.memory_space<vmem>>, %arg13: memref<1x32xf32, #tpu.memory_space<vmem>>, %arg14: memref<1x32xf32, #tpu.memory_space<vmem>>, %arg15: memref<1x32xf32, #tpu.memory_space<vmem>>, %arg16: memref<32x64xbf16, #tpu.memory_space<vmem>>, %arg17: memref<1x64xf32, #tpu.memory_space<vmem>>, %arg18: memref<64x32xbf16, #tpu.memory_space<vmem>>, %arg19: memref<1x32xf32, #tpu.memory_space<vmem>>, %arg20: memref<1x32xf32, #tpu.memory_space<vmem>>, %arg21: memref<1x32xf32, #tpu.memory_space<vmem>>, %arg22: memref<1x8x32xf32, #tpu.memory_space<vmem>>, %arg23: memref<8x64xf32, #tpu.memory_space<vmem>>) attributes {dimension_semantics = [#tpu.dimension_semantics<parallel>, #tpu.dimension_semantics<parallel>], iteration_bounds = array<i64: 2, 2>, scalar_prefetch = 0 : i64, scratch_operands = 1 : i64, tpu.core_type = #tpu.core_type<tc>, window_params = [{transform_indices = @transform_0, window_bounds = array<i64: 1, 8, 32>}, {transform_indices = @transform_1, window_bounds = array<i64: 1, 8, 32>}, {transform_indices = @transform_2, window_bounds = array<i64: 1, 8, 24>}, {transform_indices = @transform_3, window_bounds = array<i64: 1, 8, 24>}, {pipeline_mode = #tpu.pipeline_mode<synchronous>, transform_indices = @transform_4, window_bounds = array<i64: 32, 32>}, {pipeline_mode = #tpu.pipeline_mode<synchronous>, transform_indices = @transform_5, window_bounds = array<i64: 1, 32>}, {pipeline_mode = #tpu.pipeline_mode<synchronous>, transform_indices = @transform_6, window_bounds = array<i64: 32, 64>}, {pipeline_mode = #tpu.pipeline_mode<synchronous>, transform_indices = @transform_7, window_bounds = array<i64: 1, 64>}, {pipeline_mode = #tpu.pipeline_mode<synchronous>, transform_indices = @transform_8, window_bounds = array<i64: 24, 64>}, {pipeline_mode = #tpu.pipeline_mode<synchronous>, transform_indices = @transform_9, window_bounds = array<i64: 1, 64>}, {pipeline_mode = #tpu.pipeline_mode<synchronous>, transform_indices = @transform_10, window_bounds = array<i64: 64, 32>}, {pipeline_mode = #tpu.pipeline_mode<synchronous>, transform_indices = @transform_11, window_bounds = array<i64: 1, 32>}, {pipeline_mode = #tpu.pipeline_mode<synchronous>, transform_indices = @transform_12, window_bounds = array<i64: 1, 32>}, {pipeline_mode = #tpu.pipeline_mode<synchronous>, transform_indices = @transform_13, window_bounds = array<i64: 1, 32>}, {pipeline_mode = #tpu.pipeline_mode<synchronous>, transform_indices = @transform_14, window_bounds = array<i64: 32, 64>}, {pipeline_mode = #tpu.pipeline_mode<synchronous>, transform_indices = @transform_15, window_bounds = array<i64: 1, 64>}, {pipeline_mode = #tpu.pipeline_mode<synchronous>, transform_indices = @transform_16, window_bounds = array<i64: 64, 32>}, {pipeline_mode = #tpu.pipeline_mode<synchronous>, transform_indices = @transform_17, window_bounds = array<i64: 1, 32>}, {pipeline_mode = #tpu.pipeline_mode<synchronous>, transform_indices = @transform_18, window_bounds = array<i64: 1, 32>}, {pipeline_mode = #tpu.pipeline_mode<synchronous>, transform_indices = @transform_19, window_bounds = array<i64: 1, 32>}, {transform_indices = @transform_20, window_bounds = array<i64: 1, 8, 32>}]} {
    %c0 = arith.constant 0 : index
    %c0_0 = arith.constant 0 : index
    %c0_1 = arith.constant 0 : index
    %0 = vector.load %arg2[%c0, %c0_0, %c0_1] : memref<1x8x32xf32, #tpu.memory_space<vmem>>, vector<1x8x32xf32>
    %1 = vector.shape_cast %0 : vector<1x8x32xf32> to vector<8x32xf32>
    %c0_2 = arith.constant 0 : index
    %c0_3 = arith.constant 0 : index
    %c0_4 = arith.constant 0 : index
    %2 = vector.load %arg3[%c0_2, %c0_3, %c0_4] : memref<1x8x32xf32, #tpu.memory_space<vmem>>, vector<1x8x32xf32>
    %3 = vector.shape_cast %2 : vector<1x8x32xf32> to vector<8x32xf32>
    %4 = tpu.concatenate %3, %1 in 0 : vector<8x32xf32>, vector<8x32xf32> -> vector<16x32xf32>
    %c0_5 = arith.constant 0 : index
    %c0_6 = arith.constant 0 : index
    %c0_7 = arith.constant 0 : index
    %5 = vector.load %arg4[%c0_5, %c0_6, %c0_7] : memref<1x8x24xf32, #tpu.memory_space<vmem>>, vector<1x8x24xf32>
    %6 = vector.shape_cast %5 : vector<1x8x24xf32> to vector<8x24xf32>
    %c0_8 = arith.constant 0 : index
    %c0_9 = arith.constant 0 : index
    %c0_10 = arith.constant 0 : index
    %7 = vector.load %arg5[%c0_8, %c0_9, %c0_10] : memref<1x8x24xf32, #tpu.memory_space<vmem>>, vector<1x8x24xf32>
    %8 = vector.shape_cast %7 : vector<1x8x24xf32> to vector<8x24xf32>
    %9 = tpu.concatenate %6, %8 in 0 : vector<8x24xf32>, vector<8x24xf32> -> vector<16x24xf32>
    %c0_11 = arith.constant 0 : index
    %c0_12 = arith.constant 0 : index
    %10 = vector.load %arg6[%c0_11, %c0_12] : memref<32x32xbf16, #tpu.memory_space<vmem>>, vector<32x32xbf16>
    %11 = arith.truncf %1 : vector<8x32xf32> to vector<8x32xbf16>
    %cst = arith.constant dense<0.000000e+00> : vector<8x32xf32>
    %12 = tpu.matmul %11, %10, %cst {dimension_numbers = #tpu.dot_dimension_numbers<[1], [0], [0], [1], [0, 0, 1, 1], [], []>} : vector<8x32xbf16>, vector<32x32xbf16>, vector<8x32xf32> -> vector<8x32xf32>
    %c0_13 = arith.constant 0 : index
    %c0_14 = arith.constant 0 : index
    %13 = vector.load %arg7[%c0_13, %c0_14] : memref<1x32xf32, #tpu.memory_space<vmem>>, vector<1x32xf32>
    %14 = vector.broadcast %13 : vector<1x32xf32> to vector<8x32xf32>
    %15 = arith.addf %12, %14 : vector<8x32xf32>
    %16 = arith.truncf %15 : vector<8x32xf32> to vector<8x32xbf16>
    %c0_15 = arith.constant 0 : index
    %c0_16 = arith.constant 0 : index
    %17 = vector.load %arg8[%c0_15, %c0_16] : memref<32x64xbf16, #tpu.memory_space<vmem>>, vector<32x64xbf16>
    %18 = arith.truncf %4 : vector<16x32xf32> to vector<16x32xbf16>
    %cst_17 = arith.constant dense<0.000000e+00> : vector<16x64xf32>
    %19 = tpu.matmul %18, %17, %cst_17 {dimension_numbers = #tpu.dot_dimension_numbers<[1], [0], [0], [1], [0, 0, 1, 1], [], []>} : vector<16x32xbf16>, vector<32x64xbf16>, vector<16x64xf32> -> vector<16x64xf32>
    %c0_18 = arith.constant 0 : index
    %c0_19 = arith.constant 0 : index
    %20 = vector.load %arg9[%c0_18, %c0_19] : memref<1x64xf32, #tpu.memory_space<vmem>>, vector<1x64xf32>
    %21 = vector.broadcast %20 : vector<1x64xf32> to vector<16x64xf32>
    %22 = arith.addf %19, %21 : vector<16x64xf32>
    %23 = arith.truncf %22 : vector<16x64xf32> to vector<16x64xbf16>
    %c0_20 = arith.constant 0 : index
    %c0_21 = arith.constant 0 : index
    %24 = vector.load %arg10[%c0_20, %c0_21] : memref<24x64xbf16, #tpu.memory_space<vmem>>, vector<24x64xbf16>
    %25 = arith.truncf %9 : vector<16x24xf32> to vector<16x24xbf16>
    %cst_22 = arith.constant dense<0.000000e+00> : vector<16x64xf32>
    %26 = tpu.matmul %25, %24, %cst_22 {dimension_numbers = #tpu.dot_dimension_numbers<[1], [0], [0], [1], [0, 0, 1, 1], [], []>} : vector<16x24xbf16>, vector<24x64xbf16>, vector<16x64xf32> -> vector<16x64xf32>
    %c0_23 = arith.constant 0 : index
    %c0_24 = arith.constant 0 : index
    %27 = vector.load %arg11[%c0_23, %c0_24] : memref<1x64xf32, #tpu.memory_space<vmem>>, vector<1x64xf32>
    %28 = vector.broadcast %27 : vector<1x64xf32> to vector<16x64xf32>
    %29 = arith.addf %26, %28 : vector<16x64xf32>
    %30 = arith.truncf %29 : vector<16x64xf32> to vector<16x64xbf16>
    %31 = vector.extract_strided_slice %23 {offsets = [0, 0], sizes = [16, 32], strides = [1, 1]} : vector<16x64xbf16> to vector<16x32xbf16>
    %32 = vector.extract_strided_slice %23 {offsets = [0, 32], sizes = [16, 32], strides = [1, 1]} : vector<16x64xbf16> to vector<16x32xbf16>
    %33 = vector.extract_strided_slice %30 {offsets = [0, 0], sizes = [16, 32], strides = [1, 1]} : vector<16x64xbf16> to vector<16x32xbf16>
    %34 = vector.extract_strided_slice %30 {offsets = [0, 32], sizes = [16, 32], strides = [1, 1]} : vector<16x64xbf16> to vector<16x32xbf16>
    %35 = tpu.concatenate %31, %33 in 0 : vector<16x32xbf16>, vector<16x32xbf16> -> vector<32x32xbf16>
    %c8_i32 = arith.constant 8 : i32
    %36 = arith.muli %arg1, %c8_i32 : i32
    %37 = tpu.iota {dimensions = array<i32: 0>} : vector<8x16xi32>
    %38 = vector.broadcast %36 : i32 to vector<8x16xi32>
    %39 = arith.addi %38, %37 : vector<8x16xi32>
    %c1_i32 = arith.constant 1 : i32
    %40 = arith.subi %arg1, %c1_i32 : i32
    %c8_i32_25 = arith.constant 8 : i32
    %41 = arith.muli %40, %c8_i32_25 : i32
    %42 = tpu.iota {dimensions = array<i32: 1>} : vector<8x16xi32>
    %43 = vector.broadcast %41 : i32 to vector<8x16xi32>
    %44 = arith.addi %43, %42 : vector<8x16xi32>
    %c8_i32_26 = arith.constant 8 : i32
    %45 = arith.muli %arg1, %c8_i32_26 : i32
    %46 = tpu.iota {dimensions = array<i32: 1>} : vector<8x16xi32>
    %47 = vector.broadcast %45 : i32 to vector<8x16xi32>
    %48 = arith.addi %47, %46 : vector<8x16xi32>
    %c4_i32 = arith.constant 4 : i32
    %49 = vector.broadcast %c4_i32 : i32 to vector<8x16xi32>
    %50 = arith.subi %39, %49 : vector<8x16xi32>
    %51 = arith.cmpi sge, %44, %50 : vector<8x16xi32>
    %52 = arith.cmpi sle, %44, %39 : vector<8x16xi32>
    %53 = arith.andi %51, %52 : vector<8x16xi1>
    %c0_i32 = arith.constant 0 : i32
    %54 = vector.broadcast %c0_i32 : i32 to vector<8x16xi32>
    %55 = arith.cmpi sge, %44, %54 : vector<8x16xi32>
    %56 = arith.andi %53, %55 : vector<8x16xi1>
    %57 = arith.cmpi sge, %48, %39 : vector<8x16xi32>
    %c3_i32 = arith.constant 3 : i32
    %58 = vector.broadcast %c3_i32 : i32 to vector<8x16xi32>
    %59 = arith.addi %39, %58 : vector<8x16xi32>
    %60 = arith.cmpi sle, %48, %59 : vector<8x16xi32>
    %61 = arith.andi %57, %60 : vector<8x16xi1>
    %c16_i32 = arith.constant 16 : i32
    %62 = vector.broadcast %c16_i32 : i32 to vector<8x16xi32>
    %63 = arith.cmpi slt, %48, %62 : vector<8x16xi32>
    %64 = arith.andi %61, %63 : vector<8x16xi1>
    %cst_27 = arith.constant 0.000000e+00 : f32
    %cst_28 = arith.constant -1.000000e+30 : f32
    %65 = vector.broadcast %cst_27 : f32 to vector<8x16xf32>
    %66 = vector.broadcast %cst_28 : f32 to vector<8x16xf32>
    %67 = arith.select %56, %65, %66 : vector<8x16xi1>, vector<8x16xf32>
    %cst_29 = arith.constant 0.000000e+00 : f32
    %cst_30 = arith.constant -1.000000e+30 : f32
    %68 = vector.broadcast %cst_29 : f32 to vector<8x16xf32>
    %69 = vector.broadcast %cst_30 : f32 to vector<8x16xf32>
    %70 = arith.select %64, %68, %69 : vector<8x16xi1>, vector<8x16xf32>
    %71 = vector.extract_strided_slice %16 {offsets = [0, 0], sizes = [8, 8], strides = [1, 1]} : vector<8x32xbf16> to vector<8x8xbf16>
    %72 = vector.extract_strided_slice %35 {offsets = [0, 0], sizes = [32, 8], strides = [1, 1]} : vector<32x32xbf16> to vector<32x8xbf16>
    %cst_31 = arith.constant dense<0.000000e+00> : vector<8x32xf32>
    %73 = tpu.matmul %71, %72, %cst_31 {dimension_numbers = #tpu.dot_dimension_numbers<[1], [1], [0], [0], [0, 0, 1, 0], [], []>} : vector<8x8xbf16>, vector<32x8xbf16>, vector<8x32xf32> -> vector<8x32xf32>
    %cst_32 = arith.constant 0.353553385 : f32
    %74 = vector.broadcast %cst_32 : f32 to vector<8x32xf32>
    %75 = arith.mulf %73, %74 : vector<8x32xf32>
    %76 = vector.extract_strided_slice %75 {offsets = [0, 0], sizes = [8, 16], strides = [1, 1]} : vector<8x32xf32> to vector<8x16xf32>
    %77 = arith.addf %76, %67 : vector<8x16xf32>
    %cst_33 = arith.constant dense<0xFF800000> : vector<8xf32>
    %78 = vector.multi_reduction <maximumf>, %77, %cst_33 [1] : vector<8x16xf32> to vector<8xf32>
    %79 = vector.shape_cast %78 : vector<8xf32> to vector<8x1xf32>
    %80 = vector.broadcast %79 : vector<8x1xf32> to vector<8x16xf32>
    %81 = arith.subf %77, %80 : vector<8x16xf32>
    %82 = math.exp %81 : vector<8x16xf32>
    %cst_34 = arith.constant dense<0.000000e+00> : vector<8xf32>
    %83 = vector.multi_reduction <add>, %82, %cst_34 [1] : vector<8x16xf32> to vector<8xf32>
    %84 = vector.shape_cast %83 : vector<8xf32> to vector<8x1xf32>
    %85 = tpu.reciprocal %84 {approx = true} : vector<8x1xf32> -> vector<8x1xf32>
    %86 = vector.broadcast %85 : vector<8x1xf32> to vector<8x16xf32>
    %87 = arith.mulf %82, %86 : vector<8x16xf32>
    %88 = vector.extract_strided_slice %75 {offsets = [0, 16], sizes = [8, 16], strides = [1, 1]} : vector<8x32xf32> to vector<8x16xf32>
    %89 = arith.addf %88, %70 : vector<8x16xf32>
    %cst_35 = arith.constant dense<0xFF800000> : vector<8xf32>
    %90 = vector.multi_reduction <maximumf>, %89, %cst_35 [1] : vector<8x16xf32> to vector<8xf32>
    %91 = vector.shape_cast %90 : vector<8xf32> to vector<8x1xf32>
    %92 = vector.broadcast %91 : vector<8x1xf32> to vector<8x16xf32>
    %93 = arith.subf %89, %92 : vector<8x16xf32>
    %94 = math.exp %93 : vector<8x16xf32>
    %cst_36 = arith.constant dense<0.000000e+00> : vector<8xf32>
    %95 = vector.multi_reduction <add>, %94, %cst_36 [1] : vector<8x16xf32> to vector<8xf32>
    %96 = vector.shape_cast %95 : vector<8xf32> to vector<8x1xf32>
    %97 = tpu.reciprocal %96 {approx = true} : vector<8x1xf32> -> vector<8x1xf32>
    %98 = vector.broadcast %97 : vector<8x1xf32> to vector<8x16xf32>
    %99 = arith.mulf %94, %98 : vector<8x16xf32>
    %100 = vector.extract_strided_slice %32 {offsets = [0, 0], sizes = [16, 8], strides = [1, 1]} : vector<16x32xbf16> to vector<16x8xbf16>
    %101 = arith.truncf %87 : vector<8x16xf32> to vector<8x16xbf16>
    %cst_37 = arith.constant dense<0.000000e+00> : vector<8x8xf32>
    %102 = tpu.matmul %101, %100, %cst_37 {dimension_numbers = #tpu.dot_dimension_numbers<[1], [0], [0], [1], [0, 0, 1, 1], [], []>} : vector<8x16xbf16>, vector<16x8xbf16>, vector<8x8xf32> -> vector<8x8xf32>
    %c0_38 = arith.constant 0 : index
    %c0_39 = arith.constant 0 : index
    %103 = vector.load %arg23[%c0_38, %c0_39] : memref<8x64xf32, #tpu.memory_space<vmem>>, vector<8x8xf32>
    tpu.vector_store %arg23[%c0_38, %c0_39], %102 {strides = array<i32>} : memref<8x64xf32, #tpu.memory_space<vmem>>, vector<8x8xf32>,
    %104 = vector.extract_strided_slice %34 {offsets = [0, 0], sizes = [16, 8], strides = [1, 1]} : vector<16x32xbf16> to vector<16x8xbf16>
    %105 = arith.truncf %99 : vector<8x16xf32> to vector<8x16xbf16>
    %cst_40 = arith.constant dense<0.000000e+00> : vector<8x8xf32>
    %106 = tpu.matmul %105, %104, %cst_40 {dimension_numbers = #tpu.dot_dimension_numbers<[1], [0], [0], [1], [0, 0, 1, 1], [], []>} : vector<8x16xbf16>, vector<16x8xbf16>, vector<8x8xf32> -> vector<8x8xf32>
    %c0_41 = arith.constant 0 : index
    %c32 = arith.constant 32 : index
    %107 = vector.load %arg23[%c0_41, %c32] : memref<8x64xf32, #tpu.memory_space<vmem>>, vector<8x8xf32>
    tpu.vector_store %arg23[%c0_41, %c32], %106 {strides = array<i32>} : memref<8x64xf32, #tpu.memory_space<vmem>>, vector<8x8xf32>,
    %108 = vector.extract_strided_slice %16 {offsets = [0, 8], sizes = [8, 8], strides = [1, 1]} : vector<8x32xbf16> to vector<8x8xbf16>
    %109 = vector.extract_strided_slice %35 {offsets = [0, 8], sizes = [32, 8], strides = [1, 1]} : vector<32x32xbf16> to vector<32x8xbf16>
    %cst_42 = arith.constant dense<0.000000e+00> : vector<8x32xf32>
    %110 = tpu.matmul %108, %109, %cst_42 {dimension_numbers = #tpu.dot_dimension_numbers<[1], [1], [0], [0], [0, 0, 1, 0], [], []>} : vector<8x8xbf16>, vector<32x8xbf16>, vector<8x32xf32> -> vector<8x32xf32>
    %cst_43 = arith.constant 0.353553385 : f32
    %111 = vector.broadcast %cst_43 : f32 to vector<8x32xf32>
    %112 = arith.mulf %110, %111 : vector<8x32xf32>
    %113 = vector.extract_strided_slice %112 {offsets = [0, 0], sizes = [8, 16], strides = [1, 1]} : vector<8x32xf32> to vector<8x16xf32>
    %114 = arith.addf %113, %67 : vector<8x16xf32>
    %cst_44 = arith.constant dense<0xFF800000> : vector<8xf32>
    %115 = vector.multi_reduction <maximumf>, %114, %cst_44 [1] : vector<8x16xf32> to vector<8xf32>
    %116 = vector.shape_cast %115 : vector<8xf32> to vector<8x1xf32>
    %117 = vector.broadcast %116 : vector<8x1xf32> to vector<8x16xf32>
    %118 = arith.subf %114, %117 : vector<8x16xf32>
    %119 = math.exp %118 : vector<8x16xf32>
    %cst_45 = arith.constant dense<0.000000e+00> : vector<8xf32>
    %120 = vector.multi_reduction <add>, %119, %cst_45 [1] : vector<8x16xf32> to vector<8xf32>
    %121 = vector.shape_cast %120 : vector<8xf32> to vector<8x1xf32>
    %122 = tpu.reciprocal %121 {approx = true} : vector<8x1xf32> -> vector<8x1xf32>
    %123 = vector.broadcast %122 : vector<8x1xf32> to vector<8x16xf32>
    %124 = arith.mulf %119, %123 : vector<8x16xf32>
    %125 = vector.extract_strided_slice %112 {offsets = [0, 16], sizes = [8, 16], strides = [1, 1]} : vector<8x32xf32> to vector<8x16xf32>
    %126 = arith.addf %125, %70 : vector<8x16xf32>
    %cst_46 = arith.constant dense<0xFF800000> : vector<8xf32>
    %127 = vector.multi_reduction <maximumf>, %126, %cst_46 [1] : vector<8x16xf32> to vector<8xf32>
    %128 = vector.shape_cast %127 : vector<8xf32> to vector<8x1xf32>
    %129 = vector.broadcast %128 : vector<8x1xf32> to vector<8x16xf32>
    %130 = arith.subf %126, %129 : vector<8x16xf32>
    %131 = math.exp %130 : vector<8x16xf32>
    %cst_47 = arith.constant dense<0.000000e+00> : vector<8xf32>
    %132 = vector.multi_reduction <add>, %131, %cst_47 [1] : vector<8x16xf32> to vector<8xf32>
    %133 = vector.shape_cast %132 : vector<8xf32> to vector<8x1xf32>
    %134 = tpu.reciprocal %133 {approx = true} : vector<8x1xf32> -> vector<8x1xf32>
    %135 = vector.broadcast %134 : vector<8x1xf32> to vector<8x16xf32>
    %136 = arith.mulf %131, %135 : vector<8x16xf32>
    %137 = vector.extract_strided_slice %32 {offsets = [0, 8], sizes = [16, 8], strides = [1, 1]} : vector<16x32xbf16> to vector<16x8xbf16>
    %138 = arith.truncf %124 : vector<8x16xf32> to vector<8x16xbf16>
    %cst_48 = arith.constant dense<0.000000e+00> : vector<8x8xf32>
    %139 = tpu.matmul %138, %137, %cst_48 {dimension_numbers = #tpu.dot_dimension_numbers<[1], [0], [0], [1], [0, 0, 1, 1], [], []>} : vector<8x16xbf16>, vector<16x8xbf16>, vector<8x8xf32> -> vector<8x8xf32>
    %c0_49 = arith.constant 0 : index
    %c8 = arith.constant 8 : index
    %140 = vector.load %arg23[%c0_49, %c8] : memref<8x64xf32, #tpu.memory_space<vmem>>, vector<8x8xf32>
    tpu.vector_store %arg23[%c0_49, %c8], %139 {strides = array<i32>} : memref<8x64xf32, #tpu.memory_space<vmem>>, vector<8x8xf32>,
    %141 = vector.extract_strided_slice %34 {offsets = [0, 8], sizes = [16, 8], strides = [1, 1]} : vector<16x32xbf16> to vector<16x8xbf16>
    %142 = arith.truncf %136 : vector<8x16xf32> to vector<8x16xbf16>
    %cst_50 = arith.constant dense<0.000000e+00> : vector<8x8xf32>
    %143 = tpu.matmul %142, %141, %cst_50 {dimension_numbers = #tpu.dot_dimension_numbers<[1], [0], [0], [1], [0, 0, 1, 1], [], []>} : vector<8x16xbf16>, vector<16x8xbf16>, vector<8x8xf32> -> vector<8x8xf32>
    %c0_51 = arith.constant 0 : index
    %c40 = arith.constant 40 : index
    %144 = vector.load %arg23[%c0_51, %c40] : memref<8x64xf32, #tpu.memory_space<vmem>>, vector<8x8xf32>
    tpu.vector_store %arg23[%c0_51, %c40], %143 {strides = array<i32>} : memref<8x64xf32, #tpu.memory_space<vmem>>, vector<8x8xf32>,
    %145 = vector.extract_strided_slice %16 {offsets = [0, 16], sizes = [8, 8], strides = [1, 1]} : vector<8x32xbf16> to vector<8x8xbf16>
    %146 = vector.extract_strided_slice %35 {offsets = [0, 16], sizes = [32, 8], strides = [1, 1]} : vector<32x32xbf16> to vector<32x8xbf16>
    %cst_52 = arith.constant dense<0.000000e+00> : vector<8x32xf32>
    %147 = tpu.matmul %145, %146, %cst_52 {dimension_numbers = #tpu.dot_dimension_numbers<[1], [1], [0], [0], [0, 0, 1, 0], [], []>} : vector<8x8xbf16>, vector<32x8xbf16>, vector<8x32xf32> -> vector<8x32xf32>
    %cst_53 = arith.constant 0.353553385 : f32
    %148 = vector.broadcast %cst_53 : f32 to vector<8x32xf32>
    %149 = arith.mulf %147, %148 : vector<8x32xf32>
    %150 = vector.extract_strided_slice %149 {offsets = [0, 0], sizes = [8, 16], strides = [1, 1]} : vector<8x32xf32> to vector<8x16xf32>
    %151 = arith.addf %150, %67 : vector<8x16xf32>
    %cst_54 = arith.constant dense<0xFF800000> : vector<8xf32>
    %152 = vector.multi_reduction <maximumf>, %151, %cst_54 [1] : vector<8x16xf32> to vector<8xf32>
    %153 = vector.shape_cast %152 : vector<8xf32> to vector<8x1xf32>
    %154 = vector.broadcast %153 : vector<8x1xf32> to vector<8x16xf32>
    %155 = arith.subf %151, %154 : vector<8x16xf32>
    %156 = math.exp %155 : vector<8x16xf32>
    %cst_55 = arith.constant dense<0.000000e+00> : vector<8xf32>
    %157 = vector.multi_reduction <add>, %156, %cst_55 [1] : vector<8x16xf32> to vector<8xf32>
    %158 = vector.shape_cast %157 : vector<8xf32> to vector<8x1xf32>
    %159 = tpu.reciprocal %158 {approx = true} : vector<8x1xf32> -> vector<8x1xf32>
    %160 = vector.broadcast %159 : vector<8x1xf32> to vector<8x16xf32>
    %161 = arith.mulf %156, %160 : vector<8x16xf32>
    %162 = vector.extract_strided_slice %149 {offsets = [0, 16], sizes = [8, 16], strides = [1, 1]} : vector<8x32xf32> to vector<8x16xf32>
    %163 = arith.addf %162, %70 : vector<8x16xf32>
    %cst_56 = arith.constant dense<0xFF800000> : vector<8xf32>
    %164 = vector.multi_reduction <maximumf>, %163, %cst_56 [1] : vector<8x16xf32> to vector<8xf32>
    %165 = vector.shape_cast %164 : vector<8xf32> to vector<8x1xf32>
    %166 = vector.broadcast %165 : vector<8x1xf32> to vector<8x16xf32>
    %167 = arith.subf %163, %166 : vector<8x16xf32>
    %168 = math.exp %167 : vector<8x16xf32>
    %cst_57 = arith.constant dense<0.000000e+00> : vector<8xf32>
    %169 = vector.multi_reduction <add>, %168, %cst_57 [1] : vector<8x16xf32> to vector<8xf32>
    %170 = vector.shape_cast %169 : vector<8xf32> to vector<8x1xf32>
    %171 = tpu.reciprocal %170 {approx = true} : vector<8x1xf32> -> vector<8x1xf32>
    %172 = vector.broadcast %171 : vector<8x1xf32> to vector<8x16xf32>
    %173 = arith.mulf %168, %172 : vector<8x16xf32>
    %174 = vector.extract_strided_slice %32 {offsets = [0, 16], sizes = [16, 8], strides = [1, 1]} : vector<16x32xbf16> to vector<16x8xbf16>
    %175 = arith.truncf %161 : vector<8x16xf32> to vector<8x16xbf16>
    %cst_58 = arith.constant dense<0.000000e+00> : vector<8x8xf32>
    %176 = tpu.matmul %175, %174, %cst_58 {dimension_numbers = #tpu.dot_dimension_numbers<[1], [0], [0], [1], [0, 0, 1, 1], [], []>} : vector<8x16xbf16>, vector<16x8xbf16>, vector<8x8xf32> -> vector<8x8xf32>
    %c0_59 = arith.constant 0 : index
    %c16 = arith.constant 16 : index
    %177 = vector.load %arg23[%c0_59, %c16] : memref<8x64xf32, #tpu.memory_space<vmem>>, vector<8x8xf32>
    tpu.vector_store %arg23[%c0_59, %c16], %176 {strides = array<i32>} : memref<8x64xf32, #tpu.memory_space<vmem>>, vector<8x8xf32>,
    %178 = vector.extract_strided_slice %34 {offsets = [0, 16], sizes = [16, 8], strides = [1, 1]} : vector<16x32xbf16> to vector<16x8xbf16>
    %179 = arith.truncf %173 : vector<8x16xf32> to vector<8x16xbf16>
    %cst_60 = arith.constant dense<0.000000e+00> : vector<8x8xf32>
    %180 = tpu.matmul %179, %178, %cst_60 {dimension_numbers = #tpu.dot_dimension_numbers<[1], [0], [0], [1], [0, 0, 1, 1], [], []>} : vector<8x16xbf16>, vector<16x8xbf16>, vector<8x8xf32> -> vector<8x8xf32>
    %c0_61 = arith.constant 0 : index
    %c48 = arith.constant 48 : index
    %181 = vector.load %arg23[%c0_61, %c48] : memref<8x64xf32, #tpu.memory_space<vmem>>, vector<8x8xf32>
    tpu.vector_store %arg23[%c0_61, %c48], %180 {strides = array<i32>} : memref<8x64xf32, #tpu.memory_space<vmem>>, vector<8x8xf32>,
    %182 = vector.extract_strided_slice %16 {offsets = [0, 24], sizes = [8, 8], strides = [1, 1]} : vector<8x32xbf16> to vector<8x8xbf16>
    %183 = vector.extract_strided_slice %35 {offsets = [0, 24], sizes = [32, 8], strides = [1, 1]} : vector<32x32xbf16> to vector<32x8xbf16>
    %cst_62 = arith.constant dense<0.000000e+00> : vector<8x32xf32>
    %184 = tpu.matmul %182, %183, %cst_62 {dimension_numbers = #tpu.dot_dimension_numbers<[1], [1], [0], [0], [0, 0, 1, 0], [], []>} : vector<8x8xbf16>, vector<32x8xbf16>, vector<8x32xf32> -> vector<8x32xf32>
    %cst_63 = arith.constant 0.353553385 : f32
    %185 = vector.broadcast %cst_63 : f32 to vector<8x32xf32>
    %186 = arith.mulf %184, %185 : vector<8x32xf32>
    %187 = vector.extract_strided_slice %186 {offsets = [0, 0], sizes = [8, 16], strides = [1, 1]} : vector<8x32xf32> to vector<8x16xf32>
    %188 = arith.addf %187, %67 : vector<8x16xf32>
    %cst_64 = arith.constant dense<0xFF800000> : vector<8xf32>
    %189 = vector.multi_reduction <maximumf>, %188, %cst_64 [1] : vector<8x16xf32> to vector<8xf32>
    %190 = vector.shape_cast %189 : vector<8xf32> to vector<8x1xf32>
    %191 = vector.broadcast %190 : vector<8x1xf32> to vector<8x16xf32>
    %192 = arith.subf %188, %191 : vector<8x16xf32>
    %193 = math.exp %192 : vector<8x16xf32>
    %cst_65 = arith.constant dense<0.000000e+00> : vector<8xf32>
    %194 = vector.multi_reduction <add>, %193, %cst_65 [1] : vector<8x16xf32> to vector<8xf32>
    %195 = vector.shape_cast %194 : vector<8xf32> to vector<8x1xf32>
    %196 = tpu.reciprocal %195 {approx = true} : vector<8x1xf32> -> vector<8x1xf32>
    %197 = vector.broadcast %196 : vector<8x1xf32> to vector<8x16xf32>
    %198 = arith.mulf %193, %197 : vector<8x16xf32>
    %199 = vector.extract_strided_slice %186 {offsets = [0, 16], sizes = [8, 16], strides = [1, 1]} : vector<8x32xf32> to vector<8x16xf32>
    %200 = arith.addf %199, %70 : vector<8x16xf32>
    %cst_66 = arith.constant dense<0xFF800000> : vector<8xf32>
    %201 = vector.multi_reduction <maximumf>, %200, %cst_66 [1] : vector<8x16xf32> to vector<8xf32>
    %202 = vector.shape_cast %201 : vector<8xf32> to vector<8x1xf32>
    %203 = vector.broadcast %202 : vector<8x1xf32> to vector<8x16xf32>
    %204 = arith.subf %200, %203 : vector<8x16xf32>
    %205 = math.exp %204 : vector<8x16xf32>
    %cst_67 = arith.constant dense<0.000000e+00> : vector<8xf32>
    %206 = vector.multi_reduction <add>, %205, %cst_67 [1] : vector<8x16xf32> to vector<8xf32>
    %207 = vector.shape_cast %206 : vector<8xf32> to vector<8x1xf32>
    %208 = tpu.reciprocal %207 {approx = true} : vector<8x1xf32> -> vector<8x1xf32>
    %209 = vector.broadcast %208 : vector<8x1xf32> to vector<8x16xf32>
    %210 = arith.mulf %205, %209 : vector<8x16xf32>
    %211 = vector.extract_strided_slice %32 {offsets = [0, 24], sizes = [16, 8], strides = [1, 1]} : vector<16x32xbf16> to vector<16x8xbf16>
    %212 = arith.truncf %198 : vector<8x16xf32> to vector<8x16xbf16>
    %cst_68 = arith.constant dense<0.000000e+00> : vector<8x8xf32>
    %213 = tpu.matmul %212, %211, %cst_68 {dimension_numbers = #tpu.dot_dimension_numbers<[1], [0], [0], [1], [0, 0, 1, 1], [], []>} : vector<8x16xbf16>, vector<16x8xbf16>, vector<8x8xf32> -> vector<8x8xf32>
    %c0_69 = arith.constant 0 : index
    %c24 = arith.constant 24 : index
    %214 = vector.load %arg23[%c0_69, %c24] : memref<8x64xf32, #tpu.memory_space<vmem>>, vector<8x8xf32>
    tpu.vector_store %arg23[%c0_69, %c24], %213 {strides = array<i32>} : memref<8x64xf32, #tpu.memory_space<vmem>>, vector<8x8xf32>,
    %215 = vector.extract_strided_slice %34 {offsets = [0, 24], sizes = [16, 8], strides = [1, 1]} : vector<16x32xbf16> to vector<16x8xbf16>
    %216 = arith.truncf %210 : vector<8x16xf32> to vector<8x16xbf16>
    %cst_70 = arith.constant dense<0.000000e+00> : vector<8x8xf32>
    %217 = tpu.matmul %216, %215, %cst_70 {dimension_numbers = #tpu.dot_dimension_numbers<[1], [0], [0], [1], [0, 0, 1, 1], [], []>} : vector<8x16xbf16>, vector<16x8xbf16>, vector<8x8xf32> -> vector<8x8xf32>
    %c0_71 = arith.constant 0 : index
    %c56 = arith.constant 56 : index
    %218 = vector.load %arg23[%c0_71, %c56] : memref<8x64xf32, #tpu.memory_space<vmem>>, vector<8x8xf32>
    tpu.vector_store %arg23[%c0_71, %c56], %217 {strides = array<i32>} : memref<8x64xf32, #tpu.memory_space<vmem>>, vector<8x8xf32>,
    %c0_72 = arith.constant 0 : index
    %c0_73 = arith.constant 0 : index
    %219 = vector.load %arg23[%c0_72, %c0_73] : memref<8x64xf32, #tpu.memory_space<vmem>>, vector<8x64xf32>
    %c0_74 = arith.constant 0 : index
    %c0_75 = arith.constant 0 : index
    %220 = vector.load %arg12[%c0_74, %c0_75] : memref<64x32xbf16, #tpu.memory_space<vmem>>, vector<64x32xbf16>
    %221 = arith.truncf %219 : vector<8x64xf32> to vector<8x64xbf16>
    %cst_76 = arith.constant dense<0.000000e+00> : vector<8x32xf32>
    %222 = tpu.matmul %221, %220, %cst_76 {dimension_numbers = #tpu.dot_dimension_numbers<[1], [0], [0], [1], [0, 0, 1, 1], [], []>} : vector<8x64xbf16>, vector<64x32xbf16>, vector<8x32xf32> -> vector<8x32xf32>
    %223 = arith.addf %1, %222 : vector<8x32xf32>
    %c0_77 = arith.constant 0 : index
    %c0_78 = arith.constant 0 : index
    %224 = vector.load %arg13[%c0_77, %c0_78] : memref<1x32xf32, #tpu.memory_space<vmem>>, vector<1x32xf32>
    %225 = vector.broadcast %224 : vector<1x32xf32> to vector<8x32xf32>
    %226 = arith.addf %223, %225 : vector<8x32xf32>
    %c0_79 = arith.constant 0 : index
    %c0_80 = arith.constant 0 : index
    %227 = vector.load %arg14[%c0_79, %c0_80] : memref<1x32xf32, #tpu.memory_space<vmem>>, vector<1x32xf32>
    %c0_81 = arith.constant 0 : index
    %c0_82 = arith.constant 0 : index
    %228 = vector.load %arg15[%c0_81, %c0_82] : memref<1x32xf32, #tpu.memory_space<vmem>>, vector<1x32xf32>
    %cst_83 = arith.constant dense<0.000000e+00> : vector<8xf32>
    %229 = vector.multi_reduction <add>, %226, %cst_83 [1] : vector<8x32xf32> to vector<8xf32>
    %230 = vector.shape_cast %229 : vector<8xf32> to vector<8x1xf32>
    %cst_84 = arith.constant 3.200000e+01 : f32
    %231 = vector.broadcast %cst_84 : f32 to vector<8x1xf32>
    %232 = arith.divf %230, %231 : vector<8x1xf32>
    %233 = vector.broadcast %232 : vector<8x1xf32> to vector<8x32xf32>
    %234 = arith.subf %226, %233 : vector<8x32xf32>
    %235 = arith.mulf %234, %234 : vector<8x32xf32>
    %cst_85 = arith.constant dense<0.000000e+00> : vector<8xf32>
    %236 = vector.multi_reduction <add>, %235, %cst_85 [1] : vector<8x32xf32> to vector<8xf32>
    %237 = vector.shape_cast %236 : vector<8xf32> to vector<8x1xf32>
    %cst_86 = arith.constant 3.200000e+01 : f32
    %238 = vector.broadcast %cst_86 : f32 to vector<8x1xf32>
    %239 = arith.divf %237, %238 : vector<8x1xf32>
    %cst_87 = arith.constant 9.99999974E-6 : f32
    %240 = vector.broadcast %cst_87 : f32 to vector<8x1xf32>
    %241 = arith.addf %239, %240 : vector<8x1xf32>
    %242 = math.rsqrt %241 : vector<8x1xf32>
    %243 = vector.broadcast %242 : vector<8x1xf32> to vector<8x32xf32>
    %244 = arith.mulf %234, %243 : vector<8x32xf32>
    %245 = vector.broadcast %227 : vector<1x32xf32> to vector<8x32xf32>
    %246 = arith.mulf %244, %245 : vector<8x32xf32>
    %247 = vector.broadcast %228 : vector<1x32xf32> to vector<8x32xf32>
    %248 = arith.addf %246, %247 : vector<8x32xf32>
    %c0_88 = arith.constant 0 : index
    %c0_89 = arith.constant 0 : index
    %249 = vector.load %arg16[%c0_88, %c0_89] : memref<32x64xbf16, #tpu.memory_space<vmem>>, vector<32x64xbf16>
    %250 = arith.truncf %248 : vector<8x32xf32> to vector<8x32xbf16>
    %cst_90 = arith.constant dense<0.000000e+00> : vector<8x64xf32>
    %251 = tpu.matmul %250, %249, %cst_90 {dimension_numbers = #tpu.dot_dimension_numbers<[1], [0], [0], [1], [0, 0, 1, 1], [], []>} : vector<8x32xbf16>, vector<32x64xbf16>, vector<8x64xf32> -> vector<8x64xf32>
    %c0_91 = arith.constant 0 : index
    %c0_92 = arith.constant 0 : index
    %252 = vector.load %arg17[%c0_91, %c0_92] : memref<1x64xf32, #tpu.memory_space<vmem>>, vector<1x64xf32>
    %253 = vector.broadcast %252 : vector<1x64xf32> to vector<8x64xf32>
    %254 = arith.addf %251, %253 : vector<8x64xf32>
    %cst_93 = arith.constant 0.000000e+00 : f32
    %255 = vector.broadcast %cst_93 : f32 to vector<8x64xf32>
    %256 = arith.maximumf %254, %255 : vector<8x64xf32>
    %c0_94 = arith.constant 0 : index
    %c0_95 = arith.constant 0 : index
    %257 = vector.load %arg18[%c0_94, %c0_95] : memref<64x32xbf16, #tpu.memory_space<vmem>>, vector<64x32xbf16>
    %258 = arith.truncf %256 : vector<8x64xf32> to vector<8x64xbf16>
    %cst_96 = arith.constant dense<0.000000e+00> : vector<8x32xf32>
    %259 = tpu.matmul %258, %257, %cst_96 {dimension_numbers = #tpu.dot_dimension_numbers<[1], [0], [0], [1], [0, 0, 1, 1], [], []>} : vector<8x64xbf16>, vector<64x32xbf16>, vector<8x32xf32> -> vector<8x32xf32>
    %c0_97 = arith.constant 0 : index
    %c0_98 = arith.constant 0 : index
    %260 = vector.load %arg19[%c0_97, %c0_98] : memref<1x32xf32, #tpu.memory_space<vmem>>, vector<1x32xf32>
    %261 = vector.broadcast %260 : vector<1x32xf32> to vector<8x32xf32>
    %262 = arith.addf %259, %261 : vector<8x32xf32>
    %263 = arith.addf %262, %248 : vector<8x32xf32>
    %c0_99 = arith.constant 0 : index
    %c0_100 = arith.constant 0 : index
    %264 = vector.load %arg20[%c0_99, %c0_100] : memref<1x32xf32, #tpu.memory_space<vmem>>, vector<1x32xf32>
    %c0_101 = arith.constant 0 : index
    %c0_102 = arith.constant 0 : index
    %265 = vector.load %arg21[%c0_101, %c0_102] : memref<1x32xf32, #tpu.memory_space<vmem>>, vector<1x32xf32>
    %cst_103 = arith.constant dense<0.000000e+00> : vector<8xf32>
    %266 = vector.multi_reduction <add>, %263, %cst_103 [1] : vector<8x32xf32> to vector<8xf32>
    %267 = vector.shape_cast %266 : vector<8xf32> to vector<8x1xf32>
    %cst_104 = arith.constant 3.200000e+01 : f32
    %268 = vector.broadcast %cst_104 : f32 to vector<8x1xf32>
    %269 = arith.divf %267, %268 : vector<8x1xf32>
    %270 = vector.broadcast %269 : vector<8x1xf32> to vector<8x32xf32>
    %271 = arith.subf %263, %270 : vector<8x32xf32>
    %272 = arith.mulf %271, %271 : vector<8x32xf32>
    %cst_105 = arith.constant dense<0.000000e+00> : vector<8xf32>
    %273 = vector.multi_reduction <add>, %272, %cst_105 [1] : vector<8x32xf32> to vector<8xf32>
    %274 = vector.shape_cast %273 : vector<8xf32> to vector<8x1xf32>
    %cst_106 = arith.constant 3.200000e+01 : f32
    %275 = vector.broadcast %cst_106 : f32 to vector<8x1xf32>
    %276 = arith.divf %274, %275 : vector<8x1xf32>
    %cst_107 = arith.constant 9.99999974E-6 : f32
    %277 = vector.broadcast %cst_107 : f32 to vector<8x1xf32>
    %278 = arith.addf %276, %277 : vector<8x1xf32>
    %279 = math.rsqrt %278 : vector<8x1xf32>
    %280 = vector.broadcast %279 : vector<8x1xf32> to vector<8x32xf32>
    %281 = arith.mulf %271, %280 : vector<8x32xf32>
    %282 = vector.broadcast %264 : vector<1x32xf32> to vector<8x32xf32>
    %283 = arith.mulf %281, %282 : vector<8x32xf32>
    %284 = vector.broadcast %265 : vector<1x32xf32> to vector<8x32xf32>
    %285 = arith.addf %283, %284 : vector<8x32xf32>
    %c0_108 = arith.constant 0 : index
    %c0_109 = arith.constant 0 : index
    %c0_110 = arith.constant 0 : index
    %286 = vector.load %arg22[%c0_108, %c0_109, %c0_110] : memref<1x8x32xf32, #tpu.memory_space<vmem>>, vector<1x8x32xf32>
    %287 = vector.shape_cast %286 : vector<1x8x32xf32> to vector<8x32xf32>
    %288 = vector.shape_cast %285 : vector<8x32xf32> to vector<1x8x32xf32>
    tpu.vector_store %arg22[%c0_108, %c0_109, %c0_110], %288 {strides = array<i32>} : memref<1x8x32xf32, #tpu.memory_space<vmem>>, vector<1x8x32xf32>,
    return
  }
  func.func @transform_0(%arg0: i32, %arg1: i32) -> (i32, i32, i32) {
    %c0_i32 = arith.constant 0 : i32
    %c0_i32_0 = arith.constant 0 : i32
    return %arg0, %arg1, %c0_i32 : i32, i32, i32
  }
  func.func @transform_1(%arg0: i32, %arg1: i32) -> (i32, i32, i32) {
    %c1_i32 = arith.constant 1 : i32
    %0 = arith.subi %arg1, %c1_i32 : i32
    %c0_i32 = arith.constant 0 : i32
    %1 = arith.maxsi %0, %c0_i32 : i32
    %c0_i32_0 = arith.constant 0 : i32
    %c0_i32_1 = arith.constant 0 : i32
    return %arg0, %1, %c0_i32_0 : i32, i32, i32
  }
  func.func @transform_2(%arg0: i32, %arg1: i32) -> (i32, i32, i32) {
    %c0_i32 = arith.constant 0 : i32
    %c0_i32_0 = arith.constant 0 : i32
    return %arg0, %arg1, %c0_i32 : i32, i32, i32
  }
  func.func @transform_3(%arg0: i32, %arg1: i32) -> (i32, i32, i32) {
    %c1_i32 = arith.constant 1 : i32
    %0 = arith.addi %arg1, %c1_i32 : i32
    %c1_i32_0 = arith.constant 1 : i32
    %1 = arith.minsi %0, %c1_i32_0 : i32
    %c0_i32 = arith.constant 0 : i32
    %c0_i32_1 = arith.constant 0 : i32
    return %arg0, %1, %c0_i32 : i32, i32, i32
  }
  func.func @transform_4(%arg0: i32, %arg1: i32) -> (i32, i32) {
    %c0_i32 = arith.constant 0 : i32
    %c0_i32_0 = arith.constant 0 : i32
    %c0_i32_1 = arith.constant 0 : i32
    return %c0_i32, %c0_i32_0 : i32, i32
  }
  func.func @transform_5(%arg0: i32, %arg1: i32) -> (i32, i32) {
    %c0_i32 = arith.constant 0 : i32
    %c0_i32_0 = arith.constant 0 : i32
    %c0_i32_1 = arith.constant 0 : i32
    return %c0_i32, %c0_i32_0 : i32, i32
  }
  func.func @transform_6(%arg0: i32, %arg1: i32) -> (i32, i32) {
    %c0_i32 = arith.constant 0 : i32
    %c0_i32_0 = arith.constant 0 : i32
    %c0_i32_1 = arith.constant 0 : i32
    return %c0_i32, %c0_i32_0 : i32, i32
  }
  func.func @transform_7(%arg0: i32, %arg1: i32) -> (i32, i32) {
    %c0_i32 = arith.constant 0 : i32
    %c0_i32_0 = arith.constant 0 : i32
    %c0_i32_1 = arith.constant 0 : i32
    return %c0_i32, %c0_i32_0 : i32, i32
  }
  func.func @transform_8(%arg0: i32, %arg1: i32) -> (i32, i32) {
    %c0_i32 = arith.constant 0 : i32
    %c0_i32_0 = arith.constant 0 : i32
    %c0_i32_1 = arith.constant 0 : i32
    return %c0_i32, %c0_i32_0 : i32, i32
  }
  func.func @transform_9(%arg0: i32, %arg1: i32) -> (i32, i32) {
    %c0_i32 = arith.constant 0 : i32
    %c0_i32_0 = arith.constant 0 : i32
    %c0_i32_1 = arith.constant 0 : i32
    return %c0_i32, %c0_i32_0 : i32, i32
  }
  func.func @transform_10(%arg0: i32, %arg1: i32) -> (i32, i32) {
    %c0_i32 = arith.constant 0 : i32
    %c0_i32_0 = arith.constant 0 : i32
    %c0_i32_1 = arith.constant 0 : i32
    return %c0_i32, %c0_i32_0 : i32, i32
  }
  func.func @transform_11(%arg0: i32, %arg1: i32) -> (i32, i32) {
    %c0_i32 = arith.constant 0 : i32
    %c0_i32_0 = arith.constant 0 : i32
    %c0_i32_1 = arith.constant 0 : i32
    return %c0_i32, %c0_i32_0 : i32, i32
  }
  func.func @transform_12(%arg0: i32, %arg1: i32) -> (i32, i32) {
    %c0_i32 = arith.constant 0 : i32
    %c0_i32_0 = arith.constant 0 : i32
    %c0_i32_1 = arith.constant 0 : i32
    return %c0_i32, %c0_i32_0 : i32, i32
  }
  func.func @transform_13(%arg0: i32, %arg1: i32) -> (i32, i32) {
    %c0_i32 = arith.constant 0 : i32
    %c0_i32_0 = arith.constant 0 : i32
    %c0_i32_1 = arith.constant 0 : i32
    return %c0_i32, %c0_i32_0 : i32, i32
  }
  func.func @transform_14(%arg0: i32, %arg1: i32) -> (i32, i32) {
    %c0_i32 = arith.constant 0 : i32
    %c0_i32_0 = arith.constant 0 : i32
    %c0_i32_1 = arith.constant 0 : i32
    return %c0_i32, %c0_i32_0 : i32, i32
  }
  func.func @transform_15(%arg0: i32, %arg1: i32) -> (i32, i32) {
    %c0_i32 = arith.constant 0 : i32
    %c0_i32_0 = arith.constant 0 : i32
    %c0_i32_1 = arith.constant 0 : i32
    return %c0_i32, %c0_i32_0 : i32, i32
  }
  func.func @transform_16(%arg0: i32, %arg1: i32) -> (i32, i32) {
    %c0_i32 = arith.constant 0 : i32
    %c0_i32_0 = arith.constant 0 : i32
    %c0_i32_1 = arith.constant 0 : i32
    return %c0_i32, %c0_i32_0 : i32, i32
  }
  func.func @transform_17(%arg0: i32, %arg1: i32) -> (i32, i32) {
    %c0_i32 = arith.constant 0 : i32
    %c0_i32_0 = arith.constant 0 : i32
    %c0_i32_1 = arith.constant 0 : i32
    return %c0_i32, %c0_i32_0 : i32, i32
  }
  func.func @transform_18(%arg0: i32, %arg1: i32) -> (i32, i32) {
    %c0_i32 = arith.constant 0 : i32
    %c0_i32_0 = arith.constant 0 : i32
    %c0_i32_1 = arith.constant 0 : i32
    return %c0_i32, %c0_i32_0 : i32, i32
  }
  func.func @transform_19(%arg0: i32, %arg1: i32) -> (i32, i32) {
    %c0_i32 = arith.constant 0 : i32
    %c0_i32_0 = arith.constant 0 : i32
    %c0_i32_1 = arith.constant 0 : i32
    return %c0_i32, %c0_i32_0 : i32, i32
  }
  func.func @transform_20(%arg0: i32, %arg1: i32) -> (i32, i32, i32) {
    %c0_i32 = arith.constant 0 : i32
    %c0_i32_0 = arith.constant 0 : i32
    return %arg0, %arg1, %c0_i32 : i32, i32, i32
  }
}

</mosaic_0001>

<bundles_post_ra>
// kernel: hybrid_attention_decoder_forward.7
= control target key start
LH: loop header
LB: loop body
LE: loop exit
PB: predicated region body
PF: predicated region fallthrough
CT: control target
= control target key end

     0   :  { %s564_s18 = smov 0   ;;  %s566_s19 = smov 0   ;;  %s640_s0 = inlined_call_operand.vmem [shape: f32[2,16,32], index: 0, kind: input, shape index: {}]   ;;  %s641_s1 = inlined_call_operand.vmem [shape: f32[1,32], index: 1, kind: input, shape index: {}]   ;;  %s642_s2 = inlined_call_operand.vmem [shape: f32[1,32], index: 2, kind: input, shape index: {}]   ;;  %s643_s3 = inlined_call_operand.vmem [shape: bf16[32,8], index: 3, kind: input, shape index: {}]   ;;  %s644_s4 = inlined_call_operand.vmem [shape: f32[1,8], index: 4, kind: input, shape index: {}]   ;;  %s645_s5 = inlined_call_operand.vmem [shape: f32[2,16,8], index: 5, kind: output, shape index: {}]  }
   0x1   :  { %s568_s20 = smov 0   ;;  %s570_s21 = smov 0  }
   0x2   :  { %s572_s22 = smov 0  }
   0x3 LB: > { %s24_s23 = sadd.s32 1, %s523_s20  ;;  %s27_s24 = sadd.s32 1, %s527_s21  ;;  %s531_s22 = sphi %s572_s22, %s15_s22   ;;  %s527_s21 = sphi %s570_s21, %s649_s21   ;;  %s523_s20 = sphi %s568_s20, %s648_s20   ;;  %s519_s19 = sphi %s566_s19, %s647_s19   ;;  %s515_s18 = sphi %s564_s18, %s646_s18  }
   0x4   : > { %p25_p0 = scmp.ge.s32.totalorder %s24_s23, 2  ;;  %p427_p1 = scmp.ge.s32.totalorder %s531_s22, 1 }
   0x5   : > { %p206_p2 = scmp.lt.s32.totalorder %s531_s22, 5 }
   0x6   : > { %s651_s23 = smov (%p25_p0, %s24_s23), 0  ;;  %s653_s24 = smov (!%p25_p0, %s27_s24), %s527_s21 }
   0x7   : > { %p207_p3 = pnand %p427_p1, %p206_p2  ;;  %p29_p4 = scmp.ge.s32.totalorder %s653_s24, 2 }
   0x8   : > { %p240_p5 = scmp.lt.s32.totalorder (!%p207_p3), %s519_s19, 1  ;;  %p242_p6 = scmp.lt.s32.totalorder (!%p207_p3), %s515_s18, 1 }
   0x9   : > { %s655_s24 = smov (%p29_p4, %s653_s24), 0  ;;  %210 = sbr.rel (%p207_p3) target bundleno = 424 (0x1a8), region = 40 }
   0xe   : > { %s657_s19 = smov (!%p240_p5, %s519_s19), 1  ;;  %s659_s18 = smov (!%p242_p6, %s515_s18), 1  ;;  %vm260_vm0 = vcmask 261120   ;;  %v533_v2 = vmov 32.0   ;;  %v444_v14 = vld [vmem:[%s643_s3 + $0x8] sm:$0xff]  ;;  %v443_v15 = vld [vmem:[%s643_s3] sm:$0xff] }
   0xf   : > { %s428_s25 = sshll.u32 %s657_s19, 1  ;;  %489 = vrcp.f32 %v533_v2  ;;  %328 = vmatpush.bf16.msra.mxu0 %v444_v14  ;;  %v486_v25 = vld [vmem:[%s641_s1] ss:$0 sm:$0xff]  ;;  %vm335_vm5 = vcmask 64512  }
  0x10   : > { %s594_s26 = sadd.s32 %s428_s25, %s659_s18  ;;  %v487_v28 = vld [vmem:[%s642_s2] ss:$0 sm:$0xff] }
  0x11   : > { %s429_s27 = sshll.u32 %s594_s26, 3  ;;  %v488_v32 = vld [vmem:[%s644_s4] ss:$0 sm:$0xff] }
  0x12   : > { %s247_s30 = scalar_lea.vmem %s640_s0, %s429_s27  ;;  %s255_s18 = scalar_lea.vmem %s645_s5, %s429_s27 }
  0x13   : > { %v257_v0 = vld [vmem:[%s247_s30] sm:$0xff]  ;;  %329 = vmatpush.bf16.msra.mxu0 %v443_v15 }
  0x14   : > { %v261_v1 = vsel %vm260_vm0, %v257_v0, 0.0 }
  0x15   : > { %262 = vadd.xlane.f32.xlu0 %v261_v1  ;;  %v490_v3 = vpop.eup %489 }
  0x16   : > { %v265_v4 = vmul.f32 32.0, %v490_v3  ;;  %vm269_vm1 = vweird.f32 %v490_v3 }
  0x18   : > { %v266_v5 = vsub.f32 1.0, %v265_v4 }
  0x1a   : > { %v267_v6 = vmul.f32 %v490_v3, %v266_v5 }
  0x1c   : > { %v268_v7 = vadd.f32 %v490_v3, %v267_v6 }
  0x1e   : > { %v270_v8 = vsel %vm269_vm1, %v490_v3, %v268_v7 }
  0x88   : > { %v263_v9 = vpop.xlane.xlu0 %262 }
  0x89   : > { %v271_v10 = vmul.f32 %v270_v8, %v263_v9 }
  0x8b   : > { %v272_v11 = vsub.f32 %v257_v0, %v271_v10 }
  0x8d   : > { %v273_v12 = vmul.f32 %v272_v11, %v272_v11 }
  0x8f   : > { %v274_v13 = vsel %vm260_vm0, %v273_v12, 0.0 }
  0x90   : > { %275 = vadd.xlane.f32.xlu0 %v274_v13 }
 0x103   : > { %v276_v16 = vpop.xlane.xlu0 %275 }
 0x104   : > { %v277_v17 = vmul.f32 %v276_v16, %v270_v8 }
 0x106   : > { %v278_v18 = vadd.f32 1e-06, %v277_v17 }
 0x108   : > { %491 = vrsqrt.f32 %v278_v18  ;;  %vm285_vm3 = vweird.f32 %v278_v18 }
 0x10e   : > { %v492_v19 = vpop.eup %491 }
 0x10f   : > { %v280_v20 = vmul.f32 %v492_v19, %v278_v18  ;;  %vm286_vm2 = vweird.f32 %v492_v19 }
 0x110   : > { %vm287_vm4 = vmor %vm285_vm3, %vm286_vm2 }
 0x111   : > { %v281_v21 = vmul.f32 %v492_v19, %v280_v20 }
 0x113   : > { %v282_v22 = vmul.f32 0.5, %v281_v21 }
 0x115   : > { %v283_v23 = vsub.f32 1.5, %v282_v22 }
 0x117   : > { %v284_v24 = vmul.f32 %v492_v19, %v283_v23 }
 0x119   : > { %v288_v26 = vsel %vm287_vm4, %v492_v19, %v284_v24 }
 0x11a   : > { %v289_v27 = vmul.f32 %v288_v26, %v272_v11 }
 0x11c   : > { %v293_v29 = vmul.f32 %v486_v25, %v289_v27 }
 0x11e   : > { %v297_v30 = vadd.f32 %v487_v28, %v293_v29 }
 0x120   : > { %v302_v31 = vpack.c.bf16 %v297_v30, %v297_v30 }
 0x122   : > { %440 = vmatmul.msk.bf16.vlgmr.msra.gmra.mxu0 %vm260_vm0, %v302_v31 }
 0x19f   : > { %v331_v33 = vpop.f32.mrf.mxu0 }
 0x1a0   : > { %v332_v34 = vadd.f32 %v488_v32, %v331_v33 }
 0x1a2   : > { %336 = vst.msk [vmem:[%s255_s18] sm:$0xff] %vm335_vm5, %v332_v34 }
 0x1a7   : > { %v333_v35 = vpop.f32.mrf.mxu0 }
 0x1a8 PF: > { %s15_s22 = sadd.s32 1, %s531_s22   ;;  %s646_s18 = smov %s523_s20 }
 0x1a9   : > { %p12_p7 = scmp.ge.s32.totalorder %s15_s22, 6   ;;  %s647_s19 = smov %s527_s21 }
 0x1aa   : > { %s648_s20 = smov %s651_s23  ;;  %s649_s21 = smov %s655_s24 }
 0x1ab   :  { %14 = sbr.rel (!%p12_p7) target bundleno = 3 (0x3), region = 70 }

// kernel: hybrid_attention_decoder_forward.4
= control target key start
LH: loop header
LB: loop body
LE: loop exit
PB: predicated region body
PF: predicated region fallthrough
CT: control target
= control target key end

     0   :  { %s1407_s0 = inlined_call_operand.vmem [shape: f32[2,16,8], index: 0, kind: input, shape index: {}]   ;;  %s1408_s1 = inlined_call_operand.vmem [shape: f32[2,16,24], index: 1, kind: input, shape index: {}]   ;;  %s1409_s2 = inlined_call_operand.hbm [shape: bf16[8,16], index: 2, kind: input, shape index: {}]   ;;  %s1410_s3 = inlined_call_operand.hbm [shape: f32[1,16], index: 3, kind: input, shape index: {}]   ;;  %s1411_s4 = inlined_call_operand.hbm [shape: bf16[16,16], index: 4, kind: input, shape index: {}]   ;;  %s1412_s5 = inlined_call_operand.hbm [shape: f32[1,16], index: 5, kind: input, shape index: {}]   ;;  %s1413_s6 = inlined_call_operand.vmem [shape: bf16[16,32], index: 6, kind: input, shape index: {}]   ;;  %s1414_s7 = inlined_call_operand.vmem [shape: f32[1,32], index: 7, kind: input, shape index: {}]   ;;  %s1415_s8 = inlined_call_operand.hbm [shape: bf16[24,32], index: 8, kind: input, shape index: {}]   ;;  %s1416_s9 = inlined_call_operand.vmem [shape: bf16[32,32], index: 9, kind: input, shape index: {}]   ;;  %s1417_s10 = inlined_call_operand.vmem [shape: f32[1,32], index: 10, kind: input, shape index: {}]   ;;  %s1418_s11 = inlined_call_operand.vmem [shape: f32[2,16,32], index: 11, kind: output, shape index: {}]  }
   0x1   :  { %1419 = sst [smem:[#allocation13_spill]] %s1409_s2 }
   0x2   :  { %1420 = sst [smem:[#allocation14_spill]] %s1410_s3 }
   0x3   :  { %1421 = sst [smem:[#allocation15_spill]] %s1412_s5 }
   0x4   :  { %16 = vsyncpa [#allocation3], 0 }
   0x5   :  { %17 = vsyncpa [#allocation5], 0 }
   0x6   :  { %18 = vsyncpa [#allocation8], 0  ;;  %s1265_s17 = smov 0   ;;  %s1267_s18 = smov 0  }
   0x7   :  { %s1269_s19 = smov 0   ;;  %s1271_s20 = smov 0  }
   0x8   :  { %s1273_s21 = smov 0  }
   0x9 LB: > { %s1422_s3 = sld [smem:[#allocation14_spill]]  ;;  %s846_s25 = sadd.s32 4294967295, %s1196_s21   ;;  %s1196_s21 = sphi %s1273_s21, %s24_s21   ;;  %s1192_s20 = sphi %s1271_s20, %s1431_s20   ;;  %s1188_s19 = sphi %s1269_s19, %s1430_s19   ;;  %s1184_s18 = sphi %s1267_s18, %s1429_s18   ;;  %s1180_s17 = sphi %s1265_s17, %s1428_s17  }
   0xa   : > { %p848_p0 = scmp.ge.s32.totalorder %s1196_s21, 1  ;;  %p314_p1 = scmp.lt.s32.totalorder %s1196_s21, 5 }
   0xb   : > { %p1296_p2 = scmp.eq.s32.totalorder %s846_s25, 0  ;;  %s1198_s28 = smov [#allocation4]  }
   0xc   : > { %p1300_p3 = pnand %p848_p0, %p314_p1  ;;  %s340_s29 = sshll.u32 %s1198_s28, 4  ;;  %s341_s29 = int_to_ptr.vmem [resolvable:$true] %s340_s29 }
   0xd   : > { %s1425_s5 = sld [smem:[#allocation15_spill]]  ;;  %s1199_s15 = smov [#allocation7]  }
   0xe   : > { %p919_p4 = pneg %p1300_p3  ;;  %s366_s16 = sshll.u32 %s1199_s15, 4  ;;  %s367_s16 = int_to_ptr.vmem [resolvable:$true] %s366_s16 }
   0xf   : > { %s338_s24 = sshll.u32 %s1422_s3, 4  ;;  %s33_s22 = sadd.s32 1, %s1188_s19  ;;  %s339_s24 = int_to_ptr.hbm [resolvable:$true] %s338_s24 }
  0x10   : > { %p1311_p5 = pnand %p1296_p2, %p919_p4  ;;  %p34_p6 = scmp.ge.s32.totalorder %s33_s22, 2 }
  0x11   : > { %s36_s23 = sadd.s32 1, %s1192_s20  ;;  %s1427_s2 = sld [smem:[#allocation13_spill]] }
  0x12   : > { %925 = dma.hbm_to_vmem [thread:$0]  (!%p1311_p5), %s339_s24, 16, %s341_s29, [#allocation5]  }
  0x13   : > { %s364_s13 = sshll.u32 %s1425_s5, 4  ;;  %s1433_s22 = smov (%p34_p6, %s33_s22), 0  ;;  %s365_s13 = int_to_ptr.hbm [resolvable:$true] %s364_s13 }
  0x14   : > { %931 = dma.hbm_to_vmem [thread:$0]  (!%p1311_p5), %s365_s13, 16, %s367_s16, [#allocation8]  }
  0x15   : > { %s1435_s23 = smov (!%p34_p6, %s36_s23), %s1192_s20  ;;  %s1200_s12 = smov [#allocation2]  }
  0x16   : > { %s328_s3 = sshll.u32 %s1200_s12, 4  ;;  %p38_p7 = scmp.ge.s32.totalorder %s1435_s23, 2  ;;  %s329_s3 = int_to_ptr.vmem [resolvable:$true] %s328_s3 }
  0x17   : > { %s326_s30 = sshll.u32 %s1427_s2, 4  ;;  %s349_s13 = sshll.u32 %s1411_s4, 4  ;;  %s327_s30 = int_to_ptr.hbm [resolvable:$true] %s326_s30  ;;  %s350_s13 = int_to_ptr.hbm [resolvable:$true] %s349_s13 }
  0x18   : > { %922 = dma.hbm_to_vmem [thread:$0]  (!%p1311_p5), %s327_s30, 64, %s329_s3, [#allocation3]  }
  0x19   : > { %s1437_s23 = smov (%p38_p7, %s1435_s23), 0  ;;  %s1201_s15 = smov [#allocation6]  }
  0x1a   : > { %s351_s16 = sshll.u32 %s1201_s15, 4  ;;  %s381_s2 = sshll.u32 %s1415_s8, 4  ;;  %s352_s16 = int_to_ptr.vmem [resolvable:$true] %s351_s16  ;;  %s382_s2 = int_to_ptr.hbm [resolvable:$true] %s381_s2 }
  0x1b   : > { %s1202_s12 = smov 64   ;;  %s1203_s5 = smov 4  }
  0x1c   : > { %928 = dma.hbm_to_vmem [thread:$0]  (!%p1311_p5), %s350_s13, 128, %s352_s16, [#allocation5], %s1202_s12, %s1202_s12, %s1203_s5  }
  0x1d   : > { %s1204_s3 = smov [#allocation9]   ;;  %427 = sbr.rel (%p1300_p3) target bundleno = 589 (0x24d), region = 64 }
  0x1e   : > { %s383_s30 = sshll.u32 %s1204_s3, 4  ;;  %s384_s30 = int_to_ptr.vmem [resolvable:$true] %s383_s30 }
  0x1f   : > { %934 = dma.hbm_to_vmem [thread:$0]  (!%p1311_p5), %s382_s2, 192, %s384_s30, [#allocation8], %s1202_s12, %s1202_s12, %s1203_s5  }
  0x22   : > { %1167 = dma.done.wait (%p1296_p2), [#allocation3], 64  }
  0x23   : > { %1169 = vsyncadd (%p1296_p2), [#allocation3], 4294967232 }
  0x24   : > { %1171 = dma.done.wait (%p1296_p2), [#allocation5], 144  }
  0x25   : > { %1173 = vsyncadd (%p1296_p2), [#allocation5], 4294967152 }
  0x26   : > { %1175 = dma.done.wait (%p1296_p2), [#allocation8], 208  }
  0x27   : > { %1177 = vsyncadd (%p1296_p2), [#allocation8], 4294967088  ;;  %p502_p8 = scmp.lt.s32.totalorder %s1184_s18, 1  ;;  %p504_p9 = scmp.lt.s32.totalorder %s1180_s17, 1  ;;  %vm538_vm0 = vcmask 1043456   ;;  %vm534_vm1 = vcmask 64512  }
  0x28   : > { %v528_v0 = vld [vmem:[#allocation2] sm:$0xf]  ;;  %v894_v4 = vld [vmem:[#allocation6] sm:$0xff]  ;;  %v992_v5 = vld [vmem:[#allocation4] ss:$0 sm:$0xff]  ;;  %vm569_vm2 = vcmask 130048  }
  0x29   : > { %s1439_s18 = smov (!%p502_p8, %s1184_s18), 1  ;;  %s1441_s17 = smov (!%p504_p9, %s1180_s17), 1  ;;  %v540_v1 = vsel %vm538_vm0, %v528_v0, 0  ;;  %580 = vmatpush.bf16.msra.mxu1 %v894_v4  ;;  %v895_v11 = vld [vmem:[%s1413_s6] sm:$0xff]  ;;  %v619_v12 = vld [vmem:[#allocation9 + $0x8] sm:$0xf] }
  0x2a   : > { %s861_s2 = sshll.u32 %s1439_s18, 1  ;;  %549 = vmatpush.bf16.msra.mxu0 %v540_v1  ;;  %610 = vmatpush.bf16.msra.mxu2 %v895_v11  ;;  %v898_v13 = vld [vmem:[%s1416_s9 + $0x8] sm:$0xff]  ;;  %v660_v14 = vunpack.c.l.b16 %v619_v12  ;;  %v896_v23 = vld [vmem:[#allocation9] sm:$0xff]  ;;  %v897_v24 = vld [vmem:[%s1416_s9] sm:$0xff]  ;;  %vm664_vm3 = vcmask 195584   ;;  %vm638_vm4 = vcmask 261120  }
  0x2b   : > { %s507_s5 = sadd.s32 %s861_s2, %s1441_s17  ;;  %648 = vmatpush.bf16.msra.mxu3 %v898_v13  ;;  %v993_v17 = vld [vmem:[#allocation7] ss:$0 sm:$0xff]  ;;  %v994_v27 = vld [vmem:[%s1414_s7] ss:$0 sm:$0xff] }
  0x2c   : > { %s1359_s27 = sshll.u32 %s507_s5, 3  ;;  %v662_v15 = vpack.c.b16 %v660_v14, %v660_v14  ;;  %v995_v34 = vld [vmem:[%s1417_s10] ss:$0 sm:$0xff] }
  0x2d   : > { %s509_s26 = scalar_lea.vmem %s1407_s0, %s1359_s27  ;;  %s517_s25 = scalar_lea.vmem %s1408_s1, %s1359_s27 }
  0x2e   : > { %v527_v2 = vld [vmem:[%s509_s26] sm:$0xff]  ;;  %v669_v16 = vsel %vm538_vm0, %v662_v15, 0  ;;  %s525_s26 = scalar_lea.vmem %s1418_s11, %s1359_s27 }
  0x2f   : > { %v529_v3 = vpack.c.bf16 %v527_v2, %v527_v2  ;;  %677 = vmatpush.bf16.msrb.mxu0 %v669_v16  ;;  %v616_v25 = vld [vmem:[%s517_s25] sm:$0xff]  ;;  %649 = vmatpush.bf16.msra.mxu3 %v897_v24 }
  0x30   : > { %v620_v26 = vpack.c.bf16 %v616_v25, %v616_v25 }
  0x31   : > { %867 = vmatmul.msk.bf16.vlgmr.msra.gmra.mxu0 %vm534_vm1, %v529_v3 }
  0x33   : > { %678 = vmatpush.bf16.msrb.mxu0 %v896_v23 }
  0x41   : > { %891 = vmatmul.msk.bf16.vlgmr.msrb.gmra.mxu0 %vm664_vm3, %v620_v26 }
  0xae   : > { %v551_v6 = vpop.f32.mrf.mxu0 }
  0xaf   : > { %v552_v7 = vadd.f32 %v992_v5, %v551_v6 }
  0xb1   : > { %v555_v8 = vmax.f32 %v552_v7, 0.0 }
  0xb3   : > { %v558_v9 = vpack.c.bf16 %v555_v8, %v555_v8 }
  0xb5   : > { %872 = vmatmul.msk.bf16.vlgmr.msra.gmra.mxu1 %vm569_vm2, %v558_v9 }
  0xb6   : > { %v553_v10 = vpop.f32.mrf.mxu0 }
  0xbe   : > { %v680_v32 = vpop.f32.mrf.mxu0 }
  0xc6   : > { %v682_v33 = vpop.f32.mrf.mxu0 }
 0x132   : > { %v582_v18 = vpop.f32.mrf.mxu1 }
 0x133   : > { %v583_v19 = vadd.f32 %v993_v17, %v582_v18 }
 0x135   : > { %v586_v20 = vmax.f32 %v583_v19, 0.0 }
 0x137   : > { %v589_v21 = vpack.c.bf16 %v586_v20, %v586_v20 }
 0x139   : > { %877 = vmatmul.msk.bf16.vlgmr.msra.gmra.mxu2 %vm569_vm2, %v589_v21 }
 0x13a   : > { %v584_v22 = vpop.f32.mrf.mxu1 }
 0x1bc   : > { %v612_v28 = vpop.f32.mrf.mxu2 }
 0x1bd   : > { %v613_v29 = vadd.f32 %v994_v27, %v612_v28 }
 0x1bf   : > { %v625_v30 = vpack.c.bf16 %v613_v29, %v613_v29 }
 0x1c1   : > { %886 = vmatmul.msk.bf16.vlgmr.msra.gmra.mxu3 %vm638_vm4, %v625_v30 }
 0x1c4   : > { %v614_v31 = vpop.f32.mrf.mxu2 }
 0x244   : > { %v651_v35 = vpop.f32.mrf.mxu3 }
 0x245   : > { %v681_v36 = vadd.f32 %v680_v32, %v651_v35 }
 0x247   : > { %v688_v37 = vadd.f32 %v995_v34, %v681_v36 }
 0x249   : > { %v689_v38 = vmul.f32 5.656854, %v688_v37 }
 0x24b   : > { %690 = vst.msk [vmem:[%s525_s26] sm:$0xff] %vm638_vm4, %v689_v38 }
 0x24c   : > { %v653_v39 = vpop.f32.mrf.mxu3 }
 0x24d PF: > { %s24_s21 = sadd.s32 1, %s1196_s21   ;;  %s1428_s17 = smov %s1188_s19 }
 0x24e   : > { %p21_p10 = scmp.ge.s32.totalorder %s24_s21, 6   ;;  %s1429_s18 = smov %s1192_s20 }
 0x24f   : > { %s1430_s19 = smov %s1433_s22  ;;  %s1431_s20 = smov %s1437_s23 }
 0x250   :  { %23 = sbr.rel (!%p21_p10) target bundleno = 9 (0x9), region = 118 }
 0x255   :  { %718 = vsyncpa [#allocation3], 1 }
 0x256   :  { %720 = vsyncpa [#allocation3 + $0x1], 1 }
 0x257   :  { %721 = vsyncpa [#allocation5], 1 }
 0x258   :  { %722 = vsyncpa [#allocation8], 1 }

// kernel: hybrid_attention_decoder_forward.5
= control target key start
LH: loop header
LB: loop body
LE: loop exit
PB: predicated region body
PF: predicated region fallthrough
CT: control target
= control target key end

     0   :  { %s2932_s0 = inlined_call_operand.vmem [shape: f32[2,16,32], index: 0, kind: input, shape index: {}, may-alias: {0,1}]   ;;  %s2933_s1 = inlined_call_operand.vmem [shape: f32[2,16,32], index: 1, kind: input, shape index: {}, may-alias: {0,1}]   ;;  %s2934_s2 = inlined_call_operand.vmem [shape: f32[2,16,24], index: 2, kind: input, shape index: {}, may-alias: {2,3}]   ;;  %s2935_s3 = inlined_call_operand.vmem [shape: f32[2,16,24], index: 3, kind: input, shape index: {}, may-alias: {2,3}]   ;;  %s2936_s4 = inlined_call_operand.vmem [shape: bf16[32,32], index: 4, kind: input, shape index: {}]   ;;  %s2937_s5 = inlined_call_operand.vmem [shape: f32[1,32], index: 5, kind: input, shape index: {}]   ;;  %s2938_s6 = inlined_call_operand.vmem [shape: bf16[32,64], index: 6, kind: input, shape index: {}]   ;;  %s2939_s7 = inlined_call_operand.vmem [shape: f32[1,64], index: 7, kind: input, shape index: {}]   ;;  %s2940_s8 = inlined_call_operand.vmem [shape: bf16[24,64], index: 8, kind: input, shape index: {}]   ;;  %s2941_s9 = inlined_call_operand.vmem [shape: f32[1,64], index: 9, kind: input, shape index: {}]   ;;  %s2942_s10 = inlined_call_operand.vmem [shape: bf16[64,32], index: 10, kind: input, shape index: {}]   ;;  %s2943_s11 = inlined_call_operand.vmem [shape: f32[1,32], index: 11, kind: input, shape index: {}]   ;;  %s2944_s12 = inlined_call_operand.hbm [shape: f32[1,32], index: 12, kind: input, shape index: {}]   ;;  %s2945_s13 = inlined_call_operand.hbm [shape: f32[1,32], index: 13, kind: input, shape index: {}]   ;;  %s2946_s14 = inlined_call_operand.vmem [shape: bf16[32,64], index: 14, kind: input, shape index: {}]   ;;  %s2947_s15 = inlined_call_operand.hbm [shape: f32[1,64], index: 15, kind: input, shape index: {}]   ;;  %s2948_s16 = inlined_call_operand.vmem [shape: bf16[64,32], index: 16, kind: input, shape index: {}]   ;;  %s2949_s17 = inlined_call_operand.hbm [shape: f32[1,32], index: 17, kind: input, shape index: {}]   ;;  %s2950_s18 = inlined_call_operand.hbm [shape: f32[1,32], index: 18, kind: input, shape index: {}]   ;;  %s2951_s19 = inlined_call_operand.hbm [shape: f32[1,32], index: 19, kind: input, shape index: {}]   ;;  %s2952_s20 = inlined_call_operand.vmem [shape: f32[2,16,32], index: 20, kind: output, shape index: {}]  }
   0x1   :  { %2956 = sst [smem:[#allocation20_spill]] %s2932_s0 }
   0x2   :  { %2957 = sst [smem:[#allocation21_spill]] %s2933_s1 }
   0x3   :  { %2958 = sst [smem:[#allocation22_spill]] %s2934_s2 }
   0x4   :  { %2959 = sst [smem:[#allocation23_spill]] %s2935_s3 }
   0x5   :  { %2960 = sst [smem:[#allocation24_spill]] %s2936_s4 }
   0x6   :  { %2961 = sst [smem:[#allocation25_spill]] %s2944_s12 }
   0x7   :  { %2962 = sst [smem:[#allocation26_spill]] %s2945_s13 }
   0x8   :  { %2963 = sst [smem:[#allocation27_spill]] %s2947_s15 }
   0x9   :  { %2964 = sst [smem:[#allocation28_spill]] %s2948_s16 }
   0xa   :  { %2965 = sst [smem:[#allocation29_spill]] %s2949_s17 }
   0xb   :  { %2966 = sst [smem:[#allocation30_spill]] %s2950_s18 }
   0xc   :  { %2967 = sst [smem:[#allocation31_spill]] %s2952_s20 }
   0xd   :  { %25 = vsyncpa [#allocation4], 0 }
   0xe   :  { %26 = vsyncpa [#allocation6], 0 }
   0xf   :  { %27 = vsyncpa [#allocation9], 0 }
  0x10   :  { %28 = vsyncpa [#allocation12], 0  ;;  %s2581_s1 = smov 0   ;;  %s2583_s22 = smov 0  }
  0x11   :  { %s2585_s23 = smov 0   ;;  %s2587_s24 = smov 0  }
  0x12   :  { %s2589_s2 = smov 0  }
  0x13 LB: > { %2968 = sst [smem:[#allocation17_spill]] %s2452_s2  ;;  %s1914_s27 = sadd.s32 4294967295, %s2452_s2   ;;  %s2452_s2 = sphi %s2589_s2, %s34_s2   ;;  %s2448_s24 = sphi %s2587_s24, %s2993_s24   ;;  %s2444_s23 = sphi %s2585_s23, %s2992_s23   ;;  %s2440_s22 = sphi %s2583_s22, %s2991_s22   ;;  %s2436_s1 = sphi %s2581_s1, %s2990_s1  }
  0x14   : > { %s2969_s13 = sld [smem:[#allocation26_spill]]  ;;  %p1918_p0 = scmp.ge.s32.totalorder %s2452_s2, 1 }
  0x15   : > { %p539_p1 = scmp.lt.s32.totalorder %s2452_s2, 5  ;;  %p2612_p2 = scmp.eq.s32.totalorder %s1914_s27, 0 }
  0x16   : > { %s2454_s29 = smov [#allocation5]   ;;  %s2972_s17 = sld [smem:[#allocation29_spill]] }
  0x17   : > { %p2616_p3 = pnand %p1918_p0, %p539_p1  ;;  %s589_s30 = sshll.u32 %s2454_s29, 4  ;;  %s590_s30 = int_to_ptr.vmem [resolvable:$true] %s589_s30 }
  0x18   : > { %s2455_s27 = smov [#allocation8]   ;;  %s43_s29 = sadd.s32 1, %s2444_s23 }
  0x19   : > { %p2077_p4 = pneg %p2616_p3  ;;  %p44_p6 = scmp.ge.s32.totalorder %s43_s29, 2 }
  0x1a   : > { %s587_s26 = sshll.u32 %s2969_s13, 4  ;;  %s619_s13 = sshll.u32 %s2455_s27, 4  ;;  %s588_s26 = int_to_ptr.hbm [resolvable:$true] %s587_s26  ;;  %s620_s13 = int_to_ptr.vmem [resolvable:$true] %s619_s13 }
  0x1b   : > { %p2627_p5 = pnand %p2612_p2, %p2077_p4  ;;  %s46_s0 = sadd.s32 1, %s2448_s24 }
  0x1c   : > { %s617_s25 = sshll.u32 %s2972_s17, 4  ;;  %s2974_s12 = sld [smem:[#allocation25_spill]]  ;;  %s618_s25 = int_to_ptr.hbm [resolvable:$true] %s617_s25 }
  0x1d   : > { %2083 = dma.hbm_to_vmem [thread:$0]  (!%p2627_p5), %s588_s26, 16, %s590_s30, [#allocation6]  }
  0x1e   : > { %2089 = dma.hbm_to_vmem [thread:$0]  (!%p2627_p5), %s618_s25, 16, %s620_s13, [#allocation9]  }
  0x1f   : > { %s2995_s29 = smov (%p44_p6, %s43_s29), 0  ;;  %s2997_s0 = smov (!%p44_p6, %s46_s0), %s2448_s24 }
  0x20   : > { %2975 = sst [smem:[#allocation18_spill]] %s2995_s29  ;;  %s2456_s20 = smov [#allocation3]  }
  0x21   : > { %s577_s16 = sshll.u32 %s2456_s20, 4  ;;  %p48_p7 = scmp.ge.s32.totalorder %s2997_s0, 2  ;;  %s578_s16 = int_to_ptr.vmem [resolvable:$true] %s577_s16 }
  0x22   : > { %s575_s2 = sshll.u32 %s2974_s12, 4  ;;  %s2977_s15 = sld [smem:[#allocation27_spill]]  ;;  %s576_s2 = int_to_ptr.hbm [resolvable:$true] %s575_s2 }
  0x23   : > { %2080 = dma.hbm_to_vmem [thread:$0]  (!%p2627_p5), %s576_s2, 16, %s578_s16, [#allocation4]  }
  0x24   : > { %s2999_s0 = smov (%p48_p7, %s2997_s0), 0  ;;  %s2457_s17 = smov [#allocation7]  }
  0x25   : > { %2976 = sst [smem:[#allocation19_spill]] %s2999_s0  ;;  %s604_s25 = sshll.u32 %s2457_s17, 4  ;;  %s605_s25 = int_to_ptr.vmem [resolvable:$true] %s604_s25 }
  0x26   : > { %s2978_s18 = sld [smem:[#allocation30_spill]]  ;;  %s2458_s12 = smov [#allocation10]  }
  0x27   : > { %s631_s16 = sshll.u32 %s2458_s12, 4  ;;  %s641_s29 = sshll.u32 %s2951_s19, 4  ;;  %s632_s16 = int_to_ptr.vmem [resolvable:$true] %s631_s16  ;;  %s642_s29 = int_to_ptr.hbm [resolvable:$true] %s641_s29 }
  0x28   : > { %s602_s30 = sshll.u32 %s2977_s15, 4  ;;  %s2459_s13 = smov [#allocation11]   ;;  %s603_s30 = int_to_ptr.hbm [resolvable:$true] %s602_s30 }
  0x29   : > { %2086 = dma.hbm_to_vmem [thread:$0]  (!%p2627_p5), %s603_s30, 16, %s605_s25, [#allocation6]  }
  0x2a   : > { %s643_s26 = sshll.u32 %s2459_s13, 4  ;;  %712 = sbr.rel (%p2616_p3) target bundleno = 2818 (0xb02), region = 100  ;;  %s644_s26 = int_to_ptr.vmem [resolvable:$true] %s643_s26 }
  0x2b   : > { %2095 = dma.hbm_to_vmem [thread:$0]  (!%p2627_p5), %s642_s29, 16, %s644_s26, [#allocation12]  }
  0x2c   : > { %s629_s20 = sshll.u32 %s2978_s18, 4  ;;  %s630_s20 = int_to_ptr.hbm [resolvable:$true] %s629_s20 }
  0x2d   : > { %2092 = dma.hbm_to_vmem [thread:$0]  (!%p2627_p5), %s630_s20, 16, %s632_s16, [#allocation9]  }
  0x2f   : > { %2419 = dma.done.wait (%p2612_p2), [#allocation4], 16  }
  0x30   : > { %2421 = vsyncadd (%p2612_p2), [#allocation4], 4294967280 }
  0x31   : > { %2423 = dma.done.wait (%p2612_p2), [#allocation6], 32  }
  0x32   : > { %2425 = vsyncadd (%p2612_p2), [#allocation6], 4294967264 }
  0x33   : > { %2427 = dma.done.wait (%p2612_p2), [#allocation9], 32  }
  0x34   : > { %2429 = vsyncadd (%p2612_p2), [#allocation9], 4294967264 }
  0x35   : > { %2431 = dma.done.wait (%p2612_p2), [#allocation12], 16  }
  0x36   : > { %2433 = vsyncadd (%p2612_p2), [#allocation12], 4294967280  ;;  %p832_p8 = scmp.lt.s32.totalorder %s2440_s22, 1  ;;  %p834_p9 = scmp.lt.s32.totalorder %s2436_s1, 1  ;;  %v970_v0 = vld [vmem:[%s2940_s8 + $0x8] sm:$0xf]  ;;  %v1020_v26 = vlaneseq }
  0x37   : > { %s862_s12 = sadd.s32 1, %s2436_s1  ;;  %s2684_s4 = sadd.s32 4294967295, %s2436_s1  ;;  %v2041_v1 = vld [vmem:[%s2938_s6 + $0x8] sm:$0xff]  ;;  %v981_v2 = vunpack.c.l.b16 %v970_v0  ;;  %vm989_vm0 = vcmask 1043456   ;;  %v2040_v4 = vld [vmem:[%s2938_s6] sm:$0xff]  ;;  %vm910_vm1 = vcmask 261120  }
  0x38   : > { %s3001_s22 = smov (!%p832_p8, %s2440_s22), 1  ;;  %p2690_p10 = scmp.lt.s32.totalorder %s862_s12, 1  ;;  %958 = vmatpush.bf16.msra.mxu1 %v2041_v1  ;;  %v2042_v7 = vld [vmem:[%s2940_s8] sm:$0xff]  ;;  %vm985_vm2 = vcmask 195584   ;;  %v1021_v29 = vshrl.u32 %v1020_v26, 7  ;;  %v1027_v30 = vand.u32 127, %v1020_v26 }
  0x39   : > { %s835_s3 = scalar_select %p834_p9, %s2436_s1, 1  ;;  %v983_v5 = vpack.c.b16 %v981_v2, %v981_v2  ;;  %v2172_v16 = vld [vmem:[%s2937_s5] ss:$0 sm:$0xff]  ;;  %v2461_v45 = vmov -1e+30   ;;  %vm1045_vm13 = vcmask 64512  }
  0x3a   : > { %s2688_s29 = sshll.u32 %s3001_s22, 1  ;;  %p841_p11 = scmp.gt.s32.totalorder %s2684_s4, 0  ;;  %v2171_v24 = vld [vmem:[%s2941_s9] ss:$0 sm:$0xff]  ;;  %vm1087_vm14 = vcmask 261248   ;;  %vm1070_vm15 = vcmask 130048  }
  0x3b   : > { %s837_s0 = sadd.s32 %s2688_s29, %s835_s3  ;;  %p1936_p12 = scmp.lt.s32.totalorder %s2684_s4, 1  ;;  %v991_v8 = vsel %vm989_vm0, %v983_v5, 0  ;;  %v2170_v31 = vld [vmem:[%s2939_s7] ss:$0 sm:$0xff]  ;;  %vm1151_vm0 = vcmask 326912  }
  0x3c   : > { %s2695_s30 = sshll.u32 %s837_s0, 3  ;;  %s3003_s12 = smov (!%p2690_p10, %s862_s12), 1  ;;  %999 = vmatpush.bf16.msra.mxu2 %v991_v8  ;;  %959 = vmatpush.bf16.msra.mxu1 %v2040_v4 }
  0x3d   : > { %s2980_s16 = sld [smem:[#allocation24_spill]]  ;;  %s3005_s12 = smov (!%p2690_p10, %s3003_s12), 1 }
  0x3e   : > { %s2981_s26 = sld [smem:[#allocation22_spill]]  ;;  %s2460_s0 = smov 120  }
  0x3f   : > { %s2982_s21 = sld [smem:[#allocation20_spill]]  ;;  %s2471_s20 = smov 8  }
  0x40   : > { %s842_s13 = scalar_select %p841_p11, %s2684_s4, 0  ;;  %1000 = vmatpush.bf16.msra.mxu2 %v2042_v7 }
  0x41   : > { %s2983_s25 = sld [smem:[#allocation23_spill]]  ;;  %s2472_s2 = smov 56  }
  0x42   : > { %s3007_s13 = smov (!%p1936_p12, %s842_s13), 1 }
  0x43   : > { %v2039_v3 = vld [vmem:[%s2980_s16 + $0x8] sm:$0xff]  ;;  %v2038_v6 = vld [vmem:[%s2980_s16] sm:$0xff] }
  0x44   : > { %s861_s3 = scalar_lea.vmem %s2981_s26, %s2695_s30  ;;  %920 = vmatpush.bf16.msra.mxu0 %v2039_v3  ;;  %s870_s26 = sadd.s32 %s2688_s29, %s3005_s12 }
  0x45   : > { %s839_s15 = scalar_lea.vmem %s2982_s21, %s2695_s30  ;;  %s1949_s28 = sshll.u32 %s870_s26, 3  ;;  %v887_v10 = vld [vmem:[%s861_s3] sm:$0xff] }
  0x46   : > { %v2733_v9 = vld [vmem:[%s839_s15] sm:$0xff]  ;;  %s848_s15 = sadd.s32 %s3007_s13, %s2688_s29  ;;  %s2984_s21 = sld [smem:[#allocation21_spill]] }
  0x47   : > { %v893_v11 = vpack.c.bf16 %v2733_v9, %v2733_v9  ;;  %s872_s27 = scalar_lea.vmem %s2983_s25, %s1949_s28  ;;  %s1942_s18 = sshll.u32 %s848_s15, 3 }
  0x48   : > { %921 = vmatpush.bf16.msra.mxu0 %v2038_v6  ;;  %v888_v12 = vld [vmem:[%s872_s27] sm:$0xff]  ;;  %s1975_s29 = sshll.u32 %s2436_s1, 3  ;;  %s1977_s13 = sshll.u32 %s2684_s4, 3 }
  0x49   : > { %v971_v13 = vpack.c.bf16 %v888_v12, %v887_v10  ;;  %v1022_v27 = vstv %s1975_s29  ;;  %v1028_v28 = vstv %s1977_s13  ;;  %s2462_s1 = smov 16   ;;  %s2463_s4 = smov 112  }
  0x4a   : > { %v1023_v33 = vadd.s32 %v1022_v27, %v1021_v29  ;;  %v1029_v34 = vadd.s32 %v1028_v28, %v1027_v30  ;;  %v1030_v35 = vadd.s32 %v1027_v30, %v1022_v27  ;;  %s2464_s27 = smov 96   ;;  %s2465_s15 = smov 88  }
  0x4b   : > { %1960 = vmatmul.msk.bf16.vlgmr.msra.gmra.mxu0 %vm910_vm1, %v893_v11  ;;  %1974 = vmatmul.msk.bf16.vlgmr.msra.gmra.mxu2 %vm985_vm2, %v971_v13  ;;  %s2467_s12 = smov 72   ;;  %s2468_s3 = smov 80   ;;  %vm1237_vm2 = vcmask 130112  }
  0x4c   : > { %s850_s22 = scalar_lea.vmem %s2984_s21, %s1942_s18  ;;  %v1978_v37 = vadd.s32 4294967292, %v1023_v33  ;;  %vm1033_vm3 = vcmp.le.s32.totalorder %v1029_v34, %v1023_v33  ;;  %vm1035_vm4 = vcmp.ge.s32.totalorder %v1029_v34, 0  ;;  %v1038_v41 = vadd.s32 3, %v1023_v33  ;;  %s2466_s18 = smov 104  }
  0x4d   : > { %v886_v14 = vld [vmem:[%s850_s22] sm:$0xff]  ;;  %vm1037_vm6 = vcmp.ge.s32.totalorder %v1030_v35, %v1023_v33  ;;  %vm1041_vm9 = vcmp.lt.s32.totalorder %v1030_v35, 16  ;;  %s2469_s21 = smov 32   ;;  %s2470_s22 = smov 40  }
  0x4e   : > { %v932_v15 = vpack.c.bf16 %v2733_v9, %v886_v14  ;;  %vm1032_vm5 = vcmp.ge.s32.totalorder %v1029_v34, %v1978_v37  ;;  %vm1039_vm8 = vcmp.le.s32.totalorder %v1030_v35, %v1038_v41  ;;  %s2473_s29 = smov 48   ;;  %s2474_s13 = smov 24  }
  0x4f   : > { %vm1034_vm7 = vmand %vm1032_vm5, %vm1033_vm3  ;;  %vm1266_vm3 = vcmask 392512   ;;  %vm1378_vm5 = vcmask 458112  }
  0x50   : > { %1969 = vmatmul.msk.bf16.vlgmr.msra.gmra.mxu1 %vm910_vm1, %v932_v15  ;;  %vm1036_vm10 = vmand %vm1034_vm7, %vm1035_vm4  ;;  %vm1349_vm4 = vcmask 195712   ;;  %vm1490_vm7 = vcmask 523712  }
  0x51   : > { %vm1040_vm11 = vmand %vm1037_vm6, %vm1039_vm8  ;;  %v2764_v46 = vsel %vm1036_vm10, 0.0, %v2461_v45  ;;  %vm1461_vm6 = vcmask 261312   ;;  %vm1526_vm8 = vcmask 523264  }
  0x52   : > { %vm1042_vm12 = vmand %vm1040_vm11, %vm1041_vm9 }
  0x53   : > { %v1044_v51 = vsel %vm1042_vm12, 0.0, %v2461_v45 }
  0xc8   : > { %v923_v17 = vpop.f32.mrf.mxu0 }
  0xc9   : > { %v924_v18 = vadd.f32 %v2172_v16, %v923_v17 }
  0xcb   : > { %v927_v19 = vpack.c.bf16 %v924_v18, %v924_v18 }
  0xcd   : > { %v1154_v20 = vunpack.c.l.b16 %v927_v19  ;;  %v961_v21 = vpop.f32.mrf.mxu1 }
  0xce   : > { %v1002_v25 = vpop.f32.mrf.mxu2  ;;  %v962_v38 = vadd.f32 %v2170_v31, %v961_v21 }
  0xcf   : > { %v2752_v22 = vpack.c.b16 %v1154_v20, %v1154_v20  ;;  %v1003_v32 = vadd.f32 %v2171_v24, %v1002_v25 }
  0xd0   : > { %v925_v23 = vpop.f32.mrf.mxu0  ;;  %v966_v47 = vpack.c.bf16 %v962_v38, %v962_v38 }
  0xd1   : > { %1156 = vrot.lane.b32.xlu1 %v2752_v22, %s2460_s0  ;;  %v1007_v39 = vpack.c.bf16 %v1003_v32, %v1003_v32 }
  0xd2   : > { %v1011_v53 = vunpack.c.l.b16 %v966_v47 }
  0xd3   : > { %v1016_v48 = vunpack.c.l.b16 %v1007_v39 }
  0xd5   : > { %v963_v36 = vpop.f32.mrf.mxu1 }
  0xd6   : > { %v1004_v40 = vpop.f32.mrf.mxu2  ;;  %v964_v42 = vadd.f32 %v2170_v31, %v963_v36 }
  0xd7   : > { %v1005_v43 = vadd.f32 %v2171_v24, %v1004_v40 }
  0xd8   : > { %v967_v49 = vpack.c.bf16 %v964_v42, %v964_v42 }
  0xd9   : > { %v1008_v44 = vpack.c.bf16 %v1005_v43, %v1005_v43  ;;  %1083 = vrot.lane.b32.xlu1 %v1044_v51, %s2462_s1 }
  0xda   : > { %v1012_v54 = vunpack.c.l.b16 %v967_v49 }
  0xdb   : > { %v1017_v50 = vunpack.c.l.b16 %v1008_v44 }
  0xdc   : > { %v2773_v56 = vpack.c.b16 %v1012_v54, %v1011_v53 }
  0xdd   : > { %v2766_v52 = vpack.c.b16 %v1017_v50, %v1016_v48 }
  0xde   : > { %v1050_v57 = vsel %vm1045_vm13, %v2773_v56, 0 }
  0xdf   : > { %1160 = vrot.lane.b32.xlu0 %v2766_v52, %s2460_s0  ;;  %v1053_v55 = vsel %vm1045_vm13, %v2766_v52, 0 }
  0xe0   : > { %1061 = vmatpush.bf16.xpose.msra.mxu3 %v1053_v55 }
  0xe7   : > { %1158 = vrot.lane.b32.xlu0 %v2773_v56, %s2460_s0 }
  0xe8   : > { %1062 = vmatpush.bf16.xpose.msra.mxu3 %v1050_v57 }
  0xef   : > { %1979 = vmatmul.msk.bf16.vlgmr.msra.gmra.mxu3 %vm1045_vm13, %v927_v19 }
 0x143   : > { %v1157_v62 = vpop.permute.xlu1 %1156 }
 0x14b   : > { %v2783_v0 = vpop.permute.xlu1 %1083 }
 0x151   : > { %v1161_v58 = vpop.permute.xlu0 %1160 }
 0x152   : > { %v1169_v59 = vsel %vm1045_vm13, %v1161_v58, 0 }
 0x153   : > { %1177 = vmatpush.bf16.xpose.msrb.mxu2 %v1169_v59 }
 0x159   : > { %v1159_v60 = vpop.permute.xlu0 %1158 }
 0x15a   : > { %v1166_v61 = vsel %vm1045_vm13, %v1159_v60, 0 }
 0x15b   : > { %1178 = vmatpush.bf16.xpose.msrb.mxu2 %v1166_v61 }
 0x162   : > { %1982 = vmatmul.msk.bf16.vlgmr.msrb.gmra.mxu2 %vm1045_vm13, %v1157_v62 }
 0x172   : > { %v1064_v63 = vpop.f32.mrf.mxu3 }
 0x173   : > { %v1068_v1 = vmul.f32 0.35355338, %v1064_v63 }
 0x175   : > { %v1086_v2 = vadd.f32 %v2783_v0, %v1068_v1  ;;  %v1069_v14 = vadd.f32 %v1068_v1, %v2764_v46 }
 0x177   : > { %v1088_v3 = vsel %vm1087_vm14, %v1086_v2, -inf  ;;  %v1071_v15 = vsel %vm1070_vm15, %v1069_v14, -inf }
 0x178   : > { %1089 = vmax.xlane.f32.xlu2 %v1088_v3 }
 0x17a   : > { %v1066_v4 = vpop.f32.mrf.mxu3 }
 0x1e5   : > { %v1180_v5 = vpop.f32.mrf.mxu2 }
 0x1e6   : > { %v2787_v6 = vmul.f32 0.35355338, %v1180_v5 }
 0x1e8   : > { %v1197_v7 = vadd.f32 %v2787_v6, %v2783_v0 }
 0x1ea   : > { %v1198_v8 = vsel %vm1087_vm14, %v1197_v7, -inf }
 0x1eb   : > { %1199 = vmax.xlane.f32.xlu2 %v1198_v8  ;;  %v1090_v10 = vpop.xlane.xlu2 %1089 }
 0x1ec   : > { %v1091_v11 = vsub.f32 %v1086_v2, %v1090_v10 }
 0x1ed   : > { %v1182_v12 = vpop.f32.mrf.mxu2 }
 0x1ee   : > { %v1092_v13 = vmul.f32 1.442695, %v1091_v11 }
 0x1f0   : > { %2180 = vpow2.f32 %v1092_v13 }
 0x1f3   : > { %1072 = vmax.xlane.f32.xlu2 %v1071_v15 }
 0x1f6   : > { %v2181_v16 = vpop.eup %2180 }
 0x1f7   : > { %1095 = vrot.lane.b32.xlu0 %v2181_v16, %s2463_s4 }
 0x25e   : > { %v1200_v17 = vpop.xlane.xlu2 %1199 }
 0x25f   : > { %v1201_v18 = vsub.f32 %v1197_v7, %v1200_v17 }
 0x261   : > { %v1202_v19 = vmul.f32 1.442695, %v1201_v18 }
 0x263   : > { %2182 = vpow2.f32 %v1202_v19 }
 0x266   : > { %v1073_v20 = vpop.xlane.xlu2 %1072 }
 0x267   : > { %v1074_v21 = vsub.f32 %v1069_v14, %v1073_v20 }
 0x269   : > { %v2183_v23 = vpop.eup %2182  ;;  %v1075_v24 = vmul.f32 1.442695, %v1074_v21  ;;  %v1096_v25 = vpop.permute.xlu0 %1095 }
 0x26a   : > { %1205 = vrot.lane.b32.xlu1 %v2183_v23, %s2463_s4  ;;  %v1098_v26 = vsel %vm1070_vm15, %v1096_v25, 0.0 }
 0x26b   : > { %2184 = vpow2.f32 %v1075_v24  ;;  %1099 = vadd.xlane.f32.xlu0 %v1098_v26 }
 0x271   : > { %v2185_v27 = vpop.eup %2184 }
 0x272   : > { %v1077_v28 = vsel %vm1070_vm15, %v2185_v27, 0.0 }
 0x273   : > { %1078 = vadd.xlane.f32.xlu2 %v1077_v28 }
 0x28b   : > { %1104 = vrot.lane.b32.xlu2 %v2773_v56, %s2464_s27 }
 0x293   : > { %1128 = vrot.lane.b32.xlu2 %v2766_v52, %s2464_s27  ;;  %s2986_s27 = sld [smem:[#allocation31_spill]] }
 0x29b   : > { %1243 = vrot.lane.b32.xlu2 %v2766_v52, %s2465_s15 }
 0x2a3   : > { %1384 = vrot.lane.b32.xlu2 %v2766_v52, %s2466_s18 }
 0x2dc   : > { %v1206_v29 = vpop.permute.xlu1 %1205 }
 0x2dd   : > { %v1208_v30 = vsel %vm1070_vm15, %v1206_v29, 0.0 }
 0x2de   : > { %v1100_v31 = vpop.xlane.xlu0 %1099  ;;  %1209 = vadd.xlane.f32.xlu1 %v1208_v30 }
 0x2df   : > { %2186 = vrcp.f32 %v1100_v31 }
 0x2e5   : > { %v2187_v32 = vpop.eup %2186 }
 0x2e6   : > { %v1079_v33 = vpop.xlane.xlu2 %1078  ;;  %v1102_v34 = vmul.f32 %v2187_v32, %v2181_v16  ;;  %v1185_v32 = vadd.f32 %v2787_v6, %v2764_v46 }
 0x2e7   : > { %2188 = vrcp.f32 %v1079_v33 }
 0x2e8   : > { %v1124_v35 = vpack.c.bf16 %v1102_v34, %v1102_v34  ;;  %v1186_v33 = vsel %vm1070_vm15, %v1185_v32, -inf }
 0x2ea   : > { %1126 = vrot.lane.b32.xlu0 %v1124_v35, %s2463_s4 }
 0x2ed   : > { %v2189_v36 = vpop.eup %2188 }
 0x2ee   : > { %v1081_v37 = vmul.f32 %v2189_v36, %v2185_v27  ;;  %v1105_v38 = vpop.permute.xlu2 %1104 }
 0x2ef   : > { %1117 = vmatpush.bf16.msrb.mxu0 %v1105_v38 }
 0x2f0   : > { %v1103_v39 = vpack.c.bf16 %v1081_v37, %v1081_v37 }
 0x2f2   : > { %1270 = vrot.lane.b32.xlu0 %v2773_v56, %s2463_s4  ;;  %1980 = vmatmul.msk.bf16.vlgmr.msrb.gmra.mxu0 %vm1070_vm15, %v1103_v39 }
 0x2f6   : > { %v1129_v40 = vpop.permute.xlu2 %1128 }
 0x2f7   : > { %1272 = vrot.lane.b32.xlu1 %v2766_v52, %s2463_s4  ;;  %1141 = vmatpush.bf16.msrb.mxu1 %v1129_v40 }
 0x2fa   : > { %1380 = vrot.lane.b32.xlu0 %v2752_v22, %s2466_s18 }
 0x2fe   : > { %v1244_v41 = vpop.permute.xlu2 %1243 }
 0x2ff   : > { %1268 = vrot.lane.b32.xlu1 %v2752_v22, %s2463_s4  ;;  %1256 = vmatpush.bf16.msra.mxu0 %v1244_v41 }
 0x306   : > { %v1385_v42 = vpop.permute.xlu2 %1384 }
 0x307   : > { %v1393_v43 = vsel %vm1045_vm13, %v1385_v42, 0 }
 0x308   : > { %1401 = vmatpush.bf16.xpose.msrb.mxu0 %v1393_v43 }
 0x351   : > { %v1210_v44 = vpop.xlane.xlu1 %1209 }
 0x352   : > { %2190 = vrcp.f32 %v1210_v44 }
 0x358   : > { %v2191_v45 = vpop.eup %2190 }
 0x359   : > { %v1212_v47 = vmul.f32 %v2191_v45, %v2183_v23 }
 0x35b   : > { %v1239_v48 = vpack.c.bf16 %v1212_v47, %v1212_v47 }
 0x35c   : > { %v1127_v49 = vpop.permute.xlu0 %1126 }
 0x35d   : > { %1241 = vrot.lane.b32.xlu2 %v1239_v48, %s2463_s4  ;;  %1981 = vmatmul.msk.bf16.vlgmr.msrb.gmra.mxu1 %vm1070_vm15, %v1127_v49 }
 0x364   : > { %v1271_v51 = vpop.permute.xlu0 %1270 }
 0x365   : > { %1382 = vrot.lane.b32.xlu2 %v2773_v56, %s2466_s18  ;;  %v1278_v54 = vsel %vm1045_vm13, %v1271_v51, 0 }
 0x369   : > { %v1273_v50 = vpop.permute.xlu1 %1272 }
 0x36a   : > { %v1281_v22 = vsel %vm1045_vm13, %v1273_v50, 0 }
 0x36b   : > { %1289 = vmatpush.bf16.xpose.msra.mxu1 %v1281_v22 }
 0x36c   : > { %v1381_v61 = vpop.permute.xlu0 %1380 }
 0x36f   : > { %v1119_v53 = vpop.f32.mrf.mxu0 }
 0x370   : > { %1123 = vst.msk [vmem:[#allocation2] sm:$0xff] %vm1045_vm13, %v1119_v53 }
 0x371   : > { %v1269_v57 = vpop.permute.xlu1 %1268 }
 0x373   : > { %1290 = vmatpush.bf16.xpose.msra.mxu1 %v1278_v54 }
 0x377   : > { %v1121_v55 = vpop.f32.mrf.mxu0 }
 0x37a   : > { %1985 = vmatmul.msk.bf16.vlgmr.msra.gmra.mxu1 %vm1045_vm13, %v1269_v57 }
 0x3b7   : > { %v1242_v58 = vpop.permute.xlu2 %1241 }
 0x3b8   : > { %1984 = vmatmul.msk.bf16.vlgmr.msra.gmra.mxu0 %vm1070_vm15, %v1242_v58 }
 0x3bf   : > { %v1383_v59 = vpop.permute.xlu2 %1382 }
 0x3c0   : > { %v1390_v60 = vsel %vm1045_vm13, %v1383_v59, 0 }
 0x3c1   : > { %1402 = vmatpush.bf16.xpose.msrb.mxu0 %v1390_v60 }
 0x3c8   : > { %1988 = vmatmul.msk.bf16.vlgmr.msrb.gmra.mxu0 %vm1045_vm13, %v1381_v61 }
 0x3da   : > { %v2827_v62 = vpop.f32.mrf.mxu1 }
 0x3e2   : > { %v1145_v63 = vpop.f32.mrf.mxu1 }
 0x3f7   : > { %v1292_v1 = vpop.f32.mrf.mxu1 }
 0x3f8   : > { %v1296_v2 = vmul.f32 0.35355338, %v1292_v1 }
 0x3fa   : > { %v1309_v3 = vadd.f32 %v1296_v2, %v2783_v0  ;;  %v1297_v7 = vadd.f32 %v1296_v2, %v2764_v46 }
 0x3fc   : > { %v1310_v4 = vsel %vm1087_vm14, %v1309_v3, -inf  ;;  %v1298_v8 = vsel %vm1070_vm15, %v1297_v7, -inf }
 0x3fd   : > { %1311 = vmax.xlane.f32.xlu2 %v1310_v4 }
 0x3ff   : > { %v1294_v5 = vpop.f32.mrf.mxu1 }
 0x405   : > { %1299 = vmax.xlane.f32.xlu2 %v1298_v8 }
 0x435   : > { %v2833_v10 = vpop.f32.mrf.mxu0 }
 0x43d   : > { %v1260_v11 = vpop.f32.mrf.mxu0 }
 0x445   : > { %v1404_v12 = vpop.f32.mrf.mxu0 }
 0x446   : > { %v1408_v13 = vmul.f32 0.35355338, %v1404_v12 }
 0x448   : > { %v1421_v14 = vadd.f32 %v1408_v13, %v2783_v0  ;;  %v1409_v17 = vadd.f32 %v1408_v13, %v2764_v46 }
 0x44a   : > { %v1422_v15 = vsel %vm1087_vm14, %v1421_v14, -inf  ;;  %v1410_v18 = vsel %vm1070_vm15, %v1409_v17, -inf }
 0x44b   : > { %1423 = vmax.xlane.f32.xlu1 %v1422_v15 }
 0x44d   : > { %v1406_v16 = vpop.f32.mrf.mxu0 }
 0x453   : > { %1411 = vmax.xlane.f32.xlu1 %v1410_v18 }
 0x470   : > { %v1312_v19 = vpop.xlane.xlu2 %1311 }
 0x471   : > { %v1313_v20 = vsub.f32 %v1309_v3, %v1312_v19 }
 0x473   : > { %v1314_v21 = vmul.f32 1.442695, %v1313_v20 }
 0x475   : > { %2192 = vpow2.f32 %v1314_v21 }
 0x478   : > { %v1300_v23 = vpop.xlane.xlu2 %1299 }
 0x479   : > { %v1301_v24 = vsub.f32 %v1297_v7, %v1300_v23 }
 0x47b   : > { %v2839_v25 = vpop.eup %2192  ;;  %v1302_v26 = vmul.f32 1.442695, %v1301_v24 }
 0x47c   : > { %1317 = vrot.lane.b32.xlu0 %v2839_v25, %s2463_s4 }
 0x47d   : > { %2194 = vpow2.f32 %v1302_v26 }
 0x483   : > { %v2195_v0 = vpop.eup %2194 }
 0x484   : > { %v1304_v27 = vsel %vm1070_vm15, %v2195_v0, 0.0 }
 0x485   : > { %1305 = vadd.xlane.f32.xlu1 %v1304_v27  ;;  %v2045_v27 = vld [vmem:[%s2942_s10 + $0x10] sm:$0xff] }
 0x4be   : > { %v1424_v28 = vpop.xlane.xlu1 %1423 }
 0x4bf   : > { %v1425_v29 = vsub.f32 %v1421_v14, %v1424_v28  ;;  %v2044_v28 = vld [vmem:[%s2942_s10 + $0x8] sm:$0xff] }
 0x4c1   : > { %v1426_v30 = vmul.f32 1.442695, %v1425_v29  ;;  %v2043_v29 = vld [vmem:[%s2942_s10] sm:$0xff] }
 0x4c3   : > { %2196 = vpow2.f32 %v1426_v30 }
 0x4c6   : > { %v1412_v34 = vpop.xlane.xlu1 %1411 }
 0x4c7   : > { %v1413_v35 = vsub.f32 %v1409_v17, %v1412_v34 }
 0x4c9   : > { %v2197_v31 = vpop.eup %2196  ;;  %v1414_v37 = vmul.f32 1.442695, %v1413_v35  ;;  %v2173_v35 = vld [vmem:[%s2943_s11] ss:$0 sm:$0xff] }
 0x4ca   : > { %1429 = vrot.lane.b32.xlu0 %v2197_v31, %s2463_s4 }
 0x4cb   : > { %2198 = vpow2.f32 %v1414_v37 }
 0x4d1   : > { %v2199_v46 = vpop.eup %2198 }
 0x4d2   : > { %v1416_v6 = vsel %vm1070_vm15, %v2199_v46, 0.0 }
 0x4ee   : > { %v1318_v36 = vpop.permute.xlu0 %1317 }
 0x4ef   : > { %v1320_v47 = vsel %vm1070_vm15, %v1318_v36, 0.0 }
 0x4f4   : > { %1187 = vmax.xlane.f32.xlu0 %v1186_v33 }
 0x4f8   : > { %v1306_v48 = vpop.xlane.xlu1 %1305 }
 0x508   : > { %1214 = vrot.lane.b32.xlu0 %v2773_v56, %s2465_s15  ;;  %s883_s15 = scalar_lea.vmem %s2986_s27, %s2695_s30 }
 0x510   : > { %1467 = vrot.lane.b32.xlu0 %v2766_v52, %s2467_s12 }
 0x53c   : > { %v1430_v38 = vpop.permute.xlu0 %1429 }
 0x53d   : > { %v1432_v39 = vsel %vm1070_vm15, %v1430_v38, 0.0 }
 0x53e   : > { %1433 = vadd.xlane.f32.xlu1 %v1432_v39 }
 0x546   : > { %1417 = vadd.xlane.f32.xlu1 %v1416_v6  ;;  %v2475_v6 = vmov 32.0  }
 0x55f   : > { %1355 = vrot.lane.b32.xlu1 %v2766_v52, %s2468_s3 }
 0x567   : > { %v1188_v40 = vpop.xlane.xlu0 %1187 }
 0x568   : > { %v1189_v41 = vsub.f32 %v1185_v32, %v1188_v40 }
 0x56a   : > { %v1190_v42 = vmul.f32 1.442695, %v1189_v41 }
 0x56c   : > { %2200 = vpow2.f32 %v1190_v42 }
 0x572   : > { %v2201_v43 = vpop.eup %2200 }
 0x573   : > { %v1192_v44 = vsel %vm1070_vm15, %v2201_v43, 0.0 }
 0x574   : > { %1193 = vadd.xlane.f32.xlu2 %v1192_v44 }
 0x57a   : > { %v1215_v45 = vpop.permute.xlu0 %1214 }
 0x57b   : > { %1227 = vmatpush.bf16.msrb.mxu3 %v1215_v45 }
 0x57c   : > { %1321 = vadd.xlane.f32.xlu2 %v1320_v47 }
 0x594   : > { %1326 = vrot.lane.b32.xlu2 %v2773_v56, %s2468_s3 }
 0x5b1   : > { %v1434_v49 = vpop.xlane.xlu1 %1433 }
 0x5b2   : > { %2202 = vrcp.f32 %v1434_v49 }
 0x5b8   : > { %v2203_v50 = vpop.eup %2202 }
 0x5b9   : > { %v1436_v52 = vmul.f32 %v2203_v50, %v2197_v31  ;;  %v1418_v51 = vpop.xlane.xlu1 %1417 }
 0x5bb   : > { %v1463_v22 = vpack.c.bf16 %v1436_v52, %v1436_v52  ;;  %v2048_v52 = vld [vmem:[%s2946_s14 + $0x8] sm:$0xff] }
 0x5bc   : > { %1618 = vmatpush.bf16.msra.mxu0 %v2048_v52 }
 0x5bd   : > { %1465 = vrot.lane.b32.xlu0 %v1463_v22, %s2463_s4  ;;  %v2047_v22 = vld [vmem:[%s2946_s14] sm:$0xff] }
 0x5c0   : > { %1619 = vmatpush.bf16.msra.mxu0 %v2047_v22 }
 0x5c5   : > { %1148 = vrot.lane.b32.xlu0 %v2827_v62, %s2469_s21  ;;  %v1468_v62 = vpop.permute.xlu0 %1467 }
 0x5d1   : > { %v1356_v53 = vpop.permute.xlu1 %1355 }
 0x5d2   : > { %1368 = vmatpush.bf16.msra.mxu3 %v1356_v53 }
 0x5e7   : > { %v1194_v54 = vpop.xlane.xlu2 %1193 }
 0x5e8   : > { %2204 = vrcp.f32 %v1194_v54 }
 0x5e9   : > { %2206 = vrcp.f32 %v1306_v48 }
 0x5ee   : > { %v2205_v55 = vpop.eup %2204 }
 0x5ef   : > { %v1196_v57 = vmul.f32 %v2205_v55, %v2201_v43  ;;  %v1322_v58 = vpop.xlane.xlu2 %1321  ;;  %v2207_v60 = vpop.eup %2206 }
 0x5f0   : > { %2208 = vrcp.f32 %v1322_v58  ;;  %v1308_v61 = vmul.f32 %v2207_v60, %v2195_v0  ;;  %v2046_v0 = vld [vmem:[%s2942_s10 + $0x18] sm:$0xff] }
 0x5f1   : > { %v1213_v59 = vpack.c.bf16 %v1196_v57, %v1196_v57  ;;  %2210 = vrcp.f32 %v1418_v51 }
 0x5f2   : > { %v1325_v3 = vpack.c.bf16 %v1308_v61, %v1308_v61  ;;  %2212 = vrcp.f32 %v2475_v6 }
 0x5f3   : > { %1983 = vmatmul.msk.bf16.vlgmr.msrb.gmra.mxu3 %vm1070_vm15, %v1213_v59 }
 0x5f4   : > { %1534 = vmatpush.bf16.msrb.mxu3 %v2046_v0 }
 0x5f6   : > { %v2209_v63 = vpop.eup %2208 }
 0x5f7   : > { %v1327_v1 = vpop.permute.xlu2 %1326  ;;  %v1324_v2 = vmul.f32 %v2209_v63, %v2839_v25  ;;  %v2211_v11 = vpop.eup %2210 }
 0x5f8   : > { %1339 = vmatpush.bf16.msra.mxu2 %v1327_v1  ;;  %v1420_v12 = vmul.f32 %v2211_v11, %v2199_v46  ;;  %1535 = vmatpush.bf16.msrb.mxu3 %v2045_v27  ;;  %v2213_v40 = vpop.eup %2212 }
 0x5f9   : > { %v1351_v4 = vpack.c.bf16 %v1324_v2, %v1324_v2  ;;  %v1555_v41 = vmul.f32 32.0, %v2213_v40  ;;  %vm1559_vm9 = vweird.f32 %v2213_v40  ;;  %v2174_v2 = vld [vmem:[#allocation3] ss:$0 sm:$0xff] }
 0x5fa   : > { %v1437_v14 = vpack.c.bf16 %v1420_v12, %v1420_v12 }
 0x5fb   : > { %1353 = vrot.lane.b32.xlu2 %v1351_v4, %s2463_s4  ;;  %1986 = vmatmul.msk.bf16.vlgmr.msra.gmra.mxu2 %vm1070_vm15, %v1325_v3  ;;  %v1556_v42 = vsub.f32 1.0, %v1555_v41  ;;  %v2175_v3 = vld [vmem:[#allocation5] ss:$0 sm:$0xff] }
 0x5fc   : > { %1480 = vmatpush.bf16.msrb.mxu2 %v1468_v62  ;;  %1536 = vmatpush.bf16.msrb.mxu3 %v2044_v28 }
 0x5fd   : > { %v1557_v43 = vmul.f32 %v2213_v40, %v1556_v42 }
 0x5ff   : > { %v1558_v44 = vadd.f32 %v2213_v40, %v1557_v43 }
 0x600   : > { %1537 = vmatpush.bf16.msrb.mxu3 %v2043_v29 }
 0x601   : > { %v1560_v45 = vsel %vm1559_vm9, %v2213_v40, %v1558_v44 }
 0x603   : > { %1438 = vrot.lane.b32.xlu2 %v2773_v56, %s2467_s12 }
 0x60b   : > { %1263 = vrot.lane.b32.xlu2 %v2833_v10, %s2470_s22 }
 0x62f   : > { %v1466_v5 = vpop.permute.xlu0 %1465 }
 0x630   : > { %1990 = vmatmul.msk.bf16.vlgmr.msrb.gmra.mxu2 %vm1070_vm15, %v1466_v5 }
 0x637   : > { %v1149_v7 = vpop.permute.xlu0 %1148 }
 0x638   : > { %1152 = vst.msk [vmem:[#allocation2] sm:$0xff] %vm1151_vm0, %v1149_v7 }
 0x655   : > { %v1354_v8 = vpop.permute.xlu2 %1353 }
 0x656   : > { %1987 = vmatmul.msk.bf16.vlgmr.msra.gmra.mxu3 %vm1070_vm15, %v1354_v8 }
 0x65d   : > { %v1439_v13 = vpop.permute.xlu2 %1438 }
 0x65e   : > { %1451 = vmatpush.bf16.msrb.mxu1 %v1439_v13  ;;  %v2176_v13 = vld [vmem:[#allocation7] ss:$0 sm:$0xff] }
 0x661   : > { %1989 = vmatmul.msk.bf16.vlgmr.msrb.gmra.mxu1 %vm1070_vm15, %v1437_v14 }
 0x665   : > { %v1264_v25 = vpop.permute.xlu2 %1263 }
 0x676   : > { %v1229_v56 = vpop.f32.mrf.mxu3 }
 0x677   : > { %1234 = vrot.lane.b32.xlu1 %v1229_v56, %s2471_s20 }
 0x67e   : > { %v1231_v10 = vpop.f32.mrf.mxu3  ;;  %v1341_v15 = vpop.f32.mrf.mxu2 }
 0x67f   : > { %1346 = vrot.lane.b32.xlu0 %v1341_v15, %s2462_s1 }
 0x686   : > { %v1343_v16 = vpop.f32.mrf.mxu2 }
 0x6b3   : > { %v1482_v17 = vpop.f32.mrf.mxu2 }
 0x6b4   : > { %1487 = vrot.lane.b32.xlu0 %v1482_v17, %s2472_s2  ;;  %v2177_v17 = vld [vmem:[#allocation8] ss:$0 sm:$0xff] }
 0x6bb   : > { %v1484_v18 = vpop.f32.mrf.mxu2 }
 0x6d9   : > { %v1370_v19 = vpop.f32.mrf.mxu3 }
 0x6da   : > { %1375 = vrot.lane.b32.xlu1 %v1370_v19, %s2473_s29  ;;  %s2985_s29 = sld [smem:[#allocation28_spill]] }
 0x6de   : > { %v1453_v20 = vpop.f32.mrf.mxu1 }
 0x6df   : > { %1458 = vrot.lane.b32.xlu2 %v1453_v20, %s2474_s13 }
 0x6e0   : > { %v2052_v51 = vld [vmem:[%s2985_s29 + $0x18] sm:$0xff]  ;;  %v2051_v55 = vld [vmem:[%s2985_s29 + $0x10] sm:$0xff]  ;;  %v2050_v11 = vld [vmem:[%s2985_s29 + $0x8] sm:$0xff] }
 0x6e1   : > { %v1372_v21 = vpop.f32.mrf.mxu3  ;;  %1670 = vmatpush.bf16.msra.mxu1 %v2052_v51  ;;  %v2049_v12 = vld [vmem:[%s2985_s29] sm:$0xff] }
 0x6e5   : > { %1671 = vmatpush.bf16.msra.mxu1 %v2051_v55 }
 0x6e6   : > { %v1455_v23 = vpop.f32.mrf.mxu1 }
 0x6e9   : > { %v1235_v24 = vpop.permute.xlu1 %1234  ;;  %1672 = vmatpush.bf16.msra.mxu1 %v2050_v11 }
 0x6ea   : > { %1238 = vst.msk [vmem:[#allocation2] sm:$0xff] %vm1237_vm2, %v1235_v24 }
 0x6eb   : > { %1267 = vst.msk [vmem:[#allocation2] sm:$0xff] %vm1266_vm3, %v1264_v25 }
 0x6ed   : > { %1673 = vmatpush.bf16.msra.mxu1 %v2049_v12 }
 0x6f1   : > { %v1347_v26 = vpop.permute.xlu0 %1346 }
 0x6f2   : > { %1350 = vst.msk [vmem:[#allocation2] sm:$0xff] %vm1349_vm4, %v1347_v26 }
 0x726   : > { %v1488_v32 = vpop.permute.xlu0 %1487 }
 0x739   : > { %v1459_v31 = vpop.permute.xlu2 %1458 }
 0x74c   : > { %v1376_v30 = vpop.permute.xlu1 %1375 }
 0x74d   : > { %1379 = vst.msk [vmem:[#allocation2] sm:$0xff] %vm1378_vm5, %v1376_v30 }
 0x74e   : > { %1462 = vst.msk [vmem:[#allocation2] sm:$0xff] %vm1461_vm6, %v1459_v31 }
 0x74f   : > { %1491 = vst.msk [vmem:[#allocation2] sm:$0xff] %vm1490_vm7, %v1488_v32 }
 0x756   : > { %v1492_v33 = vld [vmem:[#allocation2] sm:$0xff] }
 0x757   : > { %v1501_v34 = vpack.c.bf16 %v1492_v33, %v1492_v33 }
 0x759   : > { %2007 = vmatmul.msk.bf16.vlgmr.msrb.gmra.mxu3 %vm1526_vm8, %v1501_v34 }
 0x7dc   : > { %v1539_v36 = vpop.f32.mrf.mxu3 }
 0x7dd   : > { %v1543_v37 = vadd.f32 %v1539_v36, %v2733_v9 }
 0x7df   : > { %v1548_v38 = vadd.f32 %v2173_v35, %v1543_v37  ;;  %v2178_v37 = vld [vmem:[#allocation10] ss:$0 sm:$0xff] }
 0x7e1   : > { %v1551_v39 = vsel %vm910_vm1, %v1548_v38, 0.0 }
 0x7e2   : > { %1552 = vadd.xlane.f32.xlu1 %v1551_v39  ;;  %v2179_v39 = vld [vmem:[#allocation11] ss:$0 sm:$0xff] }
 0x7e4   : > { %v1541_v46 = vpop.f32.mrf.mxu3 }
 0x855   : > { %v1553_v47 = vpop.xlane.xlu1 %1552 }
 0x856   : > { %v1561_v48 = vmul.f32 %v1560_v45, %v1553_v47 }
 0x858   : > { %v1562_v49 = vsub.f32 %v1548_v38, %v1561_v48 }
 0x85a   : > { %v1563_v50 = vmul.f32 %v1562_v49, %v1562_v49 }
 0x85c   : > { %v1564_v9 = vsel %vm910_vm1, %v1563_v50, 0.0 }
 0x85d   : > { %1565 = vadd.xlane.f32.xlu2 %v1564_v9 }
 0x8d0   : > { %v1566_v53 = vpop.xlane.xlu2 %1565 }
 0x8d1   : > { %v1567_v54 = vmul.f32 %v1566_v53, %v1560_v45 }
 0x8d3   : > { %v1568_v57 = vadd.f32 1e-05, %v1567_v54 }
 0x8d5   : > { %2214 = vrsqrt.f32 %v1568_v57  ;;  %vm1575_vm11 = vweird.f32 %v1568_v57 }
 0x8db   : > { %v2215_v58 = vpop.eup %2214 }
 0x8dc   : > { %v1570_v59 = vmul.f32 %v2215_v58, %v1568_v57  ;;  %vm1576_vm10 = vweird.f32 %v2215_v58 }
 0x8dd   : > { %vm1577_vm12 = vmor %vm1575_vm11, %vm1576_vm10 }
 0x8de   : > { %v1571_v60 = vmul.f32 %v2215_v58, %v1570_v59 }
 0x8e0   : > { %v1572_v61 = vmul.f32 0.5, %v1571_v60 }
 0x8e2   : > { %v1573_v63 = vsub.f32 1.5, %v1572_v61 }
 0x8e4   : > { %v1574_v1 = vmul.f32 %v2215_v58, %v1573_v63 }
 0x8e6   : > { %v1578_v62 = vsel %vm1577_vm12, %v2215_v58, %v1574_v1 }
 0x8e7   : > { %v1579_v4 = vmul.f32 %v1578_v62, %v1562_v49 }
 0x8e9   : > { %v1583_v5 = vmul.f32 %v2174_v2, %v1579_v4 }
 0x8eb   : > { %v1587_v7 = vadd.f32 %v2175_v3, %v1583_v5 }
 0x8ed   : > { %v1592_v8 = vpack.c.bf16 %v1587_v7, %v1587_v7 }
 0x8ef   : > { %2016 = vmatmul.msk.bf16.vlgmr.msra.gmra.mxu0 %vm910_vm1, %v1592_v8 }
 0x96c   : > { %v1621_v14 = vpop.f32.mrf.mxu0 }
 0x96d   : > { %v1622_v56 = vadd.f32 %v2176_v13, %v1621_v14 }
 0x96f   : > { %v1625_v10 = vmax.f32 %v1622_v56, 0.0 }
 0x971   : > { %v1634_v15 = vpack.c.bf16 %v1625_v10, %v1625_v10 }
 0x973   : > { %2033 = vmatmul.msk.bf16.vlgmr.msra.gmra.mxu1 %vm1526_vm8, %v1634_v15 }
 0x974   : > { %v1623_v16 = vpop.f32.mrf.mxu0 }
 0x9f0   : > { %v1675_v18 = vpop.f32.mrf.mxu1 }
 0x9f1   : > { %v1676_v19 = vadd.f32 %v2177_v17, %v1675_v18 }
 0x9f3   : > { %v1679_v20 = vadd.f32 %v1676_v19, %v1587_v7 }
 0x9f5   : > { %v1682_v21 = vsel %vm910_vm1, %v1679_v20, 0.0 }
 0x9f6   : > { %1683 = vadd.xlane.f32.xlu0 %v1682_v21 }
 0x9f8   : > { %v1677_v23 = vpop.f32.mrf.mxu1 }
 0xa69   : > { %v1684_v24 = vpop.xlane.xlu0 %1683 }
 0xa6a   : > { %v1685_v25 = vmul.f32 %v1684_v24, %v1560_v45 }
 0xa6c   : > { %v1686_v26 = vsub.f32 %v1679_v20, %v1685_v25 }
 0xa6e   : > { %v1687_v0 = vmul.f32 %v1686_v26, %v1686_v26 }
 0xa70   : > { %v1688_v27 = vsel %vm910_vm1, %v1687_v0, 0.0 }
 0xa71   : > { %1689 = vadd.xlane.f32.xlu1 %v1688_v27 }
 0xae4   : > { %v1690_v28 = vpop.xlane.xlu1 %1689 }
 0xae5   : > { %v1691_v29 = vmul.f32 %v1690_v28, %v1560_v45 }
 0xae7   : > { %v1692_v30 = vadd.f32 1e-05, %v1691_v29 }
 0xae9   : > { %2216 = vrsqrt.f32 %v1692_v30  ;;  %vm1699_vm14 = vweird.f32 %v1692_v30 }
 0xaef   : > { %v2217_v31 = vpop.eup %2216 }
 0xaf0   : > { %v1694_v32 = vmul.f32 %v2217_v31, %v1692_v30  ;;  %vm1700_vm13 = vweird.f32 %v2217_v31 }
 0xaf1   : > { %vm1701_vm15 = vmor %vm1699_vm14, %vm1700_vm13 }
 0xaf2   : > { %v1695_v33 = vmul.f32 %v2217_v31, %v1694_v32 }
 0xaf4   : > { %v1696_v34 = vmul.f32 0.5, %v1695_v33 }
 0xaf6   : > { %v1697_v35 = vsub.f32 1.5, %v1696_v34 }
 0xaf8   : > { %v1698_v36 = vmul.f32 %v2217_v31, %v1697_v35 }
 0xafa   : > { %v1702_v38 = vsel %vm1701_vm15, %v2217_v31, %v1698_v36 }
 0xafb   : > { %v1703_v46 = vmul.f32 %v1702_v38, %v1686_v26 }
 0xafd   : > { %v1707_v6 = vmul.f32 %v2178_v37, %v1703_v46 }
 0xaff   : > { %v1711_v40 = vadd.f32 %v2179_v39, %v1707_v6 }
 0xb01   : > { %1712 = vst.msk [vmem:[%s883_s15] sm:$0xff] %vm910_vm1, %v1711_v40 }
 0xb02 PF: > { %s2987_s18 = sld [smem:[#allocation17_spill]]  ;;  %s2990_s1 = smov %s2444_s23 }
 0xb03   : > { %s2988_s12 = sld [smem:[#allocation18_spill]]  ;;  %s2991_s22 = smov %s2448_s24 }
 0xb04   : > { %s2989_s3 = sld [smem:[#allocation19_spill]] }
 0xb08   : > { %s34_s2 = sadd.s32 1, %s2987_s18  }
 0xb09   : > { %p31_p13 = scmp.ge.s32.totalorder %s34_s2, 6   ;;  %s2992_s23 = smov %s2988_s12 }
 0xb0a   : > { %s2993_s24 = smov %s2989_s3 }
 0xb0b   :  { %33 = sbr.rel (!%p31_p13) target bundleno = 19 (0x13), region = 164 }
 0xb10   :  { %1740 = vsyncpa [#allocation4], 1 }
 0xb11   :  { %1742 = vsyncpa [#allocation4 + $0x1], 1 }
 0xb12   :  { %1743 = vsyncpa [#allocation6], 1 }
 0xb13   :  { %1744 = vsyncpa [#allocation9], 1 }
 0xb14   :  { %1745 = vsyncpa [#allocation12], 1 }

// kernel: hybrid_attention_decoder_forward.6
= control target key start
LH: loop header
LB: loop body
LE: loop exit
PB: predicated region body
PF: predicated region fallthrough
CT: control target
= control target key end

     0   :  { %s2159_s22 = smov 0   ;;  %s2161_s23 = smov 0   ;;  %s2455_s0 = inlined_call_operand.vmem [shape: f32[2,16,32], index: 0, kind: input, shape index: {}, may-alias: {0,1}]   ;;  %s2456_s1 = inlined_call_operand.vmem [shape: f32[2,16,32], index: 1, kind: input, shape index: {}, may-alias: {0,1}]   ;;  %s2457_s2 = inlined_call_operand.vmem [shape: f32[2,16,24], index: 2, kind: input, shape index: {}, may-alias: {2,3}]   ;;  %s2458_s3 = inlined_call_operand.vmem [shape: f32[2,16,24], index: 3, kind: input, shape index: {}, may-alias: {2,3}]   ;;  %s2459_s4 = inlined_call_operand.vmem [shape: bf16[32,32], index: 4, kind: input, shape index: {}]   ;;  %s2460_s5 = inlined_call_operand.vmem [shape: f32[1,32], index: 5, kind: input, shape index: {}]   ;;  %s2461_s6 = inlined_call_operand.vmem [shape: bf16[32,64], index: 6, kind: input, shape index: {}]   ;;  %s2462_s7 = inlined_call_operand.vmem [shape: f32[1,64], index: 7, kind: input, shape index: {}]   ;;  %s2463_s8 = inlined_call_operand.vmem [shape: bf16[24,64], index: 8, kind: input, shape index: {}]   ;;  %s2464_s9 = inlined_call_operand.vmem [shape: f32[1,64], index: 9, kind: input, shape index: {}]   ;;  %s2465_s10 = inlined_call_operand.vmem [shape: bf16[64,32], index: 10, kind: input, shape index: {}]   ;;  %s2466_s11 = inlined_call_operand.vmem [shape: f32[1,32], index: 11, kind: input, shape index: {}]   ;;  %s2467_s12 = inlined_call_operand.vmem [shape: f32[1,32], index: 12, kind: input, shape index: {}]   ;;  %s2468_s13 = inlined_call_operand.vmem [shape: f32[1,32], index: 13, kind: input, shape index: {}]   ;;  %s2469_s14 = inlined_call_operand.vmem [shape: bf16[32,64], index: 14, kind: input, shape index: {}]   ;;  %s2470_s15 = inlined_call_operand.vmem [shape: f32[1,64], index: 15, kind: input, shape index: {}]   ;;  %s2471_s16 = inlined_call_operand.vmem [shape: bf16[64,32], index: 16, kind: input, shape index: {}]   ;;  %s2472_s17 = inlined_call_operand.vmem [shape: f32[1,32], index: 17, kind: input, shape index: {}]   ;;  %s2473_s18 = inlined_call_operand.vmem [shape: f32[1,32], index: 18, kind: input, shape index: {}]   ;;  %s2474_s19 = inlined_call_operand.vmem [shape: f32[1,32], index: 19, kind: input, shape index: {}]   ;;  %s2475_s20 = inlined_call_operand.vmem [shape: f32[2,16,32], index: 20, kind: output, shape index: {}]  }
   0x1   :  { %2481 = sst [smem:[#allocation8_spill]] %s2455_s0  ;;  %s2163_s24 = smov 0  }
   0x2   :  { %2482 = sst [smem:[#allocation9_spill]] %s2456_s1  ;;  %s2157_s1 = smov 0  }
   0x3   :  { %2483 = sst [smem:[#allocation10_spill]] %s2457_s2  ;;  %s2165_s2 = smov 0  }
   0x4   :  { %2484 = sst [smem:[#allocation11_spill]] %s2458_s3 }
   0x5   :  { %2485 = sst [smem:[#allocation12_spill]] %s2459_s4 }
   0x6   :  { %2486 = sst [smem:[#allocation13_spill]] %s2461_s6 }
   0x7   :  { %2487 = sst [smem:[#allocation14_spill]] %s2475_s20 }
   0x8 LB: > { %2488 = sst [smem:[#allocation3_spill]] %s2026_s23  ;;  %s39_s25 = sadd.s32 1, %s2026_s23  ;;  %s2034_s2 = sphi %s2165_s2, %s30_s2   ;;  %s2030_s24 = sphi %s2163_s24, %s2505_s24   ;;  %s2026_s23 = sphi %s2161_s23, %s2504_s23   ;;  %s2022_s22 = sphi %s2159_s22, %s2503_s22   ;;  %s2018_s1 = sphi %s2157_s1, %s2502_s1  }
   0x9   : > { %2489 = sst [smem:[#allocation4_spill]] %s2030_s24  ;;  %s42_s3 = sadd.s32 1, %s2030_s24 }
   0xa   : > { %2490 = sst [smem:[#allocation5_spill]] %s2034_s2  ;;  %p40_p0 = scmp.ge.s32.totalorder %s39_s25, 2 }
   0xb   : > { %p1771_p1 = scmp.ge.s32.totalorder %s2034_s2, 1  ;;  %p650_p2 = scmp.lt.s32.totalorder %s2034_s2, 5 }
   0xc   : > { %s2507_s25 = smov (%p40_p0, %s39_s25), 0  ;;  %s2509_s3 = smov (!%p40_p0, %s42_s3), %s2030_s24 }
   0xd   : > { %2491 = sst [smem:[#allocation6_spill]] %s2507_s25  ;;  %p651_p3 = pnand %p1771_p1, %p650_p2 }
   0xe   : > { %p44_p4 = scmp.ge.s32.totalorder %s2509_s3, 2  ;;  %s2493_s6 = sld [smem:[#allocation13_spill]] (!%p651_p3) }
   0xf   : > { %654 = sbr.rel (%p651_p3) target bundleno = 2780 (0xadc), region = 100  ;;  %p744_p5 = scmp.lt.s32.totalorder (!%p651_p3), %s2022_s22, 1 }
  0x10   : > { %s2511_s3 = smov (%p44_p4, %s2509_s3), 0  ;;  %p746_p6 = scmp.lt.s32.totalorder (!%p651_p3), %s2018_s1, 1 }
  0x11   : > { %2492 = sst [smem:[#allocation7_spill]] %s2511_s3  ;;  %s774_s29 = sadd.s32 (!%p651_p3), 1, %s2018_s1 }
  0x12   : > { %s2494_s21 = sld [smem:[#allocation12_spill]] (!%p651_p3)  ;;  %p2209_p7 = scmp.lt.s32.totalorder (!%p651_p3), %s774_s29, 1 }
  0x13   : > { %s2215_s26 = sadd.s32 (!%p651_p3), 4294967295, %s2018_s1  ;;  %s2497_s2 = sld [smem:[#allocation8_spill]] (!%p651_p3) }
  0x14   : > { %v882_v0 = vld [vmem:[%s2463_s8 + $0x8] sm:$0xf]  ;;  %vm901_vm0 = vcmask 1043456   ;;  %s2513_s22 = smov (!%p744_p5, %s2022_s22), 1  ;;  %v1879_v4 = vld [vmem:[%s2493_s6] sm:$0xff]  ;;  %p753_p8 = scmp.gt.s32.totalorder %s2215_s26, 0  ;;  %v932_v26 = vlaneseq }
  0x15   : > { %v1880_v1 = vld [vmem:[%s2493_s6 + $0x8] sm:$0xff]  ;;  %v893_v2 = vunpack.c.l.b16 %v882_v0  ;;  %s747_s3 = scalar_select %p746_p6, %s2018_s1, 1  ;;  %v1881_v8 = vld [vmem:[%s2463_s8] sm:$0xff]  ;;  %vm822_vm1 = vcmask 261120   ;;  %vm897_vm2 = vcmask 195584   ;;  %vm957_vm13 = vcmask 64512  }
  0x16   : > { %870 = vmatpush.bf16.msra.mxu1 %v1880_v1  ;;  %s2207_s25 = sshll.u32 %s2513_s22, 1  ;;  %s2515_s29 = smov (!%p2209_p7, %s774_s29), 1  ;;  %v1950_v16 = vld [vmem:[%s2460_s5] ss:$0 sm:$0xff]  ;;  %v933_v29 = vshrl.u32 %v932_v26, 7  ;;  %v939_v30 = vand.u32 127, %v932_v26 }
  0x17   : > { %v895_v5 = vpack.c.b16 %v893_v2, %v893_v2  ;;  %s749_s0 = sadd.s32 %s2207_s25, %s747_s3  ;;  %p1775_p9 = scmp.lt.s32.totalorder %s2215_s26, 1  ;;  %v1949_v24 = vld [vmem:[%s2464_s9] ss:$0 sm:$0xff]  ;;  %v2037_v45 = vmov -1e+30   ;;  %vm999_vm14 = vcmask 261248  }
  0x18   : > { %v1878_v3 = vld [vmem:[%s2494_s21 + $0x8] sm:$0xff]  ;;  %v1877_v6 = vld [vmem:[%s2494_s21] sm:$0xff]  ;;  %s2220_s22 = sshll.u32 %s749_s0, 3  ;;  %s2496_s21 = sld [smem:[#allocation10_spill]]  ;;  %vm982_vm15 = vcmask 130048  }
  0x19   : > { %832 = vmatpush.bf16.msra.mxu0 %v1878_v3  ;;  %v903_v7 = vsel %vm901_vm0, %v895_v5, 0  ;;  %s751_s20 = scalar_lea.vmem %s2497_s2, %s2220_s22  ;;  %s2517_s29 = smov (!%p2209_p7, %s2515_s29), 1  ;;  %v1948_v31 = vld [vmem:[%s2462_s7] ss:$0 sm:$0xff]  ;;  %vm1063_vm0 = vcmask 326912  }
  0x1a   : > { %911 = vmatpush.bf16.msra.mxu2 %v903_v7  ;;  %871 = vmatpush.bf16.msra.mxu1 %v1879_v4  ;;  %v2236_v9 = vld [vmem:[%s751_s20] sm:$0xff]  ;;  %s754_s0 = scalar_select %p753_p8, %s2215_s26, 0 }
  0x1b   : > { %v805_v10 = vpack.c.bf16 %v2236_v9, %v2236_v9  ;;  %s782_s6 = sadd.s32 %s2207_s25, %s2517_s29  ;;  %s2498_s2 = sld [smem:[#allocation11_spill]] }
  0x1c   : > { %s2519_s0 = smov (!%p1775_p9, %s754_s0), 1  ;;  %s2499_s4 = sld [smem:[#allocation9_spill]] }
  0x1d   : > { %833 = vmatpush.bf16.msra.mxu0 %v1877_v6  ;;  %s760_s20 = sadd.s32 %s2519_s0, %s2207_s25  ;;  %s2036_s25 = smov 120  }
  0x1e   : > { %s773_s3 = scalar_lea.vmem %s2496_s21, %s2220_s22  ;;  %912 = vmatpush.bf16.msra.mxu2 %v1881_v8  ;;  %s1788_s21 = sshll.u32 %s782_s6, 3 }
  0x1f   : > { %v799_v11 = vld [vmem:[%s773_s3] sm:$0xff]  ;;  %s1781_s30 = sshll.u32 %s760_s20, 3  ;;  %s1814_s0 = sshll.u32 %s2018_s1, 3 }
  0x20   : > { %1799 = vmatmul.msk.bf16.vlgmr.msra.gmra.mxu0 %vm822_vm1, %v805_v10  ;;  %s1816_s23 = sshll.u32 %s2215_s26, 3  ;;  %v934_v27 = vstv %s1814_s0  ;;  %s2038_s1 = smov 16  }
  0x21   : > { %s784_s27 = scalar_lea.vmem %s2498_s2, %s1788_s21  ;;  %v940_v28 = vstv %s1816_s23  ;;  %v935_v33 = vadd.s32 %v934_v27, %v933_v29  ;;  %v942_v35 = vadd.s32 %v939_v30, %v934_v27  ;;  %s2039_s26 = smov 112  }
  0x22   : > { %v800_v12 = vld [vmem:[%s784_s27] sm:$0xff]  ;;  %s762_s3 = scalar_lea.vmem %s2499_s4, %s1781_s30  ;;  %v941_v34 = vadd.s32 %v940_v28, %v939_v30  ;;  %s2040_s30 = smov 96  }
  0x23   : > { %v883_v13 = vpack.c.bf16 %v800_v12, %v799_v11  ;;  %v798_v14 = vld [vmem:[%s762_s3] sm:$0xff]  ;;  %v1817_v37 = vadd.s32 4294967292, %v935_v33  ;;  %v950_v41 = vadd.s32 3, %v935_v33  ;;  %vm949_vm6 = vcmp.ge.s32.totalorder %v942_v35, %v935_v33  ;;  %s2041_s28 = smov 88   ;;  %s2042_s29 = smov 104  }
  0x24   : > { %v844_v15 = vpack.c.bf16 %v2236_v9, %v798_v14  ;;  %vm945_vm3 = vcmp.le.s32.totalorder %v941_v34, %v935_v33  ;;  %vm947_vm4 = vcmp.ge.s32.totalorder %v941_v34, 0  ;;  %vm953_vm9 = vcmp.lt.s32.totalorder %v942_v35, 16  ;;  %s2043_s4 = smov 72   ;;  %s2044_s3 = smov 80  }
  0x25   : > { %1813 = vmatmul.msk.bf16.vlgmr.msra.gmra.mxu2 %vm897_vm2, %v883_v13  ;;  %vm944_vm5 = vcmp.ge.s32.totalorder %v941_v34, %v1817_v37  ;;  %vm951_vm8 = vcmp.le.s32.totalorder %v942_v35, %v950_v41  ;;  %s2045_s6 = smov 32   ;;  %s2046_s21 = smov 40   ;;  %vm1149_vm2 = vcmask 130112  }
  0x26   : > { %1808 = vmatmul.msk.bf16.vlgmr.msra.gmra.mxu1 %vm822_vm1, %v844_v15  ;;  %vm946_vm7 = vmand %vm944_vm5, %vm945_vm3  ;;  %s2048_s0 = smov 56   ;;  %s2049_s23 = smov 48   ;;  %vm1178_vm3 = vcmask 392512   ;;  %vm1290_vm5 = vcmask 458112  }
  0x27   : > { %vm948_vm10 = vmand %vm946_vm7, %vm947_vm4  ;;  %s2050_s24 = smov 24   ;;  %vm1261_vm4 = vcmask 195712   ;;  %vm1402_vm7 = vcmask 523712  }
  0x28   : > { %vm952_vm11 = vmand %vm949_vm6, %vm951_vm8  ;;  %v2269_v46 = vsel %vm948_vm10, 0.0, %v2037_v45  ;;  %vm1373_vm6 = vcmask 261312   ;;  %vm1438_vm8 = vcmask 523264  }
  0x29   : > { %vm954_vm12 = vmand %vm952_vm11, %vm953_vm9 }
  0x2a   : > { %v956_v51 = vsel %vm954_vm12, 0.0, %v2037_v45 }
  0x9d   : > { %v835_v17 = vpop.f32.mrf.mxu0 }
  0x9e   : > { %v836_v18 = vadd.f32 %v1950_v16, %v835_v17 }
  0xa0   : > { %v839_v19 = vpack.c.bf16 %v836_v18, %v836_v18 }
  0xa2   : > { %v1066_v20 = vunpack.c.l.b16 %v839_v19 }
  0xa3   : > { %v873_v23 = vpop.f32.mrf.mxu1 }
  0xa4   : > { %v2257_v21 = vpack.c.b16 %v1066_v20, %v1066_v20  ;;  %v874_v38 = vadd.f32 %v1948_v31, %v873_v23 }
  0xa5   : > { %v837_v22 = vpop.f32.mrf.mxu0 }
  0xa6   : > { %1068 = vrot.lane.b32.xlu1 %v2257_v21, %s2036_s25  ;;  %v878_v47 = vpack.c.bf16 %v874_v38, %v874_v38 }
  0xa8   : > { %v914_v25 = vpop.f32.mrf.mxu2  ;;  %v923_v53 = vunpack.c.l.b16 %v878_v47 }
  0xa9   : > { %v915_v32 = vadd.f32 %v1949_v24, %v914_v25 }
  0xab   : > { %v875_v36 = vpop.f32.mrf.mxu1  ;;  %v919_v39 = vpack.c.bf16 %v915_v32, %v915_v32 }
  0xac   : > { %v876_v42 = vadd.f32 %v1948_v31, %v875_v36 }
  0xad   : > { %v928_v48 = vunpack.c.l.b16 %v919_v39 }
  0xae   : > { %v879_v49 = vpack.c.bf16 %v876_v42, %v876_v42  ;;  %995 = vrot.lane.b32.xlu1 %v956_v51, %s2038_s1 }
  0xb0   : > { %v916_v40 = vpop.f32.mrf.mxu2  ;;  %v924_v54 = vunpack.c.l.b16 %v879_v49 }
  0xb1   : > { %v917_v43 = vadd.f32 %v1949_v24, %v916_v40 }
  0xb2   : > { %v2278_v56 = vpack.c.b16 %v924_v54, %v923_v53 }
  0xb3   : > { %v920_v44 = vpack.c.bf16 %v917_v43, %v917_v43 }
  0xb4   : > { %v962_v57 = vsel %vm957_vm13, %v2278_v56, 0 }
  0xb5   : > { %v929_v50 = vunpack.c.l.b16 %v920_v44 }
  0xb7   : > { %v2271_v52 = vpack.c.b16 %v929_v50, %v928_v48 }
  0xb9   : > { %1072 = vrot.lane.b32.xlu0 %v2271_v52, %s2036_s25  ;;  %v965_v55 = vsel %vm957_vm13, %v2271_v52, 0 }
  0xba   : > { %973 = vmatpush.bf16.xpose.msra.mxu3 %v965_v55 }
  0xc1   : > { %1070 = vrot.lane.b32.xlu0 %v2278_v56, %s2036_s25  ;;  %s2047_s25 = smov 8  }
  0xc2   : > { %974 = vmatpush.bf16.xpose.msra.mxu3 %v962_v57 }
  0xc9   : > { %1818 = vmatmul.msk.bf16.vlgmr.msra.gmra.mxu3 %vm957_vm13, %v839_v19 }
 0x118   : > { %v1069_v62 = vpop.permute.xlu1 %1068 }
 0x120   : > { %v2288_v0 = vpop.permute.xlu1 %995 }
 0x12b   : > { %v1073_v58 = vpop.permute.xlu0 %1072 }
 0x12c   : > { %v1081_v59 = vsel %vm957_vm13, %v1073_v58, 0 }
 0x12d   : > { %1089 = vmatpush.bf16.xpose.msrb.mxu2 %v1081_v59 }
 0x133   : > { %v1071_v60 = vpop.permute.xlu0 %1070 }
 0x134   : > { %v1078_v61 = vsel %vm957_vm13, %v1071_v60, 0 }
 0x135   : > { %1090 = vmatpush.bf16.xpose.msrb.mxu2 %v1078_v61 }
 0x13c   : > { %1821 = vmatmul.msk.bf16.vlgmr.msrb.gmra.mxu2 %vm957_vm13, %v1069_v62 }
 0x14c   : > { %v976_v63 = vpop.f32.mrf.mxu3 }
 0x14d   : > { %v980_v1 = vmul.f32 0.35355338, %v976_v63 }
 0x14f   : > { %v998_v2 = vadd.f32 %v2288_v0, %v980_v1  ;;  %v981_v14 = vadd.f32 %v980_v1, %v2269_v46 }
 0x151   : > { %v1000_v3 = vsel %vm999_vm14, %v998_v2, -inf  ;;  %v983_v15 = vsel %vm982_vm15, %v981_v14, -inf }
 0x152   : > { %1001 = vmax.xlane.f32.xlu2 %v1000_v3 }
 0x154   : > { %v978_v4 = vpop.f32.mrf.mxu3 }
 0x1bf   : > { %v1092_v5 = vpop.f32.mrf.mxu2 }
 0x1c0   : > { %v2292_v6 = vmul.f32 0.35355338, %v1092_v5 }
 0x1c2   : > { %v1109_v7 = vadd.f32 %v2292_v6, %v2288_v0 }
 0x1c4   : > { %v1110_v8 = vsel %vm999_vm14, %v1109_v7, -inf }
 0x1c5   : > { %1111 = vmax.xlane.f32.xlu2 %v1110_v8  ;;  %v1002_v10 = vpop.xlane.xlu2 %1001 }
 0x1c6   : > { %v1003_v11 = vsub.f32 %v998_v2, %v1002_v10 }
 0x1c7   : > { %v1094_v12 = vpop.f32.mrf.mxu2 }
 0x1c8   : > { %v1004_v13 = vmul.f32 1.442695, %v1003_v11 }
 0x1ca   : > { %1958 = vpow2.f32 %v1004_v13 }
 0x1cd   : > { %984 = vmax.xlane.f32.xlu2 %v983_v15 }
 0x1d0   : > { %v1959_v16 = vpop.eup %1958 }
 0x1d1   : > { %1007 = vrot.lane.b32.xlu0 %v1959_v16, %s2039_s26 }
 0x238   : > { %v1112_v17 = vpop.xlane.xlu2 %1111 }
 0x239   : > { %v1113_v18 = vsub.f32 %v1109_v7, %v1112_v17 }
 0x23b   : > { %v1114_v19 = vmul.f32 1.442695, %v1113_v18 }
 0x23d   : > { %1960 = vpow2.f32 %v1114_v19 }
 0x240   : > { %v985_v20 = vpop.xlane.xlu2 %984 }
 0x241   : > { %v986_v22 = vsub.f32 %v981_v14, %v985_v20 }
 0x243   : > { %v1961_v23 = vpop.eup %1960  ;;  %v987_v24 = vmul.f32 1.442695, %v986_v22  ;;  %v1008_v25 = vpop.permute.xlu0 %1007 }
 0x244   : > { %1117 = vrot.lane.b32.xlu1 %v1961_v23, %s2039_s26  ;;  %v1010_v26 = vsel %vm982_vm15, %v1008_v25, 0.0 }
 0x245   : > { %1962 = vpow2.f32 %v987_v24  ;;  %1011 = vadd.xlane.f32.xlu0 %v1010_v26 }
 0x24b   : > { %v1963_v27 = vpop.eup %1962 }
 0x24c   : > { %v989_v28 = vsel %vm982_vm15, %v1963_v27, 0.0 }
 0x24d   : > { %990 = vadd.xlane.f32.xlu2 %v989_v28 }
 0x265   : > { %1016 = vrot.lane.b32.xlu2 %v2278_v56, %s2040_s30 }
 0x26d   : > { %1040 = vrot.lane.b32.xlu2 %v2271_v52, %s2040_s30 }
 0x275   : > { %1155 = vrot.lane.b32.xlu2 %v2271_v52, %s2041_s28 }
 0x27d   : > { %1296 = vrot.lane.b32.xlu2 %v2271_v52, %s2042_s29 }
 0x2b6   : > { %v1118_v29 = vpop.permute.xlu1 %1117 }
 0x2b7   : > { %v1120_v30 = vsel %vm982_vm15, %v1118_v29, 0.0 }
 0x2b8   : > { %v1012_v31 = vpop.xlane.xlu0 %1011  ;;  %1121 = vadd.xlane.f32.xlu1 %v1120_v30 }
 0x2b9   : > { %1964 = vrcp.f32 %v1012_v31 }
 0x2bf   : > { %v1965_v32 = vpop.eup %1964 }
 0x2c0   : > { %v991_v33 = vpop.xlane.xlu2 %990  ;;  %v1014_v34 = vmul.f32 %v1965_v32, %v1959_v16  ;;  %v1097_v32 = vadd.f32 %v2292_v6, %v2269_v46 }
 0x2c1   : > { %1966 = vrcp.f32 %v991_v33 }
 0x2c2   : > { %v1036_v35 = vpack.c.bf16 %v1014_v34, %v1014_v34  ;;  %v1098_v33 = vsel %vm982_vm15, %v1097_v32, -inf }
 0x2c4   : > { %1038 = vrot.lane.b32.xlu0 %v1036_v35, %s2039_s26 }
 0x2c7   : > { %v1967_v36 = vpop.eup %1966 }
 0x2c8   : > { %v993_v37 = vmul.f32 %v1967_v36, %v1963_v27  ;;  %v1017_v38 = vpop.permute.xlu2 %1016 }
 0x2c9   : > { %1029 = vmatpush.bf16.msrb.mxu0 %v1017_v38 }
 0x2ca   : > { %v1015_v39 = vpack.c.bf16 %v993_v37, %v993_v37 }
 0x2cc   : > { %1182 = vrot.lane.b32.xlu0 %v2278_v56, %s2039_s26  ;;  %1819 = vmatmul.msk.bf16.vlgmr.msrb.gmra.mxu0 %vm982_vm15, %v1015_v39 }
 0x2d0   : > { %v1041_v40 = vpop.permute.xlu2 %1040 }
 0x2d1   : > { %1184 = vrot.lane.b32.xlu1 %v2271_v52, %s2039_s26  ;;  %1053 = vmatpush.bf16.msrb.mxu1 %v1041_v40 }
 0x2d4   : > { %1292 = vrot.lane.b32.xlu0 %v2257_v21, %s2042_s29 }
 0x2d8   : > { %v1156_v41 = vpop.permute.xlu2 %1155 }
 0x2d9   : > { %1180 = vrot.lane.b32.xlu1 %v2257_v21, %s2039_s26  ;;  %1168 = vmatpush.bf16.msra.mxu0 %v1156_v41 }
 0x2e0   : > { %v1297_v42 = vpop.permute.xlu2 %1296 }
 0x2e1   : > { %v1305_v43 = vsel %vm957_vm13, %v1297_v42, 0 }
 0x2e2   : > { %1313 = vmatpush.bf16.xpose.msrb.mxu0 %v1305_v43 }
 0x32b   : > { %v1122_v44 = vpop.xlane.xlu1 %1121 }
 0x32c   : > { %1968 = vrcp.f32 %v1122_v44 }
 0x332   : > { %v1969_v45 = vpop.eup %1968 }
 0x333   : > { %v1124_v47 = vmul.f32 %v1969_v45, %v1961_v23 }
 0x335   : > { %v1151_v48 = vpack.c.bf16 %v1124_v47, %v1124_v47 }
 0x336   : > { %v1039_v49 = vpop.permute.xlu0 %1038 }
 0x337   : > { %1153 = vrot.lane.b32.xlu2 %v1151_v48, %s2039_s26  ;;  %1820 = vmatmul.msk.bf16.vlgmr.msrb.gmra.mxu1 %vm982_vm15, %v1039_v49 }
 0x33e   : > { %v1183_v51 = vpop.permute.xlu0 %1182 }
 0x33f   : > { %1294 = vrot.lane.b32.xlu2 %v2278_v56, %s2042_s29  ;;  %v1190_v54 = vsel %vm957_vm13, %v1183_v51, 0 }
 0x343   : > { %v1185_v50 = vpop.permute.xlu1 %1184 }
 0x344   : > { %v1193_v21 = vsel %vm957_vm13, %v1185_v50, 0 }
 0x345   : > { %1201 = vmatpush.bf16.xpose.msra.mxu1 %v1193_v21 }
 0x346   : > { %v1293_v61 = vpop.permute.xlu0 %1292 }
 0x349   : > { %v1031_v53 = vpop.f32.mrf.mxu0 }
 0x34a   : > { %1035 = vst.msk [vmem:[#allocation2] sm:$0xff] %vm957_vm13, %v1031_v53 }
 0x34b   : > { %v1181_v57 = vpop.permute.xlu1 %1180 }
 0x34d   : > { %1202 = vmatpush.bf16.xpose.msra.mxu1 %v1190_v54 }
 0x351   : > { %v1033_v55 = vpop.f32.mrf.mxu0 }
 0x354   : > { %1824 = vmatmul.msk.bf16.vlgmr.msra.gmra.mxu1 %vm957_vm13, %v1181_v57 }
 0x391   : > { %v1154_v58 = vpop.permute.xlu2 %1153 }
 0x392   : > { %1823 = vmatmul.msk.bf16.vlgmr.msra.gmra.mxu0 %vm982_vm15, %v1154_v58 }
 0x399   : > { %v1295_v59 = vpop.permute.xlu2 %1294 }
 0x39a   : > { %v1302_v60 = vsel %vm957_vm13, %v1295_v59, 0 }
 0x39b   : > { %1314 = vmatpush.bf16.xpose.msrb.mxu0 %v1302_v60 }
 0x3a2   : > { %1827 = vmatmul.msk.bf16.vlgmr.msrb.gmra.mxu0 %vm957_vm13, %v1293_v61 }
 0x3b4   : > { %v2332_v62 = vpop.f32.mrf.mxu1 }
 0x3bc   : > { %v1057_v63 = vpop.f32.mrf.mxu1 }
 0x3d1   : > { %v1204_v1 = vpop.f32.mrf.mxu1 }
 0x3d2   : > { %v1208_v2 = vmul.f32 0.35355338, %v1204_v1 }
 0x3d4   : > { %v1221_v3 = vadd.f32 %v1208_v2, %v2288_v0  ;;  %v1209_v7 = vadd.f32 %v1208_v2, %v2269_v46 }
 0x3d6   : > { %v1222_v4 = vsel %vm999_vm14, %v1221_v3, -inf  ;;  %v1210_v8 = vsel %vm982_vm15, %v1209_v7, -inf }
 0x3d7   : > { %1223 = vmax.xlane.f32.xlu2 %v1222_v4 }
 0x3d9   : > { %v1206_v5 = vpop.f32.mrf.mxu1 }
 0x3df   : > { %1211 = vmax.xlane.f32.xlu2 %v1210_v8 }
 0x40f   : > { %v2338_v10 = vpop.f32.mrf.mxu0 }
 0x417   : > { %v1172_v11 = vpop.f32.mrf.mxu0 }
 0x41f   : > { %v1316_v12 = vpop.f32.mrf.mxu0 }
 0x420   : > { %v1320_v13 = vmul.f32 0.35355338, %v1316_v12 }
 0x422   : > { %v1333_v14 = vadd.f32 %v1320_v13, %v2288_v0  ;;  %v1321_v17 = vadd.f32 %v1320_v13, %v2269_v46 }
 0x424   : > { %v1334_v15 = vsel %vm999_vm14, %v1333_v14, -inf  ;;  %v1322_v18 = vsel %vm982_vm15, %v1321_v17, -inf }
 0x425   : > { %1335 = vmax.xlane.f32.xlu1 %v1334_v15 }
 0x427   : > { %v1318_v16 = vpop.f32.mrf.mxu0 }
 0x42d   : > { %1323 = vmax.xlane.f32.xlu1 %v1322_v18 }
 0x44a   : > { %v1224_v19 = vpop.xlane.xlu2 %1223 }
 0x44b   : > { %v1225_v20 = vsub.f32 %v1221_v3, %v1224_v19 }
 0x44d   : > { %v1226_v22 = vmul.f32 1.442695, %v1225_v20 }
 0x44f   : > { %1970 = vpow2.f32 %v1226_v22 }
 0x452   : > { %v1212_v23 = vpop.xlane.xlu2 %1211 }
 0x453   : > { %v1213_v24 = vsub.f32 %v1209_v7, %v1212_v23 }
 0x455   : > { %v2344_v25 = vpop.eup %1970  ;;  %v1214_v26 = vmul.f32 1.442695, %v1213_v24 }
 0x456   : > { %1229 = vrot.lane.b32.xlu0 %v2344_v25, %s2039_s26 }
 0x457   : > { %1972 = vpow2.f32 %v1214_v26 }
 0x45d   : > { %v1973_v0 = vpop.eup %1972 }
 0x45e   : > { %v1216_v27 = vsel %vm982_vm15, %v1973_v0, 0.0 }
 0x45f   : > { %1217 = vadd.xlane.f32.xlu1 %v1216_v27  ;;  %v1884_v27 = vld [vmem:[%s2465_s10 + $0x10] sm:$0xff] }
 0x498   : > { %v1336_v28 = vpop.xlane.xlu1 %1335 }
 0x499   : > { %v1337_v29 = vsub.f32 %v1333_v14, %v1336_v28  ;;  %v1883_v28 = vld [vmem:[%s2465_s10 + $0x8] sm:$0xff] }
 0x49b   : > { %v1338_v30 = vmul.f32 1.442695, %v1337_v29  ;;  %v1882_v29 = vld [vmem:[%s2465_s10] sm:$0xff] }
 0x49d   : > { %1974 = vpow2.f32 %v1338_v30 }
 0x4a0   : > { %v1324_v34 = vpop.xlane.xlu1 %1323 }
 0x4a1   : > { %v1325_v35 = vsub.f32 %v1321_v17, %v1324_v34 }
 0x4a3   : > { %v1975_v31 = vpop.eup %1974  ;;  %v1326_v37 = vmul.f32 1.442695, %v1325_v35  ;;  %v1951_v35 = vld [vmem:[%s2466_s11] ss:$0 sm:$0xff] }
 0x4a4   : > { %1341 = vrot.lane.b32.xlu0 %v1975_v31, %s2039_s26 }
 0x4a5   : > { %1976 = vpow2.f32 %v1326_v37 }
 0x4ab   : > { %v1977_v46 = vpop.eup %1976 }
 0x4ac   : > { %v1328_v6 = vsel %vm982_vm15, %v1977_v46, 0.0 }
 0x4c8   : > { %v1230_v36 = vpop.permute.xlu0 %1229 }
 0x4c9   : > { %v1232_v47 = vsel %vm982_vm15, %v1230_v36, 0.0 }
 0x4ce   : > { %1099 = vmax.xlane.f32.xlu0 %v1098_v33 }
 0x4d2   : > { %v1218_v48 = vpop.xlane.xlu1 %1217 }
 0x4e2   : > { %1126 = vrot.lane.b32.xlu0 %v2278_v56, %s2041_s28 }
 0x4ea   : > { %1379 = vrot.lane.b32.xlu0 %v2271_v52, %s2043_s4 }
 0x516   : > { %v1342_v38 = vpop.permute.xlu0 %1341 }
 0x517   : > { %v1344_v39 = vsel %vm982_vm15, %v1342_v38, 0.0 }
 0x518   : > { %1345 = vadd.xlane.f32.xlu1 %v1344_v39 }
 0x520   : > { %1329 = vadd.xlane.f32.xlu1 %v1328_v6  ;;  %v2051_v6 = vmov 32.0  }
 0x539   : > { %1267 = vrot.lane.b32.xlu1 %v2271_v52, %s2044_s3 }
 0x541   : > { %v1100_v40 = vpop.xlane.xlu0 %1099 }
 0x542   : > { %v1101_v41 = vsub.f32 %v1097_v32, %v1100_v40 }
 0x544   : > { %v1102_v42 = vmul.f32 1.442695, %v1101_v41 }
 0x546   : > { %1978 = vpow2.f32 %v1102_v42 }
 0x54c   : > { %v1979_v43 = vpop.eup %1978 }
 0x54d   : > { %v1104_v44 = vsel %vm982_vm15, %v1979_v43, 0.0 }
 0x54e   : > { %1105 = vadd.xlane.f32.xlu2 %v1104_v44 }
 0x554   : > { %v1127_v45 = vpop.permute.xlu0 %1126 }
 0x555   : > { %1139 = vmatpush.bf16.msrb.mxu3 %v1127_v45 }
 0x556   : > { %1233 = vadd.xlane.f32.xlu2 %v1232_v47 }
 0x56e   : > { %1238 = vrot.lane.b32.xlu2 %v2278_v56, %s2044_s3 }
 0x58b   : > { %v1346_v49 = vpop.xlane.xlu1 %1345 }
 0x58c   : > { %1980 = vrcp.f32 %v1346_v49 }
 0x592   : > { %v1981_v50 = vpop.eup %1980 }
 0x593   : > { %v1348_v52 = vmul.f32 %v1981_v50, %v1975_v31  ;;  %v1330_v51 = vpop.xlane.xlu1 %1329 }
 0x595   : > { %v1375_v21 = vpack.c.bf16 %v1348_v52, %v1348_v52  ;;  %v1887_v52 = vld [vmem:[%s2469_s14 + $0x8] sm:$0xff] }
 0x596   : > { %1530 = vmatpush.bf16.msra.mxu0 %v1887_v52 }
 0x597   : > { %1377 = vrot.lane.b32.xlu0 %v1375_v21, %s2039_s26  ;;  %v1886_v21 = vld [vmem:[%s2469_s14] sm:$0xff] }
 0x59a   : > { %1531 = vmatpush.bf16.msra.mxu0 %v1886_v21 }
 0x59f   : > { %1060 = vrot.lane.b32.xlu0 %v2332_v62, %s2045_s6  ;;  %v1380_v62 = vpop.permute.xlu0 %1379 }
 0x5ab   : > { %v1268_v53 = vpop.permute.xlu1 %1267 }
 0x5ac   : > { %1280 = vmatpush.bf16.msra.mxu3 %v1268_v53 }
 0x5c1   : > { %v1106_v54 = vpop.xlane.xlu2 %1105 }
 0x5c2   : > { %1982 = vrcp.f32 %v1106_v54 }
 0x5c3   : > { %1984 = vrcp.f32 %v1218_v48 }
 0x5c8   : > { %v1983_v55 = vpop.eup %1982 }
 0x5c9   : > { %v1108_v57 = vmul.f32 %v1983_v55, %v1979_v43  ;;  %v1234_v58 = vpop.xlane.xlu2 %1233  ;;  %v1985_v60 = vpop.eup %1984  ;;  %v1890_v55 = vld [vmem:[%s2471_s16 + $0x10] sm:$0xff] }
 0x5ca   : > { %1986 = vrcp.f32 %v1234_v58  ;;  %v1220_v61 = vmul.f32 %v1985_v60, %v1973_v0  ;;  %v1885_v0 = vld [vmem:[%s2465_s10 + $0x18] sm:$0xff] }
 0x5cb   : > { %v1125_v59 = vpack.c.bf16 %v1108_v57, %v1108_v57  ;;  %1988 = vrcp.f32 %v1330_v51  ;;  %v1891_v51 = vld [vmem:[%s2471_s16 + $0x18] sm:$0xff] }
 0x5cc   : > { %v1237_v3 = vpack.c.bf16 %v1220_v61, %v1220_v61  ;;  %1990 = vrcp.f32 %v2051_v6 }
 0x5cd   : > { %1822 = vmatmul.msk.bf16.vlgmr.msrb.gmra.mxu3 %vm982_vm15, %v1125_v59 }
 0x5ce   : > { %1446 = vmatpush.bf16.msrb.mxu3 %v1885_v0 }
 0x5d0   : > { %v1987_v63 = vpop.eup %1986 }
 0x5d1   : > { %v1239_v1 = vpop.permute.xlu2 %1238  ;;  %v1236_v2 = vmul.f32 %v1987_v63, %v2344_v25  ;;  %v1989_v11 = vpop.eup %1988 }
 0x5d2   : > { %1251 = vmatpush.bf16.msra.mxu2 %v1239_v1  ;;  %v1332_v12 = vmul.f32 %v1989_v11, %v1977_v46  ;;  %1447 = vmatpush.bf16.msrb.mxu3 %v1884_v27  ;;  %v1991_v40 = vpop.eup %1990  ;;  %v1889_v11 = vld [vmem:[%s2471_s16 + $0x8] sm:$0xff] }
 0x5d3   : > { %v1263_v4 = vpack.c.bf16 %v1236_v2, %v1236_v2  ;;  %v1467_v41 = vmul.f32 32.0, %v1991_v40  ;;  %vm1471_vm9 = vweird.f32 %v1991_v40  ;;  %v1952_v2 = vld [vmem:[%s2467_s12] ss:$0 sm:$0xff] }
 0x5d4   : > { %v1349_v14 = vpack.c.bf16 %v1332_v12, %v1332_v12  ;;  %v1888_v12 = vld [vmem:[%s2471_s16] sm:$0xff] }
 0x5d5   : > { %1265 = vrot.lane.b32.xlu2 %v1263_v4, %s2039_s26  ;;  %1825 = vmatmul.msk.bf16.vlgmr.msra.gmra.mxu2 %vm982_vm15, %v1237_v3  ;;  %v1468_v42 = vsub.f32 1.0, %v1467_v41  ;;  %v1953_v3 = vld [vmem:[%s2468_s13] ss:$0 sm:$0xff]  ;;  %s2500_s26 = sld [smem:[#allocation14_spill]] }
 0x5d6   : > { %1392 = vmatpush.bf16.msrb.mxu2 %v1380_v62  ;;  %1448 = vmatpush.bf16.msrb.mxu3 %v1883_v28 }
 0x5d7   : > { %v1469_v43 = vmul.f32 %v1991_v40, %v1468_v42 }
 0x5d9   : > { %v1470_v44 = vadd.f32 %v1991_v40, %v1469_v43 }
 0x5da   : > { %1449 = vmatpush.bf16.msrb.mxu3 %v1882_v29 }
 0x5db   : > { %v1472_v45 = vsel %vm1471_vm9, %v1991_v40, %v1470_v44  ;;  %s795_s30 = scalar_lea.vmem %s2500_s26, %s2220_s22 }
 0x5dd   : > { %1350 = vrot.lane.b32.xlu2 %v2278_v56, %s2043_s4 }
 0x5e5   : > { %1175 = vrot.lane.b32.xlu2 %v2338_v10, %s2046_s21 }
 0x609   : > { %v1378_v5 = vpop.permute.xlu0 %1377 }
 0x60a   : > { %1829 = vmatmul.msk.bf16.vlgmr.msrb.gmra.mxu2 %vm982_vm15, %v1378_v5 }
 0x611   : > { %v1061_v7 = vpop.permute.xlu0 %1060 }
 0x612   : > { %1064 = vst.msk [vmem:[#allocation2] sm:$0xff] %vm1063_vm0, %v1061_v7 }
 0x62f   : > { %v1266_v8 = vpop.permute.xlu2 %1265 }
 0x630   : > { %1826 = vmatmul.msk.bf16.vlgmr.msra.gmra.mxu3 %vm982_vm15, %v1266_v8 }
 0x637   : > { %v1351_v13 = vpop.permute.xlu2 %1350 }
 0x638   : > { %1363 = vmatpush.bf16.msrb.mxu1 %v1351_v13  ;;  %v1954_v13 = vld [vmem:[%s2470_s15] ss:$0 sm:$0xff] }
 0x63b   : > { %1828 = vmatmul.msk.bf16.vlgmr.msrb.gmra.mxu1 %vm982_vm15, %v1349_v14 }
 0x63c   : > { %1582 = vmatpush.bf16.msra.mxu1 %v1891_v51 }
 0x63f   : > { %v1176_v25 = vpop.permute.xlu2 %1175 }
 0x640   : > { %1583 = vmatpush.bf16.msra.mxu1 %v1890_v55 }
 0x644   : > { %1584 = vmatpush.bf16.msra.mxu1 %v1889_v11 }
 0x648   : > { %1585 = vmatpush.bf16.msra.mxu1 %v1888_v12 }
 0x650   : > { %v1141_v56 = vpop.f32.mrf.mxu3 }
 0x651   : > { %1146 = vrot.lane.b32.xlu1 %v1141_v56, %s2047_s25 }
 0x658   : > { %v1143_v10 = vpop.f32.mrf.mxu3  ;;  %v1253_v15 = vpop.f32.mrf.mxu2 }
 0x659   : > { %1258 = vrot.lane.b32.xlu0 %v1253_v15, %s2038_s1 }
 0x660   : > { %v1255_v16 = vpop.f32.mrf.mxu2 }
 0x68d   : > { %v1394_v17 = vpop.f32.mrf.mxu2 }
 0x68e   : > { %1399 = vrot.lane.b32.xlu0 %v1394_v17, %s2048_s0  ;;  %v1955_v17 = vld [vmem:[%s2472_s17] ss:$0 sm:$0xff] }
 0x695   : > { %v1396_v18 = vpop.f32.mrf.mxu2 }
 0x6b3   : > { %v1282_v19 = vpop.f32.mrf.mxu3 }
 0x6b4   : > { %1287 = vrot.lane.b32.xlu1 %v1282_v19, %s2049_s23 }
 0x6b8   : > { %v1365_v20 = vpop.f32.mrf.mxu1 }
 0x6b9   : > { %1370 = vrot.lane.b32.xlu2 %v1365_v20, %s2050_s24 }
 0x6bb   : > { %v1284_v22 = vpop.f32.mrf.mxu3 }
 0x6c0   : > { %v1367_v23 = vpop.f32.mrf.mxu1 }
 0x6c3   : > { %v1147_v24 = vpop.permute.xlu1 %1146 }
 0x6c4   : > { %1150 = vst.msk [vmem:[#allocation2] sm:$0xff] %vm1149_vm2, %v1147_v24 }
 0x6c5   : > { %1179 = vst.msk [vmem:[#allocation2] sm:$0xff] %vm1178_vm3, %v1176_v25 }
 0x6cb   : > { %v1259_v26 = vpop.permute.xlu0 %1258 }
 0x6cc   : > { %1262 = vst.msk [vmem:[#allocation2] sm:$0xff] %vm1261_vm4, %v1259_v26 }
 0x700   : > { %v1400_v32 = vpop.permute.xlu0 %1399 }
 0x713   : > { %v1371_v31 = vpop.permute.xlu2 %1370 }
 0x726   : > { %v1288_v30 = vpop.permute.xlu1 %1287 }
 0x727   : > { %1291 = vst.msk [vmem:[#allocation2] sm:$0xff] %vm1290_vm5, %v1288_v30 }
 0x728   : > { %1374 = vst.msk [vmem:[#allocation2] sm:$0xff] %vm1373_vm6, %v1371_v31 }
 0x729   : > { %1403 = vst.msk [vmem:[#allocation2] sm:$0xff] %vm1402_vm7, %v1400_v32 }
 0x730   : > { %v1404_v33 = vld [vmem:[#allocation2] sm:$0xff] }
 0x731   : > { %v1413_v34 = vpack.c.bf16 %v1404_v33, %v1404_v33 }
 0x733   : > { %1846 = vmatmul.msk.bf16.vlgmr.msrb.gmra.mxu3 %vm1438_vm8, %v1413_v34 }
 0x7b6   : > { %v1451_v36 = vpop.f32.mrf.mxu3 }
 0x7b7   : > { %v1455_v37 = vadd.f32 %v1451_v36, %v2236_v9 }
 0x7b9   : > { %v1460_v38 = vadd.f32 %v1951_v35, %v1455_v37  ;;  %v1956_v37 = vld [vmem:[%s2473_s18] ss:$0 sm:$0xff] }
 0x7bb   : > { %v1463_v39 = vsel %vm822_vm1, %v1460_v38, 0.0 }
 0x7bc   : > { %1464 = vadd.xlane.f32.xlu1 %v1463_v39  ;;  %v1957_v39 = vld [vmem:[%s2474_s19] ss:$0 sm:$0xff] }
 0x7be   : > { %v1453_v46 = vpop.f32.mrf.mxu3 }
 0x82f   : > { %v1465_v47 = vpop.xlane.xlu1 %1464 }
 0x830   : > { %v1473_v48 = vmul.f32 %v1472_v45, %v1465_v47 }
 0x832   : > { %v1474_v49 = vsub.f32 %v1460_v38, %v1473_v48 }
 0x834   : > { %v1475_v50 = vmul.f32 %v1474_v49, %v1474_v49 }
 0x836   : > { %v1476_v9 = vsel %vm822_vm1, %v1475_v50, 0.0 }
 0x837   : > { %1477 = vadd.xlane.f32.xlu2 %v1476_v9 }
 0x8aa   : > { %v1478_v53 = vpop.xlane.xlu2 %1477 }
 0x8ab   : > { %v1479_v54 = vmul.f32 %v1478_v53, %v1472_v45 }
 0x8ad   : > { %v1480_v57 = vadd.f32 1e-05, %v1479_v54 }
 0x8af   : > { %1992 = vrsqrt.f32 %v1480_v57  ;;  %vm1487_vm11 = vweird.f32 %v1480_v57 }
 0x8b5   : > { %v1993_v58 = vpop.eup %1992 }
 0x8b6   : > { %v1482_v59 = vmul.f32 %v1993_v58, %v1480_v57  ;;  %vm1488_vm10 = vweird.f32 %v1993_v58 }
 0x8b7   : > { %vm1489_vm12 = vmor %vm1487_vm11, %vm1488_vm10 }
 0x8b8   : > { %v1483_v60 = vmul.f32 %v1993_v58, %v1482_v59 }
 0x8ba   : > { %v1484_v61 = vmul.f32 0.5, %v1483_v60 }
 0x8bc   : > { %v1485_v63 = vsub.f32 1.5, %v1484_v61 }
 0x8be   : > { %v1486_v1 = vmul.f32 %v1993_v58, %v1485_v63 }
 0x8c0   : > { %v1490_v62 = vsel %vm1489_vm12, %v1993_v58, %v1486_v1 }
 0x8c1   : > { %v1491_v4 = vmul.f32 %v1490_v62, %v1474_v49 }
 0x8c3   : > { %v1495_v5 = vmul.f32 %v1952_v2, %v1491_v4 }
 0x8c5   : > { %v1499_v7 = vadd.f32 %v1953_v3, %v1495_v5 }
 0x8c7   : > { %v1504_v8 = vpack.c.bf16 %v1499_v7, %v1499_v7 }
 0x8c9   : > { %1855 = vmatmul.msk.bf16.vlgmr.msra.gmra.mxu0 %vm822_vm1, %v1504_v8 }
 0x946   : > { %v1533_v14 = vpop.f32.mrf.mxu0 }
 0x947   : > { %v1534_v56 = vadd.f32 %v1954_v13, %v1533_v14 }
 0x949   : > { %v1537_v10 = vmax.f32 %v1534_v56, 0.0 }
 0x94b   : > { %v1546_v15 = vpack.c.bf16 %v1537_v10, %v1537_v10 }
 0x94d   : > { %1872 = vmatmul.msk.bf16.vlgmr.msra.gmra.mxu1 %vm1438_vm8, %v1546_v15 }
 0x94e   : > { %v1535_v16 = vpop.f32.mrf.mxu0 }
 0x9ca   : > { %v1587_v18 = vpop.f32.mrf.mxu1 }
 0x9cb   : > { %v1588_v19 = vadd.f32 %v1955_v17, %v1587_v18 }
 0x9cd   : > { %v1591_v20 = vadd.f32 %v1588_v19, %v1499_v7 }
 0x9cf   : > { %v1594_v22 = vsel %vm822_vm1, %v1591_v20, 0.0 }
 0x9d0   : > { %1595 = vadd.xlane.f32.xlu0 %v1594_v22 }
 0x9d2   : > { %v1589_v23 = vpop.f32.mrf.mxu1 }
 0xa43   : > { %v1596_v24 = vpop.xlane.xlu0 %1595 }
 0xa44   : > { %v1597_v25 = vmul.f32 %v1596_v24, %v1472_v45 }
 0xa46   : > { %v1598_v26 = vsub.f32 %v1591_v20, %v1597_v25 }
 0xa48   : > { %v1599_v0 = vmul.f32 %v1598_v26, %v1598_v26 }
 0xa4a   : > { %v1600_v27 = vsel %vm822_vm1, %v1599_v0, 0.0 }
 0xa4b   : > { %1601 = vadd.xlane.f32.xlu1 %v1600_v27 }
 0xabe   : > { %v1602_v28 = vpop.xlane.xlu1 %1601 }
 0xabf   : > { %v1603_v29 = vmul.f32 %v1602_v28, %v1472_v45 }
 0xac1   : > { %v1604_v30 = vadd.f32 1e-05, %v1603_v29 }
 0xac3   : > { %1994 = vrsqrt.f32 %v1604_v30  ;;  %vm1611_vm14 = vweird.f32 %v1604_v30 }
 0xac9   : > { %v1995_v31 = vpop.eup %1994 }
 0xaca   : > { %v1606_v32 = vmul.f32 %v1995_v31, %v1604_v30  ;;  %vm1612_vm13 = vweird.f32 %v1995_v31 }
 0xacb   : > { %vm1613_vm15 = vmor %vm1611_vm14, %vm1612_vm13 }
 0xacc   : > { %v1607_v33 = vmul.f32 %v1995_v31, %v1606_v32 }
 0xace   : > { %v1608_v34 = vmul.f32 0.5, %v1607_v33 }
 0xad0   : > { %v1609_v35 = vsub.f32 1.5, %v1608_v34 }
 0xad2   : > { %v1610_v36 = vmul.f32 %v1995_v31, %v1609_v35 }
 0xad4   : > { %v1614_v38 = vsel %vm1613_vm15, %v1995_v31, %v1610_v36 }
 0xad5   : > { %v1615_v46 = vmul.f32 %v1614_v38, %v1598_v26 }
 0xad7   : > { %v1619_v6 = vmul.f32 %v1956_v37, %v1615_v46 }
 0xad9   : > { %v1623_v40 = vadd.f32 %v1957_v39, %v1619_v6 }
 0xadb   : > { %1624 = vst.msk [vmem:[%s795_s30] sm:$0xff] %vm822_vm1, %v1623_v40 }
 0xadc PF: > { %s2501_s28 = sld [smem:[#allocation5_spill]] }
 0xadd   : > { %s2502_s1 = sld [smem:[#allocation3_spill]] }
 0xade   : > { %s2503_s22 = sld [smem:[#allocation4_spill]] }
 0xadf   : > { %s2504_s23 = sld [smem:[#allocation6_spill]] }
 0xae0   : > { %s2505_s24 = sld [smem:[#allocation7_spill]] }
 0xae2   : > { %s30_s2 = sadd.s32 1, %s2501_s28  }
 0xae3   : > { %p27_p10 = scmp.ge.s32.totalorder %s30_s2, 6  }
 0xae5   :  { %29 = sbr.rel (!%p27_p10) target bundleno = 8 (0x8), region = 139 }

</bundles_post_ra>
